<compile_context>
chip_gen: v7x
topology: tpu7x:2x2x1
jax: 0.10.0
libtpu: 0.0.40
codegen_flags: <defaults>
</compile_context>

<pallas_src>
import functools

import jax
import jax.numpy as jnp
from jax.experimental import pallas as pl
from jax.experimental.pallas import tpu as pltpu


# ------------------------------------------------------------------ small helpers

def _round_up(x, m):
    return ((x + m - 1) // m) * m


def _pad2d(x, rows, cols):
    return jnp.pad(x, ((0, rows - x.shape[0]), (0, cols - x.shape[1])))


def _vmem_limit_bytes():
    """~75% of physical VMEM per TensorCore (64 MiB on v7x, 128 MiB on v5e/v6e),
    capped so tiles + compiler scratch always have headroom."""
    try:
        cap = int(pltpu.get_tpu_info().vmem_capacity_bytes)
    except Exception:
        cap = 64 << 20  # conservative (v7x-sized) fallback
    return min((cap * 3) // 4, 96 << 20)


def _pick_tiles(m, n, k, a_item, b_item, budget):
    """VMEM-aware tile selection for the tiled matmul fallback.

    Prefers full-K tiles (single K step -> resident accumulator, no re-reads of
    the output tile), then the largest (tm, tn) that fits the double-buffered
    bf16 input tiles + f32 accumulator inside `budget`.  Finally, if the
    parallel grid collapsed to a single block, split one axis so both v7x
    TensorCores get work (irrelevant on single-TC v5e/v6e)."""
    def cands(dim, opts):
        cs = [c for c in opts if c <= dim and dim % c == 0]
        return cs if cs else [dim]          # full dim is always a legal block

    tms = cands(m, (512, 256, 128))
    tns = cands(n, (1024, 512, 256, 128))
    tks = sorted(set(cands(k, (2048, 1024, 512, 256, 128)) + [k]), reverse=True)

    def fits(tm, tn, tk):
        # 2x for double-buffered input tiles, plus the f32 accumulator.
        return (2 * (tm * tk * a_item + tk * tn * b_item) + tm * tn * 4) <= budget

    best = None
    for tk in tks:                          # largest K tile first (fewest K steps)
        for tm in tms:
            for tn in tns:
                if not fits(tm, tn, tk):
                    continue
                score = (tk, tm * tn, tn)
                if best is None or score > best[0]:
                    best = (score, (tm, tn, tk))
    if best is None:
        tm, tn, tk = min(tms), min(tns), min(tks)
    else:
        tm, tn, tk = best[1]

    # v7x megacore: keep >=2 blocks along a "parallel" axis when possible.
    if (m // tm) * (n // tn) == 1:
        smaller_tn = [c for c in tns if c < tn]
        smaller_tm = [c for c in tms if c < tm]
        if smaller_tn:
            tn = max(smaller_tn)
        elif smaller_tm:
            tm = max(smaller_tm)
    return tm, tn, tk


# ------------------------------------------------------------------ fused whole-network kernel
# Small-graph regime: every padded operand (A_hat, pool matrix, X, all weights
# and biases) plus the widest activation fits VMEM, so one launch does the
# entire forward pass in f32 (no bf16 rounding of A_hat / pool / activations).

def _fused_gcn_kernel(*refs, num_layers):
    a_ref, p_ref, x_ref = refs[0], refs[1], refs[2]
    w_refs = [refs[3 + 2 * i] for i in range(num_layers)]
    b_refs = [refs[4 + 2 * i] for i in range(num_layers)]
    o_ref = refs[3 + 2 * num_layers]

    a = a_ref[...]
    h = x_ref[...]
    for li in range(num_layers):
        w = w_refs[li][...]
        b = b_refs[li][...]
        # relu(A_hat @ (h @ W) + b) == relu((A_hat @ h) @ W + b); pick the
        # cheaper association (adjacency matmul on the narrower operand).
        if h.shape[1] < w.shape[1]:
            t = jnp.dot(jnp.dot(a, h, preferred_element_type=jnp.float32), w,
                        preferred_element_type=jnp.float32)
        else:
            t = jnp.dot(a, jnp.dot(h, w, preferred_element_type=jnp.float32),
                        preferred_element_type=jnp.float32)
        h = jnp.maximum(t + b, 0.0)
    # global_mean_pool as (G, N) @ (N, C_out), all f32.
    o_ref[...] = jnp.dot(p_ref[...], h,
                         preferred_element_type=jnp.float32).astype(o_ref.dtype)


def _fused_forward(a_p, p_p, x_p, w_ps, b_ps, num_graphs, out_channels):
    num_layers = len(w_ps)
    operands = [a_p, p_p, x_p]
    for w, b in zip(w_ps, b_ps):
        operands += [w, b]
    out = pl.pallas_call(
        functools.partial(_fused_gcn_kernel, num_layers=num_layers),
        out_shape=jax.ShapeDtypeStruct((p_p.shape[0], w_ps[-1].shape[1]),
                                       jnp.float32),
        compiler_params=pltpu.CompilerParams(
            vmem_limit_bytes=_vmem_limit_bytes()),
    )(*operands)
    return out[:num_graphs, :out_channels]


# ------------------------------------------------------------------ tiled matmul kernel (fallback)

def _mm_kernel(*refs, relu, has_bias):
    """One (tm, tn) output tile of A @ B (+ bias, optional ReLU).

    Grid = (M/tm, N/tn, K/tk).  The trailing K axis is the reduction axis
    ("arbitrary"); partial products accumulate into a resident f32 VMEM
    scratch and bias/ReLU/store happen once on the last K step."""
    if has_bias:
        a_ref, b_ref, bias_ref, o_ref, acc_ref = refs
    else:
        a_ref, b_ref, o_ref, acc_ref = refs
        bias_ref = None
    k = pl.program_id(2)

    @pl.when(k == 0)
    def _():
        acc_ref[...] = jnp.zeros_like(acc_ref)

    acc_ref[...] += jnp.dot(a_ref[...], b_ref[...],
                            preferred_element_type=jnp.float32)

    @pl.when(k == pl.num_programs(2) - 1)
    def _():
        r = acc_ref[...]
        if has_bias:
            r = r + bias_ref[...]           # bias broadcast, f32
        if relu:
            r = jnp.maximum(r, 0.0)
        o_ref[...] = r.astype(o_ref.dtype)


def tiled_matmul(a, b, bias=None, *, relu=False, out_dtype=jnp.bfloat16):
    """C = A @ B (+ optional bias and ReLU).  A:(M,K), B:(K,N), bias:(1,N) f32."""
    m, k = a.shape
    k2, n = b.shape
    assert k == k2
    has_bias = bias is not None
    if has_bias:
        assert bias.shape == (1, n)

    budget = int(_vmem_limit_bytes() * 0.6)
    tm, tn, tk = _pick_tiles(m, n, k, a.dtype.itemsize, b.dtype.itemsize, budget)
    gm, gn, gk = m // tm, n // tn, k // tk

    in_specs = [
        pl.BlockSpec((tm, tk), lambda i, j, kk: (i, kk)),
        pl.BlockSpec((tk, tn), lambda i, j, kk: (kk, j)),
    ]
    operands = [a, b]
    if has_bias:
        in_specs.append(pl.BlockSpec((1, tn), lambda i, j, kk: (0, j)))
        operands.append(bias)

    out_item = jnp.dtype(out_dtype).itemsize
    # Include tiling re-read factors: A is read once per column tile, B once
    # per row tile, bias once per row tile.
    bytes_accessed = (m * k * a.dtype.itemsize * gn
                      + k * n * b.dtype.itemsize * gm
                      + m * n * out_item)
    if has_bias:
        bytes_accessed += n * bias.dtype.itemsize * gm

    return pl.pallas_call(
        functools.partial(_mm_kernel, relu=relu, has_bias=has_bias),
        out_shape=jax.ShapeDtypeStruct((m, n), out_dtype),
        grid_spec=pltpu.PrefetchScalarGridSpec(
            num_scalar_prefetch=0,
            grid=(gm, gn, gk),
            in_specs=in_specs,
            out_specs=pl.BlockSpec((tm, tn), lambda i, j, kk: (i, j)),
            scratch_shapes=[pltpu.VMEM((tm, tn), jnp.float32)],
        ),
        compiler_params=pltpu.CompilerParams(
            # row/col tiles shard across TensorCores (v7x megacore); K reduces.
            dimension_semantics=("parallel", "parallel", "arbitrary"),
            vmem_limit_bytes=_vmem_limit_bytes(),
        ),
        cost_estimate=pl.CostEstimate(
            flops=2 * m * n * k, transcendentals=0,
            bytes_accessed=bytes_accessed),
    )(*operands)


def _tiled_forward(a_p, p_p, x_p, w_ps, b_ps, num_graphs, out_channels):
    """Large-graph fallback: one tiled pallas_call per matmul (bf16 operands,
    f32 accumulation, bias+ReLU fused into the adjacency matmul epilogue)."""
    # TODO(synk): exploit A_hat's block-diagonal structure for batched graphs
    # (scalar-prefetched nonzero-block indices via PrefetchScalarGridSpec to
    # skip all-zero (i, kk) tiles of the adjacency matmul).
    a_bf = a_p.astype(jnp.bfloat16)
    h = x_p.astype(jnp.bfloat16)
    for w_p, b_p in zip(w_ps, b_ps):
        ci, co = w_p.shape
        w_bf = w_p.astype(jnp.bfloat16)
        if ci < co:
            # (A_hat @ X) @ W : adjacency matmul on the narrower operand.
            ah = tiled_matmul(a_bf, h, relu=False, out_dtype=jnp.bfloat16)
            h = tiled_matmul(ah, w_bf, bias=b_p, relu=True, out_dtype=jnp.bfloat16)
        else:
            xw = tiled_matmul(h, w_bf, relu=False, out_dtype=jnp.bfloat16)
            h = tiled_matmul(a_bf, xw, bias=b_p, relu=True, out_dtype=jnp.bfloat16)
    # Mean pooling stays in f32 for parity (tiny matmul).
    out = tiled_matmul(p_p, h.astype(jnp.float32), relu=False,
                       out_dtype=jnp.float32)
    return out[:num_graphs, :out_channels]


# ------------------------------------------------------------------ forward wrapper

def gcn_feature_extractor(a_hat, pool_mat, x, weights, biases, out_channels,
                          *, force_tiled=False):
    """GCN feature extractor forward pass.

    a_hat: (N, N) normalized adjacency, pool_mat: (G, N) mean-pool matrix,
    x: (N, C_in) node features; weights/biases: per-layer GCNConv params.
    Returns (G, out_channels) float32."""
    num_nodes = x.shape[0]
    num_graphs = pool_mat.shape[0]

    # Pad to lane/sublane-friendly sizes; zero padding is mathematically inert
    # (padded A_hat / pool rows & cols are zero, padded W rows/cols and bias
    # lanes are zero, so padded junk never reaches the real outputs).
    # NB: g_pad must stay a multiple of 8 (sublane rule for full-dim blocks).
    n_pad = _round_up(num_nodes, 128)
    g_pad = _round_up(num_graphs, 8)
    c0_pad = _round_up(x.shape[1], 128)

    a_p = _pad2d(a_hat, n_pad, n_pad).astype(jnp.float32)
    p_p = _pad2d(pool_mat, g_pad, n_pad).astype(jnp.float32)
    x_p = _pad2d(x, n_pad, c0_pad).astype(jnp.float32)

    w_ps, b_ps = [], []
    for w, b in zip(weights, biases):
        ci = _round_up(w.shape[0], 128)
        co = _round_up(w.shape[1], 128)
        w_ps.append(_pad2d(w, ci, co).astype(jnp.float32))
        b_ps.append(_pad2d(b, 1, co).astype(jnp.float32))

    # Fused-path f32 VMEM footprint: all inputs + output + ~2x widest activation.
    widest = max([c0_pad] + [wp.shape[1] for wp in w_ps])
    footprint = 4 * (a_p.size + p_p.size + x_p.size
                     + sum(wp.size for wp in w_ps) + sum(bp.size for bp in b_ps)
                     + g_pad * w_ps[-1].shape[1] + 2 * n_pad * widest)

    if (not force_tiled) and footprint <= int(_vmem_limit_bytes() * 0.6):
        return _fused_forward(a_p, p_p, x_p, w_ps, b_ps, num_graphs, out_channels)
    return _tiled_forward(a_p, p_p, x_p, w_ps, b_ps, num_graphs, out_channels)


# ------------------------------------------------------------------ glue (plain JAX)

def build_norm_adj(edge_index, num_nodes):
    """Dense A_hat = D^{-1/2}(A+I)D^{-1/2}.  Duplicate edges sum (scatter-add,
    like PyG); self loops are added only where missing (add_remaining_self_loops)."""
    src, dst = edge_index
    a = jnp.zeros((num_nodes, num_nodes), jnp.float32)
    a = a.at[dst, src].add(1.0)
    diag = jnp.diagonal(a)
    a = a + jnp.diag(jnp.where(diag == 0.0, 1.0, 0.0))
    deg = a.sum(axis=1)
    d_inv_sqrt = jnp.where(deg > 0, 1.0 / jnp.sqrt(deg), 0.0)
    return d_inv_sqrt[:, None] * a * d_inv_sqrt[None, :]


def build_mean_pool_matrix(batch, num_graphs):
    """P[g, i] = 1/|{j : batch[j]==g}| if batch[i]==g else 0  (global_mean_pool)."""
    onehot = (batch[None, :] == jnp.arange(num_graphs)[:, None]).astype(jnp.float32)
    counts = jnp.maximum(onehot.sum(axis=1, keepdims=True), 1.0)
    return onehot / counts


def gcn_layer_dims(in_channels, out_channels, num_layers=5, max_exp=10):
    """Channel widths exactly as GCNFeatureExtractor.__init__ builds them."""
    if num_layers < 2:
        raise ValueError('Number of layers should be at least 2 (1 hidden layer)')
    dims = []
    for i in range(num_layers - 1):
        if i == 0:
            dims.append((in_channels, 2 ** max_exp))
        else:
            dims.append((2 ** (max_exp - i + 1), 2 ** (max_exp - i)))
    dims.append((2 ** (max_exp - num_layers + 2), out_channels))
    return dims


def init_params(key, dims):
    """Deterministic glorot-uniform weights + zero biases (PyG GCNConv default)."""
    weights, biases = [], []
    for (cin, cout) in dims:
        key, sub = jax.random.split(key)
        limit = jnp.sqrt(6.0 / (cin + cout))
        w = jax.random.uniform(sub, (cin, cout), jnp.float32, -limit, limit)
        b = jnp.zeros((1, cout), jnp.float32)
        weights.append(w)
        biases.append(b)
    return weights, biases


# ------------------------------------------------------------------ main

if __name__ == "__main__":
    key = jax.random.PRNGKey(0)

    in_channels = 16
    out_channels = 32
    num_layers = 5
    num_graphs = 2
    nodes_per_graph = 16
    num_nodes = num_graphs * nodes_per_graph   # 32

    # node features
    key, kx = jax.random.split(key)
    x = jax.random.normal(kx, (num_nodes, in_channels), jnp.float32)

    # undirected ring graph inside each of the two graphs
    src_list, dst_list = [], []
    for g in range(num_graphs):
        base = g * nodes_per_graph
        for i in range(nodes_per_graph):
            a = base + i
            b = base + (i + 1) % nodes_per_graph
            src_list += [a, b]
            dst_list += [b, a]
    edge_index = jnp.array([src_list, dst_list], dtype=jnp.int32)

    batch = jnp.repeat(jnp.arange(num_graphs, dtype=jnp.int32), nodes_per_graph)

    # glue: dense normalized adjacency + pooling matrix + deterministic params
    a_hat = build_norm_adj(edge_index, num_nodes)
    pool_mat = build_mean_pool_matrix(batch, num_graphs)
    dims = gcn_layer_dims(in_channels, out_channels, num_layers=num_layers)
    weights, biases = init_params(key, dims)

    # Fast path: whole network fused into a single pallas_call (all-VMEM, f32).
    out_fused = jax.block_until_ready(
        gcn_feature_extractor(a_hat, pool_mat, x, weights, biases, out_channels))
    # Also exercise the large-graph tiled fallback path (bf16 tiled matmuls).
    out_tiled = jax.block_until_ready(
        gcn_feature_extractor(a_hat, pool_mat, x, weights, biases, out_channels,
                              force_tiled=True))

    assert out_fused.shape == (num_graphs, out_channels)
    assert out_tiled.shape == (num_graphs, out_channels)
    assert bool(jnp.all(jnp.isfinite(out_fused)))
    assert bool(jnp.all(jnp.isfinite(out_tiled)))
    # Paths should agree up to bf16 rounding of the tiled fallback.
    diff = float(jnp.max(jnp.abs(out_fused - out_tiled)))
    scale = float(jnp.max(jnp.abs(out_fused)))
    assert diff <= 0.1 * scale + 5e-3

    print("KERNEL_OK")
</pallas_src>

<mosaic_0001>
module attributes {stable_mosaic.version = 11 : i64} {
  func.func @_fused_gcn_kernel(%arg0: memref<128x128xf32, #tpu.memory_space<vmem>>, %arg1: memref<8x128xf32, #tpu.memory_space<vmem>>, %arg2: memref<128x128xf32, #tpu.memory_space<vmem>>, %arg3: memref<128x1024xf32, #tpu.memory_space<vmem>>, %arg4: memref<1x1024xf32, #tpu.memory_space<vmem>>, %arg5: memref<1024x512xf32, #tpu.memory_space<vmem>>, %arg6: memref<1x512xf32, #tpu.memory_space<vmem>>, %arg7: memref<512x256xf32, #tpu.memory_space<vmem>>, %arg8: memref<1x256xf32, #tpu.memory_space<vmem>>, %arg9: memref<256x128xf32, #tpu.memory_space<vmem>>, %arg10: memref<1x128xf32, #tpu.memory_space<vmem>>, %arg11: memref<128x128xf32, #tpu.memory_space<vmem>>, %arg12: memref<1x128xf32, #tpu.memory_space<vmem>>, %arg13: memref<8x128xf32, #tpu.memory_space<vmem>>) attributes {dimension_semantics = [], scalar_prefetch = 0 : i64, scratch_operands = 0 : i64, tpu.core_type = #tpu.core_type<tc>} {
    %c0 = arith.constant 0 : index
    %c0_0 = arith.constant 0 : index
    %0 = vector.load %arg0[%c0, %c0_0] : memref<128x128xf32, #tpu.memory_space<vmem>>, vector<128x128xf32>
    %c0_1 = arith.constant 0 : index
    %c0_2 = arith.constant 0 : index
    %1 = vector.load %arg2[%c0_1, %c0_2] : memref<128x128xf32, #tpu.memory_space<vmem>>, vector<128x128xf32>
    %c0_3 = arith.constant 0 : index
    %c0_4 = arith.constant 0 : index
    %2 = vector.load %arg3[%c0_3, %c0_4] : memref<128x1024xf32, #tpu.memory_space<vmem>>, vector<128x1024xf32>
    %c0_5 = arith.constant 0 : index
    %c0_6 = arith.constant 0 : index
    %3 = vector.load %arg4[%c0_5, %c0_6] : memref<1x1024xf32, #tpu.memory_space<vmem>>, vector<1x1024xf32>
    %cst = arith.constant dense<0.000000e+00> : vector<128x128xf32>
    %4 = tpu.matmul %0, %1, %cst {dimension_numbers = #tpu.dot_dimension_numbers<[1], [0], [0], [1], [0, 0, 1, 1], [], []>} : vector<128x128xf32>, vector<128x128xf32>, vector<128x128xf32> -> vector<128x128xf32>
    %cst_7 = arith.constant dense<0.000000e+00> : vector<128x1024xf32>
    %5 = tpu.matmul %4, %2, %cst_7 {dimension_numbers = #tpu.dot_dimension_numbers<[1], [0], [0], [1], [0, 0, 1, 1], [], []>} : vector<128x128xf32>, vector<128x1024xf32>, vector<128x1024xf32> -> vector<128x1024xf32>
    %6 = vector.broadcast %3 : vector<1x1024xf32> to vector<128x1024xf32>
    %7 = arith.addf %5, %6 : vector<128x1024xf32>
    %cst_8 = arith.constant 0.000000e+00 : f32
    %8 = vector.broadcast %cst_8 : f32 to vector<128x1024xf32>
    %9 = arith.maximumf %7, %8 : vector<128x1024xf32>
    %c0_9 = arith.constant 0 : index
    %c0_10 = arith.constant 0 : index
    %10 = vector.load %arg5[%c0_9, %c0_10] : memref<1024x512xf32, #tpu.memory_space<vmem>>, vector<1024x512xf32>
    %c0_11 = arith.constant 0 : index
    %c0_12 = arith.constant 0 : index
    %11 = vector.load %arg6[%c0_11, %c0_12] : memref<1x512xf32, #tpu.memory_space<vmem>>, vector<1x512xf32>
    %cst_13 = arith.constant dense<0.000000e+00> : vector<128x512xf32>
    %12 = tpu.matmul %9, %10, %cst_13 {dimension_numbers = #tpu.dot_dimension_numbers<[1], [0], [0], [1], [0, 0, 1, 1], [], []>} : vector<128x1024xf32>, vector<1024x512xf32>, vector<128x512xf32> -> vector<128x512xf32>
    %cst_14 = arith.constant dense<0.000000e+00> : vector<128x512xf32>
    %13 = tpu.matmul %0, %12, %cst_14 {dimension_numbers = #tpu.dot_dimension_numbers<[1], [0], [0], [1], [0, 0, 1, 1], [], []>} : vector<128x128xf32>, vector<128x512xf32>, vector<128x512xf32> -> vector<128x512xf32>
    %14 = vector.broadcast %11 : vector<1x512xf32> to vector<128x512xf32>
    %15 = arith.addf %13, %14 : vector<128x512xf32>
    %cst_15 = arith.constant 0.000000e+00 : f32
    %16 = vector.broadcast %cst_15 : f32 to vector<128x512xf32>
    %17 = arith.maximumf %15, %16 : vector<128x512xf32>
    %c0_16 = arith.constant 0 : index
    %c0_17 = arith.constant 0 : index
    %18 = vector.load %arg7[%c0_16, %c0_17] : memref<512x256xf32, #tpu.memory_space<vmem>>, vector<512x256xf32>
    %c0_18 = arith.constant 0 : index
    %c0_19 = arith.constant 0 : index
    %19 = vector.load %arg8[%c0_18, %c0_19] : memref<1x256xf32, #tpu.memory_space<vmem>>, vector<1x256xf32>
    %cst_20 = arith.constant dense<0.000000e+00> : vector<128x256xf32>
    %20 = tpu.matmul %17, %18, %cst_20 {dimension_numbers = #tpu.dot_dimension_numbers<[1], [0], [0], [1], [0, 0, 1, 1], [], []>} : vector<128x512xf32>, vector<512x256xf32>, vector<128x256xf32> -> vector<128x256xf32>
    %cst_21 = arith.constant dense<0.000000e+00> : vector<128x256xf32>
    %21 = tpu.matmul %0, %20, %cst_21 {dimension_numbers = #tpu.dot_dimension_numbers<[1], [0], [0], [1], [0, 0, 1, 1], [], []>} : vector<128x128xf32>, vector<128x256xf32>, vector<128x256xf32> -> vector<128x256xf32>
    %22 = vector.broadcast %19 : vector<1x256xf32> to vector<128x256xf32>
    %23 = arith.addf %21, %22 : vector<128x256xf32>
    %cst_22 = arith.constant 0.000000e+00 : f32
    %24 = vector.broadcast %cst_22 : f32 to vector<128x256xf32>
    %25 = arith.maximumf %23, %24 : vector<128x256xf32>
    %c0_23 = arith.constant 0 : index
    %c0_24 = arith.constant 0 : index
    %26 = vector.load %arg9[%c0_23, %c0_24] : memref<256x128xf32, #tpu.memory_space<vmem>>, vector<256x128xf32>
    %c0_25 = arith.constant 0 : index
    %c0_26 = arith.constant 0 : index
    %27 = vector.load %arg10[%c0_25, %c0_26] : memref<1x128xf32, #tpu.memory_space<vmem>>, vector<1x128xf32>
    %cst_27 = arith.constant dense<0.000000e+00> : vector<128x128xf32>
    %28 = tpu.matmul %25, %26, %cst_27 {dimension_numbers = #tpu.dot_dimension_numbers<[1], [0], [0], [1], [0, 0, 1, 1], [], []>} : vector<128x256xf32>, vector<256x128xf32>, vector<128x128xf32> -> vector<128x128xf32>
    %cst_28 = arith.constant dense<0.000000e+00> : vector<128x128xf32>
    %29 = tpu.matmul %0, %28, %cst_28 {dimension_numbers = #tpu.dot_dimension_numbers<[1], [0], [0], [1], [0, 0, 1, 1], [], []>} : vector<128x128xf32>, vector<128x128xf32>, vector<128x128xf32> -> vector<128x128xf32>
    %30 = vector.broadcast %27 : vector<1x128xf32> to vector<128x128xf32>
    %31 = arith.addf %29, %30 : vector<128x128xf32>
    %cst_29 = arith.constant 0.000000e+00 : f32
    %32 = vector.broadcast %cst_29 : f32 to vector<128x128xf32>
    %33 = arith.maximumf %31, %32 : vector<128x128xf32>
    %c0_30 = arith.constant 0 : index
    %c0_31 = arith.constant 0 : index
    %34 = vector.load %arg11[%c0_30, %c0_31] : memref<128x128xf32, #tpu.memory_space<vmem>>, vector<128x128xf32>
    %c0_32 = arith.constant 0 : index
    %c0_33 = arith.constant 0 : index
    %35 = vector.load %arg12[%c0_32, %c0_33] : memref<1x128xf32, #tpu.memory_space<vmem>>, vector<1x128xf32>
    %cst_34 = arith.constant dense<0.000000e+00> : vector<128x128xf32>
    %36 = tpu.matmul %33, %34, %cst_34 {dimension_numbers = #tpu.dot_dimension_numbers<[1], [0], [0], [1], [0, 0, 1, 1], [], []>} : vector<128x128xf32>, vector<128x128xf32>, vector<128x128xf32> -> vector<128x128xf32>
    %cst_35 = arith.constant dense<0.000000e+00> : vector<128x128xf32>
    %37 = tpu.matmul %0, %36, %cst_35 {dimension_numbers = #tpu.dot_dimension_numbers<[1], [0], [0], [1], [0, 0, 1, 1], [], []>} : vector<128x128xf32>, vector<128x128xf32>, vector<128x128xf32> -> vector<128x128xf32>
    %38 = vector.broadcast %35 : vector<1x128xf32> to vector<128x128xf32>
    %39 = arith.addf %37, %38 : vector<128x128xf32>
    %cst_36 = arith.constant 0.000000e+00 : f32
    %40 = vector.broadcast %cst_36 : f32 to vector<128x128xf32>
    %41 = arith.maximumf %39, %40 : vector<128x128xf32>
    %c0_37 = arith.constant 0 : index
    %c0_38 = arith.constant 0 : index
    %42 = vector.load %arg1[%c0_37, %c0_38] : memref<8x128xf32, #tpu.memory_space<vmem>>, vector<8x128xf32>
    %cst_39 = arith.constant dense<0.000000e+00> : vector<8x128xf32>
    %43 = tpu.matmul %42, %41, %cst_39 {dimension_numbers = #tpu.dot_dimension_numbers<[1], [0], [0], [1], [0, 0, 1, 1], [], []>} : vector<8x128xf32>, vector<128x128xf32>, vector<8x128xf32> -> vector<8x128xf32>
    %c0_40 = arith.constant 0 : index
    %c0_41 = arith.constant 0 : index
    %44 = vector.load %arg13[%c0_40, %c0_41] : memref<8x128xf32, #tpu.memory_space<vmem>>, vector<8x128xf32>
    tpu.vector_store %arg13[%c0_40, %c0_41], %43 {strides = array<i32>} : memref<8x128xf32, #tpu.memory_space<vmem>>, vector<8x128xf32>,
    return
  }
}

</mosaic_0001>

<bundles_post_ra>
// kernel: tpu_custom_call.1
= control target key start
LH: loop header
LB: loop body
LE: loop exit
PB: predicated region body
PF: predicated region fallthrough
CT: control target
= control target key end

     0   :  { %18 = vsyncpa [#allocation3], 0  ;;  %s8391_s0 = inlined_call_operand.hbm [shape: f32[128,128], index: 0, kind: input, shape index: {}]   ;;  %s8392_s1 = inlined_call_operand.hbm [shape: f32[8,128], index: 1, kind: input, shape index: {}]   ;;  %s8393_s2 = inlined_call_operand.hbm [shape: f32[128,128], index: 2, kind: input, shape index: {}]   ;;  %s8394_s3 = inlined_call_operand.hbm [shape: f32[128,1024], index: 3, kind: input, shape index: {}]   ;;  %s8395_s4 = inlined_call_operand.hbm [shape: f32[1,1024], index: 4, kind: input, shape index: {}]   ;;  %s8396_s5 = inlined_call_operand.hbm [shape: f32[1024,512], index: 5, kind: input, shape index: {}]   ;;  %s8397_s6 = inlined_call_operand.hbm [shape: f32[1,512], index: 6, kind: input, shape index: {}]   ;;  %s8398_s7 = inlined_call_operand.hbm [shape: f32[512,256], index: 7, kind: input, shape index: {}]   ;;  %s8399_s8 = inlined_call_operand.hbm [shape: f32[1,256], index: 8, kind: input, shape index: {}]   ;;  %s8400_s9 = inlined_call_operand.hbm [shape: f32[256,128], index: 9, kind: input, shape index: {}]   ;;  %s8401_s10 = inlined_call_operand.hbm [shape: f32[1,128], index: 10, kind: input, shape index: {}]   ;;  %s8402_s11 = inlined_call_operand.hbm [shape: f32[128,128], index: 11, kind: input, shape index: {}]   ;;  %s8403_s12 = inlined_call_operand.hbm [shape: f32[1,128], index: 12, kind: input, shape index: {}]   ;;  %s8404_s13 = inlined_call_operand.hbm [shape: f32[8,128], index: 13, kind: output, shape index: {}]  }
   0x1   :  { %19 = vsyncpa [#allocation6], 0 }
   0x2   :  { %20 = vsyncpa [#allocation9], 0 }
   0x3   :  { %21 = vsyncpa [#allocation12], 0 }
   0x4   :  { %22 = vsyncpa [#allocation15], 0 }
   0x5   :  { %23 = vsyncpa [#allocation18], 0 }
   0x6   :  { %24 = vsyncpa [#allocation21], 0 }
   0x7   :  { %25 = vsyncpa [#allocation4], 0  ;;  %s7098_s25 = smov [#allocation5]   ;;  %s7099_s27 = smov [#allocation8]  }
   0x8   :  { %s44_s26 = sshll.u32 %s7098_s25, 4  ;;  %s65_s28 = sshll.u32 %s7099_s27, 4  ;;  %s45_s26 = int_to_ptr.vmem [resolvable:$true] %s44_s26  ;;  %s7193_s28 = int_to_ptr.vmem [resolvable:$true] %s65_s28 }
   0x9   :  { %s6774_s14 = scalar_lea.hbm %s8392_s1, 128 }
   0xa   :  { %p6775_p0 = scmp.ne.s32.totalorder %s8392_s1, %s6774_s14  ;;  %p6778_p1 = scmp.lt.u32.totalorder %s6774_s14, %s8392_s1 }
   0xc   :  { %p6780_p2 = pnand %p6778_p1, %p6775_p0 }
   0xe   :  { %6783 = shalt.err (!%p6780_p2)
}
   0xf   :  { %s6784_s19 = scalar_lea.vmem %s45_s26, 128  ;;  %p6789_p4 = scmp.lt.s32.totalorder %s45_s26, %s45_s26 }
  0x10   :  { %p6785_p3 = scmp.ne.s32.totalorder %s45_s26, %s6784_s19  ;;  %p6790_p5 = scmp.lt.s32.totalorder %s6784_s19, %s6784_s19 }
  0x12   :  { %p6791_p6 = por %p6790_p5, %p6789_p4 }
  0x14   :  { %p6792_p7 = pnand %p6791_p6, %p6785_p3 }
  0x16   :  { %6795 = shalt.err (!%p6792_p7)
}
  0x17   :  { %47 = dma.hbm_to_vmem [thread:$0]  %s8392_s1, 128, %s45_s26, [#allocation6]  }
  0x18   :  { %s6796_s24 = scalar_lea.hbm %s8394_s3, 16384 }
  0x19   :  { %p6797_p8 = scmp.ne.s32.totalorder %s8394_s3, %s6796_s24  ;;  %p6800_p9 = scmp.lt.u32.totalorder %s6796_s24, %s8394_s3 }
  0x1b   :  { %p6802_p10 = pnand %p6800_p9, %p6797_p8 }
  0x1d   :  { %6805 = shalt.err (!%p6802_p10)
}
  0x1e   :  { %s6806_s14 = scalar_lea.vmem %s7193_s28, 16384  ;;  %p6811_p12 = scmp.lt.s32.totalorder %s7193_s28, %s7193_s28 }
  0x1f   :  { %p6807_p11 = scmp.ne.s32.totalorder %s7193_s28, %s6806_s14  ;;  %p6812_p13 = scmp.lt.s32.totalorder %s6806_s14, %s6806_s14 }
  0x21   :  { %p6813_p0 = por %p6812_p13, %p6811_p12 }
  0x23   :  { %p6814_p1 = pnand %p6813_p0, %p6807_p11 }
  0x25   :  { %6817 = shalt.err (!%p6814_p1)
}
  0x26   :  { %s7100_s1 = smov 1024   ;;  %s7101_s26 = smov 64  }
  0x27   :  { %71 = dma.hbm_to_vmem [thread:$0]  %s8394_s3, 16384, %s7193_s28, [#allocation9], %s7100_s1, %s7100_s1, %s7101_s26  }
  0x28   :  { %s7102_s17 = smov [#allocation11]   ;;  %s6818_s21 = scalar_lea.hbm %s8396_s5, 65536 }
  0x29   :  { %s87_s18 = sshll.u32 %s7102_s17, 4  ;;  %p6819_p2 = scmp.ne.s32.totalorder %s8396_s5, %s6818_s21  ;;  %s88_s18 = int_to_ptr.vmem [resolvable:$true] %s87_s18 }
  0x2a   :  { %p6822_p3 = scmp.lt.u32.totalorder %s6818_s21, %s8396_s5 }
  0x2c   :  { %p6824_p4 = pnand %p6822_p3, %p6819_p2 }
  0x2e   :  { %6827 = shalt.err (!%p6824_p4)
}
  0x2f   :  { %s6828_s27 = scalar_lea.vmem %s88_s18, 65536  ;;  %p6833_p6 = scmp.lt.s32.totalorder %s88_s18, %s88_s18 }
  0x30   :  { %p6829_p5 = scmp.ne.s32.totalorder %s88_s18, %s6828_s27  ;;  %p6834_p7 = scmp.lt.s32.totalorder %s6828_s27, %s6828_s27 }
  0x32   :  { %p6835_p8 = por %p6834_p7, %p6833_p6 }
  0x34   :  { %p6836_p9 = pnand %p6835_p8, %p6829_p5 }
  0x36   :  { %6839 = shalt.err (!%p6836_p9)
}
  0x37   :  { %s7103_s3 = smov 512   ;;  %s7104_s28 = smov 32  }
  0x38   :  { %93 = dma.hbm_to_vmem [thread:$0]  %s8396_s5, 65536, %s88_s18, [#allocation12], %s7103_s3, %s7103_s3, %s7104_s28  }
  0x39   :  { %s7105_s14 = smov [#allocation14]   ;;  %s6840_s16 = scalar_lea.hbm %s8398_s7, 16384 }
  0x3a   :  { %s109_s1 = sshll.u32 %s7105_s14, 4  ;;  %p6841_p10 = scmp.ne.s32.totalorder %s8398_s7, %s6840_s16  ;;  %s110_s1 = int_to_ptr.vmem [resolvable:$true] %s109_s1 }
  0x3b   :  { %p6844_p11 = scmp.lt.u32.totalorder %s6840_s16, %s8398_s7 }
  0x3d   :  { %p6846_p12 = pnand %p6844_p11, %p6841_p10 }
  0x3f   :  { %6849 = shalt.err (!%p6846_p12)
}
  0x40   :  { %s6850_s22 = scalar_lea.vmem %s110_s1, 16384  ;;  %p6855_p0 = scmp.lt.s32.totalorder %s110_s1, %s110_s1 }
  0x41   :  { %p6851_p13 = scmp.ne.s32.totalorder %s110_s1, %s6850_s22  ;;  %p6856_p1 = scmp.lt.s32.totalorder %s6850_s22, %s6850_s22 }
  0x43   :  { %p6857_p2 = por %p6856_p1, %p6855_p0 }
  0x45   :  { %p6858_p3 = pnand %p6857_p2, %p6851_p13 }
  0x47   :  { %6861 = shalt.err (!%p6858_p3)
}
  0x48   :  { %s7106_s5 = smov 256   ;;  %s7107_s18 = smov 16  }
  0x49   :  { %115 = dma.hbm_to_vmem [thread:$0]  %s8398_s7, 16384, %s110_s1, [#allocation15], %s7106_s5, %s7106_s5, %s7107_s18  }
  0x4a   :  { %s7108_s25 = smov [#allocation17]   ;;  %s7109_s3 = smov [#allocation20]  }
  0x4b   :  { %s131_s27 = sshll.u32 %s7108_s25, 4  ;;  %s153_s28 = sshll.u32 %s7109_s3, 4  ;;  %s132_s27 = int_to_ptr.vmem [resolvable:$true] %s131_s27  ;;  %s7248_s28 = int_to_ptr.vmem [resolvable:$true] %s153_s28 }
  0x4c   :  { %s6862_s14 = scalar_lea.hbm %s8400_s9, 4096 }
  0x4d   :  { %p6863_p4 = scmp.ne.s32.totalorder %s8400_s9, %s6862_s14  ;;  %p6866_p5 = scmp.lt.u32.totalorder %s6862_s14, %s8400_s9 }
  0x4f   :  { %p6868_p6 = pnand %p6866_p5, %p6863_p4 }
  0x51   :  { %6871 = shalt.err (!%p6868_p6)
}
  0x52   :  { %s6872_s7 = scalar_lea.vmem %s132_s27, 4096  ;;  %p6877_p8 = scmp.lt.s32.totalorder %s132_s27, %s132_s27 }
  0x53   :  { %p6873_p7 = scmp.ne.s32.totalorder %s132_s27, %s6872_s7  ;;  %p6878_p9 = scmp.lt.s32.totalorder %s6872_s7, %s6872_s7 }
  0x55   :  { %p6879_p10 = por %p6878_p9, %p6877_p8 }
  0x57   :  { %p6880_p11 = pnand %p6879_p10, %p6873_p7 }
  0x59   :  { %6883 = shalt.err (!%p6880_p11)
}
  0x5a   :  { %s7110_s1 = smov 128   ;;  %s7111_s19 = smov 8  }
  0x5b   :  { %137 = dma.hbm_to_vmem [thread:$0]  %s8400_s9, 4096, %s132_s27, [#allocation18], %s7110_s1, %s7110_s1, %s7111_s19  }
  0x5c   :  { %s6884_s18 = scalar_lea.hbm %s8402_s11, 2048 }
  0x5d   :  { %p6885_p12 = scmp.ne.s32.totalorder %s8402_s11, %s6884_s18  ;;  %p6888_p13 = scmp.lt.u32.totalorder %s6884_s18, %s8402_s11 }
  0x5f   :  { %p6890_p0 = pnand %p6888_p13, %p6885_p12 }
  0x61   :  { %6893 = shalt.err (!%p6890_p0)
}
  0x62   :  { %s6894_s29 = scalar_lea.vmem %s7248_s28, 2048  ;;  %p6899_p2 = scmp.lt.s32.totalorder %s7248_s28, %s7248_s28 }
  0x63   :  { %p6895_p1 = scmp.ne.s32.totalorder %s7248_s28, %s6894_s29  ;;  %p6900_p3 = scmp.lt.s32.totalorder %s6894_s29, %s6894_s29 }
  0x65   :  { %p6901_p4 = por %p6900_p3, %p6899_p2 }
  0x67   :  { %p6902_p5 = pnand %p6901_p4, %p6895_p1 }
  0x69   :  { %6905 = shalt.err (!%p6902_p5)
}
  0x6a   :  { %159 = dma.hbm_to_vmem [thread:$0]  %s8402_s11, 2048, %s7248_s28, [#allocation21], %s7110_s1, %s7110_s1, %s7111_s19  }
  0x6b   :  { %s7112_s30 = smov [#allocation2]   ;;  %s7113_s26 = smov [#allocation7]  }
  0x6c   :  { %s31_s14 = sshll.u32 %s7112_s30, 4  ;;  %s53_s15 = sshll.u32 %s7113_s26, 4  ;;  %s32_s14 = int_to_ptr.vmem [resolvable:$true] %s31_s14  ;;  %s7285_s15 = int_to_ptr.vmem [resolvable:$true] %s53_s15 }
  0x6d   :  { %s6906_s7 = scalar_lea.hbm %s8391_s0, 2048 }
  0x6e   :  { %p6907_p6 = scmp.ne.s32.totalorder %s8391_s0, %s6906_s7  ;;  %p6910_p7 = scmp.lt.u32.totalorder %s6906_s7, %s8391_s0 }
  0x70   :  { %p6912_p8 = pnand %p6910_p7, %p6907_p6 }
  0x72   :  { %6915 = shalt.err (!%p6912_p8)
}
  0x73   :  { %s6916_s11 = scalar_lea.vmem %s32_s14, 2048  ;;  %p6921_p10 = scmp.lt.s32.totalorder %s32_s14, %s32_s14 }
  0x74   :  { %p6917_p9 = scmp.ne.s32.totalorder %s32_s14, %s6916_s11  ;;  %p6922_p11 = scmp.lt.s32.totalorder %s6916_s11, %s6916_s11 }
  0x76   :  { %p6923_p12 = por %p6922_p11, %p6921_p10 }
  0x78   :  { %p6924_p13 = pnand %p6923_p12, %p6917_p9 }
  0x7a   :  { %6927 = shalt.err (!%p6924_p13)
}
  0x7b   :  { %37 = dma.hbm_to_vmem [thread:$0]  %s8391_s0, 2048, %s32_s14, [#allocation3], %s7110_s1, %s7110_s1, %s7111_s19  }
  0x7c   :  { %s6928_s25 = scalar_lea.hbm %s8393_s2, 2048 }
  0x7d   :  { %p6929_p0 = scmp.ne.s32.totalorder %s8393_s2, %s6928_s25  ;;  %p6932_p1 = scmp.lt.u32.totalorder %s6928_s25, %s8393_s2 }
  0x7f   :  { %p6934_p2 = pnand %p6932_p1, %p6929_p0 }
  0x81   :  { %6937 = shalt.err (!%p6934_p2)
}
  0x82   :  { %s6938_s30 = scalar_lea.vmem %s7285_s15, 2048  ;;  %p6943_p4 = scmp.lt.s32.totalorder %s7285_s15, %s7285_s15 }
  0x83   :  { %p6939_p3 = scmp.ne.s32.totalorder %s7285_s15, %s6938_s30  ;;  %p6944_p5 = scmp.lt.s32.totalorder %s6938_s30, %s6938_s30 }
  0x85   :  { %p6945_p6 = por %p6944_p5, %p6943_p4 }
  0x87   :  { %p6946_p7 = pnand %p6945_p6, %p6939_p3 }
  0x89   :  { %6949 = shalt.err (!%p6946_p7)
}
  0x8a   :  { %59 = dma.hbm_to_vmem [thread:$0]  %s8393_s2, 2048, %s7285_s15, [#allocation6], %s7110_s1, %s7110_s1, %s7111_s19  }
  0x8b   :  { %s7114_s26 = smov [#allocation10]   ;;  %s7115_s17 = smov [#allocation13]  }
  0x8c   :  { %s78_s16 = sshll.u32 %s7114_s26, 4  ;;  %s100_s7 = sshll.u32 %s7115_s17, 4  ;;  %s79_s16 = int_to_ptr.vmem [resolvable:$true] %s78_s16  ;;  %s101_s7 = int_to_ptr.vmem [resolvable:$true] %s100_s7 }
  0x8d   :  { %s6950_s22 = scalar_lea.hbm %s8395_s4, 128 }
  0x8e   :  { %p6951_p8 = scmp.ne.s32.totalorder %s8395_s4, %s6950_s22  ;;  %p6954_p9 = scmp.lt.u32.totalorder %s6950_s22, %s8395_s4 }
  0x90   :  { %p6956_p10 = pnand %p6954_p9, %p6951_p8 }
  0x92   :  { %6959 = shalt.err (!%p6956_p10)
}
  0x93   :  { %s6960_s2 = scalar_lea.vmem %s79_s16, 128  ;;  %p6965_p12 = scmp.lt.s32.totalorder %s79_s16, %s79_s16 }
  0x94   :  { %p6961_p11 = scmp.ne.s32.totalorder %s79_s16, %s6960_s2  ;;  %p6966_p13 = scmp.lt.s32.totalorder %s6960_s2, %s6960_s2 }
  0x96   :  { %p6967_p0 = por %p6966_p13, %p6965_p12 }
  0x98   :  { %p6968_p1 = pnand %p6967_p0, %p6961_p11 }
  0x9a   :  { %6971 = shalt.err (!%p6968_p1)
}
  0x9b   :  { %81 = dma.hbm_to_vmem [thread:$0]  %s8395_s4, 128, %s79_s16, [#allocation9]  }
  0x9c   :  { %s6972_s24 = scalar_lea.hbm %s8397_s6, 64 }
  0x9d   :  { %p6973_p2 = scmp.ne.s32.totalorder %s8397_s6, %s6972_s24  ;;  %p6976_p3 = scmp.lt.u32.totalorder %s6972_s24, %s8397_s6 }
  0x9f   :  { %p6978_p4 = pnand %p6976_p3, %p6973_p2 }
  0xa1   :  { %6981 = shalt.err (!%p6978_p4)
}
  0xa2   :  { %s6982_s27 = scalar_lea.vmem %s101_s7, 64  ;;  %p6987_p6 = scmp.lt.s32.totalorder %s101_s7, %s101_s7 }
  0xa3   :  { %p6983_p5 = scmp.ne.s32.totalorder %s101_s7, %s6982_s27  ;;  %p6988_p7 = scmp.lt.s32.totalorder %s6982_s27, %s6982_s27 }
  0xa5   :  { %p6989_p8 = por %p6988_p7, %p6987_p6 }
  0xa7   :  { %p6990_p9 = pnand %p6989_p8, %p6983_p5 }
  0xa9   :  { %6993 = shalt.err (!%p6990_p9)
}
  0xaa   :  { %103 = dma.hbm_to_vmem [thread:$0]  %s8397_s6, 64, %s101_s7, [#allocation12]  }
  0xab   :  { %s7116_s0 = smov [#allocation16]   ;;  %s7117_s26 = smov [#allocation19]  }
  0xac   :  { %s122_s14 = sshll.u32 %s7116_s0, 4  ;;  %s144_s16 = sshll.u32 %s7117_s26, 4  ;;  %s123_s14 = int_to_ptr.vmem [resolvable:$true] %s122_s14  ;;  %s145_s16 = int_to_ptr.vmem [resolvable:$true] %s144_s16 }
  0xad   :  { %s6994_s21 = scalar_lea.hbm %s8399_s8, 32 }
  0xae   :  { %p6995_p10 = scmp.ne.s32.totalorder %s8399_s8, %s6994_s21  ;;  %p6998_p11 = scmp.lt.u32.totalorder %s6994_s21, %s8399_s8 }
  0xb0   :  { %p7000_p12 = pnand %p6998_p11, %p6995_p10 }
  0xb2   :  { %7003 = shalt.err (!%p7000_p12)
}
  0xb3   :  { %s7004_s6 = scalar_lea.vmem %s123_s14, 32  ;;  %p7009_p0 = scmp.lt.s32.totalorder %s123_s14, %s123_s14 }
  0xb4   :  { %p7005_p13 = scmp.ne.s32.totalorder %s123_s14, %s7004_s6  ;;  %p7010_p1 = scmp.lt.s32.totalorder %s7004_s6, %s7004_s6 }
  0xb6   :  { %p7011_p2 = por %p7010_p1, %p7009_p0 }
  0xb8   :  { %p7012_p3 = pnand %p7011_p2, %p7005_p13 }
  0xba   :  { %7015 = shalt.err (!%p7012_p3)
}
  0xbb   :  { %125 = dma.hbm_to_vmem [thread:$0]  %s8399_s8, 32, %s123_s14, [#allocation15]  }
  0xbc   :  { %s7016_s19 = scalar_lea.hbm %s8401_s10, 16 }
  0xbd   :  { %p7017_p4 = scmp.ne.s32.totalorder %s8401_s10, %s7016_s19  ;;  %p7020_p5 = scmp.lt.u32.totalorder %s7016_s19, %s8401_s10 }
  0xbf   :  { %p7022_p6 = pnand %p7020_p5, %p7017_p4 }
  0xc1   :  { %7025 = shalt.err (!%p7022_p6)
}
  0xc2   :  { %s7026_s3 = scalar_lea.vmem %s145_s16, 16  ;;  %s7030_s29 = scalar_lea.vmem %s145_s16, 32 }
  0xc3   :  { %p7027_p7 = scmp.ne.s32.totalorder %s145_s16, %s7026_s3  ;;  %p7031_p8 = scmp.lt.s32.totalorder %s145_s16, %s145_s16 }
  0xc4   :  { %p7032_p9 = scmp.lt.s32.totalorder %s7030_s29, %s7026_s3 }
  0xc6   :  { %p7033_p10 = por %p7032_p9, %p7031_p8 }
  0xc8   :  { %p7034_p11 = pnand %p7033_p10, %p7027_p7 }
  0xca   :  { %7037 = shalt.err (!%p7034_p11)
}
  0xcb   :  { %147 = dma.hbm_to_vmem [thread:$0]  %s8401_s10, 16, %s145_s16, [#allocation18]  }
  0xcc   :  { %s7118_s27 = smov [#allocation22]   ;;  %s7038_s14 = scalar_lea.hbm %s8403_s12, 16 }
  0xcd   :  { %s166_s4 = sshll.u32 %s7118_s27, 4  ;;  %p7039_p12 = scmp.ne.s32.totalorder %s8403_s12, %s7038_s14  ;;  %s167_s4 = int_to_ptr.vmem [resolvable:$true] %s166_s4 }
  0xce   :  { %p7042_p13 = scmp.lt.u32.totalorder %s7038_s14, %s8403_s12 }
  0xd0   :  { %p7044_p0 = pnand %p7042_p13, %p7039_p12 }
  0xd2   :  { %7047 = shalt.err (!%p7044_p0)
}
  0xd3   :  { %s7048_s22 = scalar_lea.vmem %s167_s4, 16  ;;  %s7052_s10 = scalar_lea.vmem %s167_s4, 32 }
  0xd4   :  { %p7049_p1 = scmp.ne.s32.totalorder %s167_s4, %s7048_s22  ;;  %p7053_p2 = scmp.lt.s32.totalorder %s167_s4, %s167_s4 }
  0xd5   :  { %p7054_p3 = scmp.lt.s32.totalorder %s7052_s10, %s7048_s22 }
  0xd7   :  { %p7055_p4 = por %p7054_p3, %p7053_p2 }
  0xd9   :  { %p7056_p5 = pnand %p7055_p4, %p7049_p1 }
  0xdb   :  { %7059 = shalt.err (!%p7056_p5)
}
  0xdc   :  { %169 = dma.hbm_to_vmem [thread:$0]  %s8403_s12, 16, %s167_s4, [#allocation21]  }
  0xdd   :  { %7082 = dma.done.wait [#allocation3], 2048  }
  0xde   :  { %7083 = vsyncadd [#allocation3], 4294965248 }
  0xdf   :  { %7084 = dma.done.wait [#allocation6], 2176  }
  0xe0   :  { %7085 = vsyncadd [#allocation6], 4294965120 }
  0xe1   :  { %7086 = dma.done.wait [#allocation9], 16512  }
  0xe2   :  { %7087 = vsyncadd [#allocation9], 4294950784 }
  0xe3   :  { %7088 = dma.done.wait [#allocation12], 65600  }
  0xe4   :  { %7089 = vsyncadd [#allocation12], 4294901696 }
  0xe5   :  { %7090 = dma.done.wait [#allocation15], 16416  }
  0xe6   :  { %7091 = vsyncadd [#allocation15], 4294950880 }
  0xe7   :  { %7092 = dma.done.wait [#allocation18], 4112  }
  0xe8   :  { %7093 = vsyncadd [#allocation18], 4294963184 }
  0xe9   :  { %7094 = dma.done.wait [#allocation21], 2064  }
  0xea   :  { %7095 = vsyncadd [#allocation21], 4294965232  ;;  %v225_v0 = vld [vmem:[#allocation7] sm:$0xff]  ;;  %v226_v1 = vld [vmem:[#allocation7 + $0x8] sm:$0xff]  ;;  %vm7121_vm0 = vmmov 0   ;;  %s7122_s12 = smov [#allocation23]  }
  0xeb   :  { %v227_v2 = vld [vmem:[#allocation7 + $0x10] sm:$0xff]  ;;  %v5444_v3 = vpack.c.bf16 %v226_v1, %v225_v0  ;;  %v228_v4 = vld [vmem:[#allocation7 + $0x18] sm:$0xff]  ;;  %v229_v6 = vld [vmem:[#allocation7 + $0x20] sm:$0xff]  ;;  %s4943_s11 = sshll.u32 %s7122_s12, 4  ;;  %s4944_s11 = int_to_ptr.vmem [resolvable:$true] %s4943_s11 }
  0xec   :  { %v5448_v5 = vpack.c.bf16 %v228_v4, %v227_v2  ;;  %v230_v7 = vld [vmem:[#allocation7 + $0x28] sm:$0xff]  ;;  %v209_v9 = vld [vmem:[#allocation2] sm:$0xff]  ;;  %v231_v10 = vld [vmem:[#allocation7 + $0x30] sm:$0xff]  ;;  %s7060_s28 = scalar_lea.vmem %s4944_s11, 128  ;;  %p7065_p7 = scmp.lt.s32.totalorder %s4944_s11, %s4944_s11 }
  0xed   :  { %5445 = vmatprep.subr.bf16.mxu0 %v5444_v3  ;;  %v5452_v8 = vpack.c.bf16 %v230_v7, %v229_v6  ;;  %v232_v11 = vld [vmem:[#allocation7 + $0x38] sm:$0xff]  ;;  %5217 = vmatprep.mubr.f32.mxu0 %v209_v9  ;;  %v233_v13 = vld [vmem:[#allocation7 + $0x40] sm:$0xff]  ;;  %v234_v14 = vld [vmem:[#allocation7 + $0x48] sm:$0xff]  ;;  %p7061_p6 = scmp.ne.s32.totalorder %s4944_s11, %s7060_s28  ;;  %p7066_p8 = scmp.lt.s32.totalorder %s7060_s28, %s7060_s28 }
  0xee   :  { %5447 = vmatpush3.bf16.msra.mxu0 %v5444_v3  ;;  %v5456_v12 = vpack.c.bf16 %v232_v11, %v231_v10  ;;  %v242_v15 = vld [vmem:[#allocation8 + $0x8] sm:$0xff]  ;;  %v241_v18 = vld [vmem:[#allocation8] sm:$0xff]  ;;  %v5460_v20 = vpack.c.bf16 %v234_v14, %v233_v13  ;;  %v235_v24 = vld [vmem:[#allocation7 + $0x50] sm:$0xff] }
  0xef   :  { %5449 = vmatprep.subr.bf16.mxu0 %v5448_v5  ;;  %v250_v16 = vld [vmem:[#allocation8 + $0x48] sm:$0xff]  ;;  %v249_v19 = vld [vmem:[#allocation8 + $0x40] sm:$0xff]  ;;  %v236_v25 = vld [vmem:[#allocation7 + $0x58] sm:$0xff]  ;;  %p7067_p9 = por %p7066_p8, %p7065_p7 }
  0xf0   :  { %v5476_v17 = vpack.c.bf16 %v250_v16, %v242_v15  ;;  %v5478_v21 = vpack.c.bf16 %v249_v19, %v241_v18  ;;  %v258_v22 = vld [vmem:[#allocation8 + $0x88] sm:$0xff]  ;;  %v257_v27 = vld [vmem:[#allocation8 + $0x80] sm:$0xff]  ;;  %v5464_v32 = vpack.c.bf16 %v236_v25, %v235_v24  ;;  %v239_v47 = vld [vmem:[#allocation7 + $0x70] sm:$0xff] }
  0xf1   :  { %v266_v23 = vld [vmem:[#allocation8 + $0xc8] sm:$0xff]  ;;  %v265_v28 = vld [vmem:[#allocation8 + $0xc0] sm:$0xff]  ;;  %v240_v48 = vld [vmem:[#allocation7 + $0x78] sm:$0xff]  ;;  %p7068_p10 = pnand %p7067_p9, %p7061_p6 }
  0xf2   :  { %5451 = vmatpush3.bf16.msra.mxu0 %v5448_v5  ;;  %5477 = vmatprep.subr.bf16.mxu1 %v5476_v17  ;;  %v5480_v26 = vpack.c.bf16 %v266_v23, %v258_v22  ;;  %v5482_v29 = vpack.c.bf16 %v265_v28, %v257_v27  ;;  %v274_v30 = vld [vmem:[#allocation8 + $0x108] sm:$0xff]  ;;  %v273_v34 = vld [vmem:[#allocation8 + $0x100] sm:$0xff]  ;;  %v5472_v53 = vpack.c.bf16 %v240_v48, %v239_v47  ;;  %v244_v56 = vld [vmem:[#allocation8 + $0x18] sm:$0xff] }
  0xf3   :  { %5453 = vmatprep.subr.bf16.mxu0 %v5452_v8  ;;  %5479 = vmatpush1.bf16.msra.mxu1 %v5478_v21  ;;  %v282_v31 = vld [vmem:[#allocation8 + $0x148] sm:$0xff]  ;;  %v281_v35 = vld [vmem:[#allocation8 + $0x140] sm:$0xff]  ;;  %v252_v57 = vld [vmem:[#allocation8 + $0x58] sm:$0xff] }
  0xf4   :  { %5481 = vmatprep.subr.bf16.mxu1 %v5480_v26  ;;  %v5484_v33 = vpack.c.bf16 %v282_v31, %v274_v30  ;;  %v237_v36 = vld [vmem:[#allocation7 + $0x60] sm:$0xff]  ;;  %v238_v37 = vld [vmem:[#allocation7 + $0x68] sm:$0xff]  ;;  %v5486_v39 = vpack.c.bf16 %v281_v35, %v273_v34  ;;  %v5508_v62 = vpack.c.bf16 %v252_v57, %v244_v56  ;;  %v243_v63 = vld [vmem:[#allocation8 + $0x10] sm:$0xff] }
  0xf5   :  { %v290_v38 = vld [vmem:[#allocation8 + $0x188] sm:$0xff]  ;;  %v289_v42 = vld [vmem:[#allocation8 + $0x180] sm:$0xff]  ;;  %v5468_v44 = vpack.c.bf16 %v238_v37, %v237_v36  ;;  %v251_v0 = vld [vmem:[#allocation8 + $0x50] sm:$0xff] }
  0xf6   :  { %5455 = vmatpush3.bf16.msra.mxu0 %v5452_v8  ;;  %v298_v40 = vld [vmem:[#allocation8 + $0x1c8] sm:$0xff]  ;;  %v297_v43 = vld [vmem:[#allocation8 + $0x1c0] sm:$0xff]  ;;  %v260_v1 = vld [vmem:[#allocation8 + $0x98] sm:$0xff]  ;;  %v5510_v8 = vpack.c.bf16 %v251_v0, %v243_v63 }
  0xf7   :  { %5457 = vmatprep.subr.bf16.mxu0 %v5456_v12  ;;  %5483 = vmatpush1.bf16.msra.mxu1 %v5482_v29  ;;  %v5488_v41 = vpack.c.bf16 %v298_v40, %v290_v38  ;;  %v306_v45 = vld [vmem:[#allocation8 + $0x208] sm:$0xff]  ;;  %v5490_v49 = vpack.c.bf16 %v297_v43, %v289_v42  ;;  %v305_v51 = vld [vmem:[#allocation8 + $0x200] sm:$0xff]  ;;  %v268_v2 = vld [vmem:[#allocation8 + $0xd8] sm:$0xff] }
  0xf8   :  { %5485 = vmatprep.subr.bf16.mxu1 %v5484_v33  ;;  %v314_v46 = vld [vmem:[#allocation8 + $0x248] sm:$0xff]  ;;  %v313_v52 = vld [vmem:[#allocation8 + $0x240] sm:$0xff]  ;;  %v5512_v11 = vpack.c.bf16 %v268_v2, %v260_v1  ;;  %v267_v13 = vld [vmem:[#allocation8 + $0xd0] sm:$0xff] }
  0xf9   :  { %v5492_v50 = vpack.c.bf16 %v314_v46, %v306_v45  ;;  %v322_v54 = vld [vmem:[#allocation8 + $0x288] sm:$0xff]  ;;  %v5494_v58 = vpack.c.bf16 %v313_v52, %v305_v51  ;;  %v321_v60 = vld [vmem:[#allocation8 + $0x280] sm:$0xff]  ;;  %v276_v14 = vld [vmem:[#allocation8 + $0x118] sm:$0xff] }
  0xfa   :  { %5459 = vmatpush3.bf16.msra.mxu0 %v5456_v12  ;;  %v330_v55 = vld [vmem:[#allocation8 + $0x2c8] sm:$0xff]  ;;  %v329_v61 = vld [vmem:[#allocation8 + $0x2c0] sm:$0xff]  ;;  %v259_v12 = vld [vmem:[#allocation8 + $0x90] sm:$0xff] }
  0xfb   :  { %5461 = vmatprep.subr.bf16.mxu0 %v5460_v20  ;;  %5487 = vmatpush1.bf16.msra.mxu1 %v5486_v39  ;;  %v5496_v59 = vpack.c.bf16 %v330_v55, %v322_v54  ;;  %v338_v3 = vld [vmem:[#allocation8 + $0x308] sm:$0xff]  ;;  %v210_v5 = vld [vmem:[#allocation2 + $0x8] sm:$0xff]  ;;  %v5498_v6 = vpack.c.bf16 %v329_v61, %v321_v60  ;;  %v284_v16 = vld [vmem:[#allocation8 + $0x158] sm:$0xff]  ;;  %v5514_v21 = vpack.c.bf16 %v267_v13, %v259_v12 }
  0xfc   :  { %5489 = vmatprep.subr.bf16.mxu1 %v5488_v41  ;;  %v346_v4 = vld [vmem:[#allocation8 + $0x348] sm:$0xff]  ;;  %v337_v9 = vld [vmem:[#allocation8 + $0x300] sm:$0xff]  ;;  %v213_v24 = vld [vmem:[#allocation2 + $0x20] sm:$0xff]  ;;  %v5516_v25 = vpack.c.bf16 %v284_v16, %v276_v14 }
  0xfd   :  { %v211_v7 = vld [vmem:[#allocation2 + $0x10] sm:$0xff]  ;;  %v345_v10 = vld [vmem:[#allocation8 + $0x340] sm:$0xff]  ;;  %v5500_v15 = vpack.c.bf16 %v346_v4, %v338_v3  ;;  %v275_v26 = vld [vmem:[#allocation8 + $0x110] sm:$0xff] }
  0xfe   :  { %5463 = vmatpush3.bf16.msra.mxu0 %v5460_v20  ;;  %v354_v17 = vld [vmem:[#allocation8 + $0x388] sm:$0xff]  ;;  %v5502_v19 = vpack.c.bf16 %v345_v10, %v337_v9  ;;  %v212_v20 = vld [vmem:[#allocation2 + $0x18] sm:$0xff]  ;;  %v353_v22 = vld [vmem:[#allocation8 + $0x380] sm:$0xff] }
  0xff   :  { %5465 = vmatprep.subr.bf16.mxu0 %v5464_v32  ;;  %5491 = vmatpush1.bf16.msra.mxu1 %v5490_v49  ;;  %v362_v18 = vld [vmem:[#allocation8 + $0x3c8] sm:$0xff]  ;;  %v361_v23 = vld [vmem:[#allocation8 + $0x3c0] sm:$0xff]  ;;  %v283_v27 = vld [vmem:[#allocation8 + $0x150] sm:$0xff] }
 0x100   :  { %5493 = vmatprep.subr.bf16.mxu1 %v5492_v50  ;;  %v5504_v28 = vpack.c.bf16 %v362_v18, %v354_v17  ;;  %v292_v29 = vld [vmem:[#allocation8 + $0x198] sm:$0xff]  ;;  %v5506_v31 = vpack.c.bf16 %v361_v23, %v353_v22  ;;  %v5518_v33 = vpack.c.bf16 %v283_v27, %v275_v26  ;;  %v215_v34 = vld [vmem:[#allocation2 + $0x30] sm:$0xff]  ;;  %v291_v36 = vld [vmem:[#allocation8 + $0x190] sm:$0xff] }
 0x101   :  { %v300_v30 = vld [vmem:[#allocation8 + $0x1d8] sm:$0xff]  ;;  %v299_v37 = vld [vmem:[#allocation8 + $0x1d0] sm:$0xff]  ;;  %v218_v48 = vld [vmem:[#allocation2 + $0x48] sm:$0xff] }
 0x102   :  { %5467 = vmatpush3.bf16.msra.mxu0 %v5464_v32  ;;  %v214_v32 = vld [vmem:[#allocation2 + $0x28] sm:$0xff]  ;;  %v5520_v35 = vpack.c.bf16 %v300_v30, %v292_v29  ;;  %v308_v38 = vld [vmem:[#allocation8 + $0x218] sm:$0xff]  ;;  %v216_v40 = vld [vmem:[#allocation2 + $0x38] sm:$0xff]  ;;  %v5522_v41 = vpack.c.bf16 %v299_v37, %v291_v36 }
 0x103   :  { %5469 = vmatprep.subr.bf16.mxu0 %v5468_v44  ;;  %5495 = vmatpush1.bf16.msra.mxu1 %v5494_v58  ;;  %v316_v39 = vld [vmem:[#allocation8 + $0x258] sm:$0xff]  ;;  %v315_v45 = vld [vmem:[#allocation8 + $0x250] sm:$0xff]  ;;  %v219_v50 = vld [vmem:[#allocation2 + $0x50] sm:$0xff] }
 0x104   :  { %5497 = vmatprep.subr.bf16.mxu1 %v5496_v59  ;;  %v217_v42 = vld [vmem:[#allocation2 + $0x40] sm:$0xff]  ;;  %v5524_v43 = vpack.c.bf16 %v316_v39, %v308_v38  ;;  %v323_v52 = vld [vmem:[#allocation8 + $0x290] sm:$0xff]  ;;  %v222_v0 = vld [vmem:[#allocation2 + $0x68] sm:$0xff] }
 0x105   :  { %v324_v46 = vld [vmem:[#allocation8 + $0x298] sm:$0xff]  ;;  %v220_v56 = vld [vmem:[#allocation2 + $0x58] sm:$0xff]  ;;  %v223_v2 = vld [vmem:[#allocation2 + $0x70] sm:$0xff] }
 0x106   :  { %5471 = vmatpush3.bf16.msra.mxu0 %v5468_v44  ;;  %v307_v44 = vld [vmem:[#allocation8 + $0x210] sm:$0xff]  ;;  %v332_v47 = vld [vmem:[#allocation8 + $0x2d8] sm:$0xff]  ;;  %v246_v9 = vld [vmem:[#allocation8 + $0x28] sm:$0xff] }
 0x107   :  { %5473 = vmatprep.subr.bf16.mxu0 %v5472_v53  ;;  %5499 = vmatpush1.bf16.msra.mxu1 %v5498_v6  ;;  %v5526_v49 = vpack.c.bf16 %v315_v45, %v307_v44  ;;  %v5528_v51 = vpack.c.bf16 %v332_v47, %v324_v46  ;;  %v340_v54 = vld [vmem:[#allocation8 + $0x318] sm:$0xff]  ;;  %v339_v60 = vld [vmem:[#allocation8 + $0x310] sm:$0xff]  ;;  %v254_v10 = vld [vmem:[#allocation8 + $0x68] sm:$0xff] }
 0x108   :  { %5501 = vmatprep.subr.bf16.mxu1 %v5500_v15  ;;  %v348_v55 = vld [vmem:[#allocation8 + $0x358] sm:$0xff]  ;;  %v347_v61 = vld [vmem:[#allocation8 + $0x350] sm:$0xff]  ;;  %v5540_v12 = vpack.c.bf16 %v254_v10, %v246_v9  ;;  %v245_v15 = vld [vmem:[#allocation8 + $0x20] sm:$0xff] }
 0x109   :  { %v221_v58 = vld [vmem:[#allocation2 + $0x60] sm:$0xff]  ;;  %v5532_v59 = vpack.c.bf16 %v348_v55, %v340_v54  ;;  %v5534_v1 = vpack.c.bf16 %v347_v61, %v339_v60  ;;  %v355_v4 = vld [vmem:[#allocation8 + $0x390] sm:$0xff]  ;;  %v253_v16 = vld [vmem:[#allocation8 + $0x60] sm:$0xff] }
 0x10a   :  { %5475 = vmatpush3.bf16.msra.mxu0 %v5472_v53  ;;  %v331_v53 = vld [vmem:[#allocation8 + $0x2d0] sm:$0xff]  ;;  %v364_v63 = vld [vmem:[#allocation8 + $0x3d8] sm:$0xff]  ;;  %v261_v26 = vld [vmem:[#allocation8 + $0xa0] sm:$0xff] }
 0x10b   :  { %5509 = vmatprep.subr.bf16.mxu0 %v5508_v62  ;;  %5503 = vmatpush1.bf16.msra.mxu1 %v5502_v19  ;;  %v5530_v57 = vpack.c.bf16 %v331_v53, %v323_v52  ;;  %v356_v62 = vld [vmem:[#allocation8 + $0x398] sm:$0xff]  ;;  %v224_v6 = vld [vmem:[#allocation2 + $0x78] sm:$0xff]  ;;  %v262_v19 = vld [vmem:[#allocation8 + $0xa8] sm:$0xff] }
 0x10c   :  { %5505 = vmatprep.subr.bf16.mxu1 %v5504_v28  ;;  %v5536_v3 = vpack.c.bf16 %v364_v63, %v356_v62  ;;  %v256_v13 = vld [vmem:[#allocation8 + $0x78] sm:$0xff]  ;;  %v247_v17 = vld [vmem:[#allocation8 + $0x30] sm:$0xff]  ;;  %v269_v27 = vld [vmem:[#allocation8 + $0xe0] sm:$0xff] }
 0x10d   :  { %5218 = vmatmul.mubr.f32.vlgmr.msra.gmra.mrb[0].mxu0 %v210_v5  ;;  %v363_v5 = vld [vmem:[#allocation8 + $0x3d0] sm:$0xff]  ;;  %v272_v22 = vld [vmem:[#allocation8 + $0xf8] sm:$0xff]  ;;  %v5546_v38 = vpack.c.bf16 %v269_v27, %v261_v26  ;;  %v294_v47 = vld [vmem:[#allocation8 + $0x1a8] sm:$0xff] }
 0x10e   :  { %5220 = vmatprep.mubr.f32.mxu0 %v211_v7  ;;  %5511 = vmatpush1.bf16.msra.mxu0 %v5510_v8  ;;  %v5538_v7 = vpack.c.bf16 %v363_v5, %v355_v4  ;;  %v8405_v8 = vmov 0.0   ;;  %v255_v18 = vld [vmem:[#allocation8 + $0x70] sm:$0xff]  ;;  %v288_v36 = vld [vmem:[#allocation8 + $0x178] sm:$0xff]  ;;  %v293_v54 = vld [vmem:[#allocation8 + $0x1a0] sm:$0xff] }
 0x10f   :  { %5513 = vmatprep.subr.bf16.mxu0 %v5512_v11  ;;  %5507 = vmatpush1.bf16.msra.mxu1 %v5506_v31  ;;  %v248_v11 = vld [vmem:[#allocation8 + $0x38] sm:$0xff]  ;;  %v263_v31 = vld [vmem:[#allocation8 + $0xb0] sm:$0xff]  ;;  %v301_v55 = vld [vmem:[#allocation8 + $0x1e0] sm:$0xff] }
 0x110   :  { %620 = vmatprep.mubr.f32.mxu1 %v8405_v8  ;;  %v5572_v14 = vpack.c.bf16 %v256_v13, %v248_v11  ;;  %5541 = vmatprep.subr.bf16.mxu1 %v5540_v12  ;;  %v279_v45 = vld [vmem:[#allocation8 + $0x130] sm:$0xff]  ;;  %v310_v61 = vld [vmem:[#allocation8 + $0x228] sm:$0xff]  ;;  %v312_v63 = vld [vmem:[#allocation8 + $0x238] sm:$0xff] }
 0x111   :  { %5221 = vmatmul.mubr.f32.gmra.mrb[2].mxu0 %v212_v20  ;;  %v270_v20 = vld [vmem:[#allocation8 + $0xe8] sm:$0xff]  ;;  %v287_v46 = vld [vmem:[#allocation8 + $0x170] sm:$0xff]  ;;  %v309_v4 = vld [vmem:[#allocation8 + $0x220] sm:$0xff] }
 0x112   :  { %5223 = vmatprep.mubr.f32.mxu0 %v213_v24  ;;  %5515 = vmatpush1.bf16.msra.mxu0 %v5514_v21  ;;  %v264_v21 = vld [vmem:[#allocation8 + $0xb8] sm:$0xff]  ;;  %v5542_v24 = vpack.c.bf16 %v253_v16, %v245_v15  ;;  %v5544_v29 = vpack.c.bf16 %v270_v20, %v262_v19  ;;  %v5582_v53 = vpack.c.bf16 %v287_v46, %v279_v45  ;;  %v303_v60 = vld [vmem:[#allocation8 + $0x1f0] sm:$0xff]  ;;  %v318_v62 = vld [vmem:[#allocation8 + $0x268] sm:$0xff] }
 0x113   :  { %5517 = vmatprep.subr.bf16.mxu0 %v5516_v25  ;;  %v5574_v25 = vpack.c.bf16 %v255_v18, %v247_v17  ;;  %v5576_v30 = vpack.c.bf16 %v272_v22, %v264_v21  ;;  %v317_v5 = vld [vmem:[#allocation8 + $0x260] sm:$0xff]  ;;  %v311_v10 = vld [vmem:[#allocation8 + $0x230] sm:$0xff]  ;;  %v326_v12 = vld [vmem:[#allocation8 + $0x2a8] sm:$0xff] }
 0x114   :  { %v319_v11 = vld [vmem:[#allocation8 + $0x270] sm:$0xff]  ;;  %v334_v13 = vld [vmem:[#allocation8 + $0x2e8] sm:$0xff]  ;;  %v336_v15 = vld [vmem:[#allocation8 + $0x2f8] sm:$0xff]  ;;  %v5558_v17 = vpack.c.bf16 %v317_v5, %v309_v4 }
 0x115   :  { %5224 = vmatmul.mubr.f32.gmra.mrb[4].mxu0 %v214_v32  ;;  %v271_v32 = vld [vmem:[#allocation8 + $0xf0] sm:$0xff]  ;;  %v5590_v18 = vpack.c.bf16 %v319_v11, %v311_v10  ;;  %v325_v19 = vld [vmem:[#allocation8 + $0x2a0] sm:$0xff]  ;;  %v5560_v22 = vpack.c.bf16 %v334_v13, %v326_v12  ;;  %v342_v27 = vld [vmem:[#allocation8 + $0x328] sm:$0xff] }
 0x116   :  { %5226 = vmatprep.mubr.f32.mxu0 %v215_v34  ;;  %5519 = vmatpush1.bf16.msra.mxu0 %v5518_v33  ;;  %v278_v33 = vld [vmem:[#allocation8 + $0x128] sm:$0xff]  ;;  %v5578_v39 = vpack.c.bf16 %v271_v32, %v263_v31  ;;  %v333_v20 = vld [vmem:[#allocation8 + $0x2e0] sm:$0xff]  ;;  %v335_v26 = vld [vmem:[#allocation8 + $0x2f0] sm:$0xff] }
 0x117   :  { %5521 = vmatprep.subr.bf16.mxu0 %v5520_v35  ;;  %v286_v34 = vld [vmem:[#allocation8 + $0x168] sm:$0xff]  ;;  %v280_v35 = vld [vmem:[#allocation8 + $0x138] sm:$0xff]  ;;  %v1337_v13 = vld [vmem:[#allocation11 + $0x48] sm:$0xff] }
 0x118   :  { %v5580_v44 = vpack.c.bf16 %v288_v36, %v280_v35  ;;  %v352_v31 = vld [vmem:[#allocation8 + $0x378] sm:$0xff]  ;;  %v341_v35 = vld [vmem:[#allocation8 + $0x320] sm:$0xff]  ;;  %v366_v45 = vld [vmem:[#allocation8 + $0x3e8] sm:$0xff] }
 0x119   :  { %5227 = vmatmul.mubr.f32.gmra.mrb[6].mxu0 %v216_v40  ;;  %v277_v40 = vld [vmem:[#allocation8 + $0x120] sm:$0xff]  ;;  %v360_v46 = vld [vmem:[#allocation8 + $0x3b8] sm:$0xff]  ;;  %v1332_v10 = vld [vmem:[#allocation11 + $0x20] sm:$0xff] }
 0x11a   :  { %5229 = vmatprep.mubr.f32.mxu0 %v217_v42  ;;  %5523 = vmatpush1.bf16.msra.mxu0 %v5522_v41  ;;  %v285_v41 = vld [vmem:[#allocation8 + $0x160] sm:$0xff]  ;;  %v1330_v11 = vld [vmem:[#allocation11 + $0x10] sm:$0xff] }
 0x11b   :  { %5525 = vmatprep.subr.bf16.mxu0 %v5524_v43  ;;  %v5548_v43 = vpack.c.bf16 %v286_v34, %v278_v33  ;;  %v5550_v52 = vpack.c.bf16 %v285_v41, %v277_v40  ;;  %v5562_v33 = vpack.c.bf16 %v333_v20, %v325_v19  ;;  %v349_v36 = vld [vmem:[#allocation8 + $0x360] sm:$0xff]  ;;  %v343_v41 = vld [vmem:[#allocation8 + $0x330] sm:$0xff]  ;;  %v1334_v12 = vld [vmem:[#allocation11 + $0x30] sm:$0xff] }
 0x11c   :  { %v5862_v19 = vpack.c.bf16 %v1334_v12, %v1330_v11  ;;  %v1336_v20 = vld [vmem:[#allocation11 + $0x40] sm:$0xff]  ;;  %v1366_v11 = vld [vmem:[#allocation11 + $0x130] sm:$0xff]  ;;  %v1373_v12 = vld [vmem:[#allocation11 + $0x168] sm:$0xff] }
 0x11d   :  { %5230 = vmatmul.mubr.f32.gmra.mrb[8].mxu0 %v218_v48  ;;  %v302_v48 = vld [vmem:[#allocation8 + $0x1e8] sm:$0xff] }
 0x11e   :  { %5232 = vmatprep.mubr.f32.mxu0 %v219_v50  ;;  %5527 = vmatpush1.bf16.msra.mxu0 %v5526_v49  ;;  %v296_v49 = vld [vmem:[#allocation8 + $0x1b8] sm:$0xff] }
 0x11f   :  { %5529 = vmatprep.subr.bf16.mxu0 %v5528_v51  ;;  %v304_v50 = vld [vmem:[#allocation8 + $0x1f8] sm:$0xff] }
 0x121   :  { %5233 = vmatmul.mubr.f32.gmra.mrb[10].mxu0 %v220_v56 }
 0x122   :  { %5235 = vmatprep.mubr.f32.mxu0 %v221_v58  ;;  %5531 = vmatpush1.bf16.msra.mxu0 %v5530_v57  ;;  %v5552_v57 = vpack.c.bf16 %v302_v48, %v294_v47  ;;  %v5584_v58 = vpack.c.bf16 %v304_v50, %v296_v49  ;;  %v368_v47 = vld [vmem:[#allocation8 + $0x3f8] sm:$0xff]  ;;  %v5566_v49 = vpack.c.bf16 %v349_v36, %v341_v35  ;;  %v1344_v36 = vld [vmem:[#allocation11 + $0x80] sm:$0xff] }
 0x123   :  { %5533 = vmatprep.subr.bf16.mxu0 %v5532_v59  ;;  %v295_v59 = vld [vmem:[#allocation8 + $0x1b0] sm:$0xff] }
 0x125   :  { %5236 = vmatmul.mubr.f32.gmra.mrb[12].mxu0 %v222_v0  ;;  %v320_v0 = vld [vmem:[#allocation8 + $0x278] sm:$0xff] }
 0x126   :  { %5238 = vmatprep.mubr.f32.mxu0 %v223_v2  ;;  %5535 = vmatpush1.bf16.msra.mxu0 %v5534_v1  ;;  %v5554_v2 = vpack.c.bf16 %v301_v55, %v293_v54  ;;  %v5588_v9 = vpack.c.bf16 %v320_v0, %v312_v63  ;;  %v1335_v63 = vld [vmem:[#allocation11 + $0x38] sm:$0xff] }
 0x127   :  { %5537 = vmatprep.subr.bf16.mxu0 %v5536_v3  ;;  %v5586_v3 = vpack.c.bf16 %v303_v60, %v295_v59  ;;  %v367_v59 = vld [vmem:[#allocation8 + $0x3f0] sm:$0xff] }
 0x128   :  { %v1329_v60 = vld [vmem:[#allocation11 + $0x8] sm:$0xff] }
 0x129   :  { %5239 = vmatmul.mubr.f32.gmra.mrb[14].mxu0 %v224_v6 }
 0x12a   :  { %5539 = vmatpush1.bf16.msra.mxu0 %v5538_v7  ;;  %781 = vmatprep.mubr.f32.mxu0 %v8405_v8  ;;  %v5556_v7 = vpack.c.bf16 %v318_v62, %v310_v61  ;;  %v1333_v61 = vld [vmem:[#allocation11 + $0x28] sm:$0xff]  ;;  %v1331_v62 = vld [vmem:[#allocation11 + $0x18] sm:$0xff] }
 0x12b   :  { %5573 = vmatprep.subr.bf16.mxu0 %v5572_v14  ;;  %v328_v14 = vld [vmem:[#allocation8 + $0x2b8] sm:$0xff]  ;;  %v5604_v5 = vpack.c.bf16 %v1333_v61, %v1329_v60  ;;  %v1365_v60 = vld [vmem:[#allocation11 + $0x128] sm:$0xff]  ;;  %v1363_v61 = vld [vmem:[#allocation11 + $0x118] sm:$0xff] }
 0x1e0   :  { %v7384_v23 = vpop.f32.mrb[0].mxu0 }
 0x1e1   :  { %v7386_v28 = vpop.f32.mrb[1].mxu0 }
 0x1e2   :  { %621 = vmatmul.mubr.f32.vlgmr.msra.gmra.mrb[0].mxu1 %v7386_v28  ;;  %782 = vmatmul.mubr.f32.vlgmr.msra.gmra.mrb[16].mxu0 %v7386_v28 }
 0x1e3   :  { %626 = vmatprep.mubr.f32.mxu1 %v8405_v8  ;;  %787 = vmatprep.mubr.f32.mxu0 %v8405_v8 }
 0x1e4   :  { %v7392_v37 = vpop.f32.mrb[2].mxu0  ;;  %5543 = vmatpush1.bf16.msra.mxu1 %v5542_v24  ;;  %5575 = vmatpush1.bf16.msra.mxu0 %v5574_v25  ;;  %v5592_v24 = vpack.c.bf16 %v336_v15, %v328_v14  ;;  %v327_v25 = vld [vmem:[#allocation8 + $0x2b0] sm:$0xff]  ;;  %v1339_v15 = vld [vmem:[#allocation11 + $0x58] sm:$0xff] }
 0x1e5   :  { %v7394_v42 = vpop.f32.mrb[3].mxu0  ;;  %5545 = vmatprep.subr.bf16.mxu1 %v5544_v29  ;;  %5577 = vmatprep.subr.bf16.mxu0 %v5576_v30  ;;  %v350_v29 = vld [vmem:[#allocation8 + $0x368] sm:$0xff]  ;;  %v344_v30 = vld [vmem:[#allocation8 + $0x338] sm:$0xff]  ;;  %v5594_v34 = vpack.c.bf16 %v335_v26, %v327_v25  ;;  %v1341_v14 = vld [vmem:[#allocation11 + $0x68] sm:$0xff] }
 0x1e6   :  { %627 = vmatmul.mubr.f32.gmra.mrb[2].mxu1 %v7384_v23  ;;  %788 = vmatmul.mubr.f32.gmra.mrb[18].mxu0 %v7384_v23  ;;  %v5596_v40 = vpack.c.bf16 %v352_v31, %v344_v30  ;;  %v1338_v26 = vld [vmem:[#allocation11 + $0x50] sm:$0xff]  ;;  %v1349_v30 = vld [vmem:[#allocation11 + $0xa8] sm:$0xff]  ;;  %v1347_v31 = vld [vmem:[#allocation11 + $0x98] sm:$0xff] }
 0x1e7   :  { %632 = vmatprep.mubr.f32.mxu1 %v8405_v8  ;;  %793 = vmatprep.mubr.f32.mxu0 %v8405_v8 }
 0x1e8   :  { %v7400_v51 = vpop.f32.mrb[4].mxu0  ;;  %5547 = vmatpush1.bf16.msra.mxu1 %v5546_v38  ;;  %5579 = vmatpush1.bf16.msra.mxu0 %v5578_v39  ;;  %v5564_v39 = vpack.c.bf16 %v350_v29, %v342_v27  ;;  %v1342_v27 = vld [vmem:[#allocation11 + $0x70] sm:$0xff]  ;;  %v1345_v29 = vld [vmem:[#allocation11 + $0x88] sm:$0xff] }
 0x1e9   :  { %v7402_v56 = vpop.f32.mrb[5].mxu0  ;;  %5549 = vmatprep.subr.bf16.mxu1 %v5548_v43  ;;  %5581 = vmatprep.subr.bf16.mxu0 %v5580_v44  ;;  %v351_v43 = vld [vmem:[#allocation8 + $0x370] sm:$0xff]  ;;  %v358_v44 = vld [vmem:[#allocation8 + $0x3a8] sm:$0xff]  ;;  %v5866_v35 = vpack.c.bf16 %v1342_v27, %v1338_v26  ;;  %v1379_v27 = vld [vmem:[#allocation11 + $0x198] sm:$0xff] }
 0x1ea   :  { %633 = vmatmul.mubr.f32.gmra.mrb[4].mxu1 %v7394_v42  ;;  %794 = vmatmul.mubr.f32.gmra.mrb[20].mxu0 %v7394_v42  ;;  %v5598_v50 = vpack.c.bf16 %v351_v43, %v343_v41  ;;  %v5568_v55 = vpack.c.bf16 %v366_v45, %v358_v44  ;;  %v1346_v43 = vld [vmem:[#allocation11 + $0x90] sm:$0xff]  ;;  %v1357_v45 = vld [vmem:[#allocation11 + $0xe8] sm:$0xff] }
 0x1eb   :  { %638 = vmatprep.mubr.f32.mxu1 %v8405_v8  ;;  %799 = vmatprep.mubr.f32.mxu0 %v8405_v8  ;;  %v1350_v44 = vld [vmem:[#allocation11 + $0xb0] sm:$0xff]  ;;  %v1381_v26 = vld [vmem:[#allocation11 + $0x1a8] sm:$0xff] }
 0x1ec   :  { %v7408_v1 = vpop.f32.mrb[6].mxu0  ;;  %5551 = vmatpush1.bf16.msra.mxu1 %v5550_v52  ;;  %5583 = vmatpush1.bf16.msra.mxu0 %v5582_v53  ;;  %v357_v52 = vld [vmem:[#allocation8 + $0x3a0] sm:$0xff] }
 0x1ed   :  { %v7410_v6 = vpop.f32.mrb[7].mxu0  ;;  %5553 = vmatprep.subr.bf16.mxu1 %v5552_v57  ;;  %5585 = vmatprep.subr.bf16.mxu0 %v5584_v58  ;;  %v365_v53 = vld [vmem:[#allocation8 + $0x3e0] sm:$0xff]  ;;  %v5600_v57 = vpack.c.bf16 %v368_v47, %v360_v46  ;;  %v359_v58 = vld [vmem:[#allocation8 + $0x3b0] sm:$0xff] }
 0x1ee   :  { %639 = vmatmul.mubr.f32.gmra.mrb[6].mxu1 %v7392_v37  ;;  %800 = vmatmul.mubr.f32.gmra.mrb[22].mxu0 %v7392_v37  ;;  %v1355_v46 = vld [vmem:[#allocation11 + $0xd8] sm:$0xff] }
 0x1ef   :  { %644 = vmatprep.mubr.f32.mxu1 %v8405_v8  ;;  %805 = vmatprep.mubr.f32.mxu0 %v8405_v8  ;;  %v1359_v47 = vld [vmem:[#allocation11 + $0xf8] sm:$0xff] }
 0x1f0   :  { %v7416_v16 = vpop.f32.mrb[8].mxu0  ;;  %5555 = vmatpush1.bf16.msra.mxu1 %v5554_v2  ;;  %5587 = vmatpush1.bf16.msra.mxu0 %v5586_v3  ;;  %v5570_v2 = vpack.c.bf16 %v365_v53, %v357_v52  ;;  %v5602_v3 = vpack.c.bf16 %v367_v59, %v359_v58  ;;  %v1352_v52 = vld [vmem:[#allocation11 + $0xc0] sm:$0xff]  ;;  %v1354_v58 = vld [vmem:[#allocation11 + $0xd0] sm:$0xff] }
 0x1f1   :  { %v7418_v21 = vpop.f32.mrb[9].mxu0  ;;  %5557 = vmatprep.subr.bf16.mxu1 %v5556_v7  ;;  %5589 = vmatprep.subr.bf16.mxu0 %v5588_v9  ;;  %v5860_v7 = vpack.c.bf16 %v1335_v63, %v1331_v62  ;;  %v1328_v9 = vld [vmem:[#allocation11] sm:$0xff]  ;;  %v1358_v59 = vld [vmem:[#allocation11 + $0xf0] sm:$0xff]  ;;  %v1367_v62 = vld [vmem:[#allocation11 + $0x138] sm:$0xff] }
 0x1f2   :  { %645 = vmatmul.mubr.f32.gmra.mrb[8].mxu1 %v7402_v56  ;;  %806 = vmatmul.mubr.f32.gmra.mrb[24].mxu0 %v7402_v56  ;;  %v1356_v53 = vld [vmem:[#allocation11 + $0xe0] sm:$0xff] }
 0x1f3   :  { %650 = vmatprep.mubr.f32.mxu1 %v8405_v8  ;;  %811 = vmatprep.mubr.f32.mxu0 %v8405_v8  ;;  %v5618_v63 = vpack.c.bf16 %v1356_v53, %v1352_v52  ;;  %v1386_v52 = vld [vmem:[#allocation11 + $0x1d0] sm:$0xff] }
 0x1f4   :  { %v7424_v32 = vpop.f32.mrb[10].mxu0  ;;  %5559 = vmatpush1.bf16.msra.mxu1 %v5558_v17  ;;  %5591 = vmatpush1.bf16.msra.mxu0 %v5590_v18  ;;  %v1343_v17 = vld [vmem:[#allocation11 + $0x78] sm:$0xff]  ;;  %v5606_v18 = vpack.c.bf16 %v1332_v10, %v1328_v9  ;;  %v5876_v9 = vpack.c.bf16 %v1367_v62, %v1363_v61  ;;  %v1362_v10 = vld [vmem:[#allocation11 + $0x110] sm:$0xff]  ;;  %v1396_v61 = vld [vmem:[#allocation11 + $0x220] sm:$0xff] }
 0x1f5   :  { %v7426_v38 = vpop.f32.mrb[11].mxu0  ;;  %5561 = vmatprep.subr.bf16.mxu1 %v5560_v22  ;;  %5593 = vmatprep.subr.bf16.mxu0 %v5592_v24  ;;  %v1340_v22 = vld [vmem:[#allocation11 + $0x60] sm:$0xff]  ;;  %v5608_v24 = vpack.c.bf16 %v1341_v14, %v1337_v13  ;;  %v5864_v25 = vpack.c.bf16 %v1343_v17, %v1339_v15  ;;  %v1371_v13 = vld [vmem:[#allocation11 + $0x158] sm:$0xff]  ;;  %v5878_v17 = vpack.c.bf16 %v1366_v11, %v1362_v10  ;;  %v1390_v53 = vld [vmem:[#allocation11 + $0x1f0] sm:$0xff] }
 0x1f6   :  { %651 = vmatmul.mubr.f32.gmra.mrb[10].mxu1 %v7400_v51  ;;  %812 = vmatmul.mubr.f32.gmra.mrb[26].mxu0 %v7400_v51  ;;  %v1375_v14 = vld [vmem:[#allocation11 + $0x178] sm:$0xff] }
 0x1f7   :  { %656 = vmatprep.mubr.f32.mxu1 %v8405_v8  ;;  %817 = vmatprep.mubr.f32.mxu0 %v8405_v8 }
 0x1f8   :  { %v7432_v48 = vpop.f32.mrb[12].mxu0  ;;  %5563 = vmatpush1.bf16.msra.mxu1 %v5562_v33  ;;  %5595 = vmatpush1.bf16.msra.mxu0 %v5594_v34  ;;  %v1351_v33 = vld [vmem:[#allocation11 + $0xb8] sm:$0xff]  ;;  %v5610_v34 = vpack.c.bf16 %v1340_v22, %v1336_v20  ;;  %v5880_v22 = vpack.c.bf16 %v1375_v14, %v1371_v13 }
 0x1f9   :  { %v7434_v54 = vpop.f32.mrb[13].mxu0  ;;  %5565 = vmatprep.subr.bf16.mxu1 %v5564_v39  ;;  %5597 = vmatprep.subr.bf16.mxu0 %v5596_v40  ;;  %v1348_v39 = vld [vmem:[#allocation11 + $0xa0] sm:$0xff]  ;;  %v5612_v40 = vpack.c.bf16 %v1349_v30, %v1345_v29  ;;  %v5868_v41 = vpack.c.bf16 %v1351_v33, %v1347_v31  ;;  %v1383_v29 = vld [vmem:[#allocation11 + $0x1b8] sm:$0xff] }
 0x1fa   :  { %657 = vmatmul.mubr.f32.gmra.mrb[12].mxu1 %v7410_v6  ;;  %818 = vmatmul.mubr.f32.gmra.mrb[28].mxu0 %v7410_v6  ;;  %v1376_v33 = vld [vmem:[#allocation11 + $0x180] sm:$0xff] }
 0x1fb   :  { %662 = vmatprep.mubr.f32.mxu1 %v8405_v8  ;;  %823 = vmatprep.mubr.f32.mxu0 %v8405_v8 }
 0x1fc   :  { %v7440_v0 = vpop.f32.mrb[14].mxu0  ;;  %5567 = vmatpush1.bf16.msra.mxu1 %v5566_v49  ;;  %5599 = vmatpush1.bf16.msra.mxu0 %v5598_v50  ;;  %v5614_v49 = vpack.c.bf16 %v1348_v39, %v1344_v36  ;;  %v5870_v50 = vpack.c.bf16 %v1350_v44, %v1346_v43  ;;  %v5884_v36 = vpack.c.bf16 %v1383_v29, %v1379_v27  ;;  %v1378_v39 = vld [vmem:[#allocation11 + $0x190] sm:$0xff]  ;;  %v1387_v43 = vld [vmem:[#allocation11 + $0x1d8] sm:$0xff] }
 0x1fd   :  { %v7442_v4 = vpop.f32.mrb[15].mxu0  ;;  %5569 = vmatprep.subr.bf16.mxu1 %v5568_v55  ;;  %5601 = vmatprep.subr.bf16.mxu0 %v5600_v57  ;;  %v5872_v57 = vpack.c.bf16 %v1359_v47, %v1355_v46  ;;  %v1391_v44 = vld [vmem:[#allocation11 + $0x1f8] sm:$0xff]  ;;  %v1384_v46 = vld [vmem:[#allocation11 + $0x1c0] sm:$0xff]  ;;  %v1410_v29 = vld [vmem:[#allocation11 + $0x290] sm:$0xff] }
 0x1fe   :  { %663 = vmatmul.mubr.f32.gmra.mrb[14].mxu1 %v7408_v1  ;;  %824 = vmatmul.mubr.f32.gmra.mrb[30].mxu0 %v7408_v1  ;;  %v1388_v47 = vld [vmem:[#allocation11 + $0x1e0] sm:$0xff] }
 0x1ff   :  { %668 = vmatprep.mubr.f32.mxu1 %v8405_v8  ;;  %829 = vmatprep.mubr.f32.mxu0 %v8405_v8 }
 0x200   :  { %5571 = vmatpush1.bf16.msra.mxu1 %v5570_v2  ;;  %5603 = vmatpush1.bf16.msra.mxu0 %v5602_v3  ;;  %v5874_v2 = vpack.c.bf16 %v1358_v59, %v1354_v58  ;;  %v1360_v3 = vld [vmem:[#allocation11 + $0x100] sm:$0xff]  ;;  %v1399_v58 = vld [vmem:[#allocation11 + $0x238] sm:$0xff]  ;;  %v5634_v59 = vpack.c.bf16 %v1388_v47, %v1384_v46 }
 0x201   :  { %5605 = vmatprep.subr.bf16.mxu1 %v5604_v5  ;;  %5861 = vmatprep.subr.bf16.mxu0 %v5860_v7  ;;  %v1364_v5 = vld [vmem:[#allocation11 + $0x120] sm:$0xff]  ;;  %v1431_v46 = vld [vmem:[#allocation11 + $0x338] sm:$0xff] }
 0x202   :  { %669 = vmatmul.mubr.f32.gmra.mrb[16].mxu1 %v7418_v21  ;;  %830 = vmatmul.mubr.f32.gmra.mrb[32].mxu0 %v7418_v21  ;;  %v5622_v15 = vpack.c.bf16 %v1364_v5, %v1360_v3  ;;  %v1398_v3 = vld [vmem:[#allocation11 + $0x230] sm:$0xff]  ;;  %v1405_v5 = vld [vmem:[#allocation11 + $0x268] sm:$0xff] }
 0x203   :  { %674 = vmatprep.mubr.f32.mxu1 %v8405_v8  ;;  %835 = vmatprep.mubr.f32.mxu0 %v8405_v8 }
 0x206   :  { %675 = vmatmul.mubr.f32.gmra.mrb[18].mxu1 %v7416_v16  ;;  %836 = vmatmul.mubr.f32.gmra.mrb[34].mxu0 %v7416_v16 }
 0x207   :  { %680 = vmatprep.mubr.f32.mxu1 %v8405_v8  ;;  %841 = vmatprep.mubr.f32.mxu0 %v8405_v8 }
 0x20a   :  { %681 = vmatmul.mubr.f32.gmra.mrb[20].mxu1 %v7426_v38  ;;  %842 = vmatmul.mubr.f32.gmra.mrb[36].mxu0 %v7426_v38 }
 0x20b   :  { %686 = vmatprep.mubr.f32.mxu1 %v8405_v8  ;;  %847 = vmatprep.mubr.f32.mxu0 %v8405_v8 }
 0x20e   :  { %687 = vmatmul.mubr.f32.gmra.mrb[22].mxu1 %v7424_v32  ;;  %848 = vmatmul.mubr.f32.gmra.mrb[38].mxu0 %v7424_v32 }
 0x20f   :  { %692 = vmatprep.mubr.f32.mxu1 %v8405_v8  ;;  %853 = vmatprep.mubr.f32.mxu0 %v8405_v8 }
 0x212   :  { %693 = vmatmul.mubr.f32.gmra.mrb[24].mxu1 %v7434_v54  ;;  %854 = vmatmul.mubr.f32.gmra.mrb[40].mxu0 %v7434_v54 }
 0x213   :  { %698 = vmatprep.mubr.f32.mxu1 %v8405_v8  ;;  %859 = vmatprep.mubr.f32.mxu0 %v8405_v8 }
 0x216   :  { %699 = vmatmul.mubr.f32.gmra.mrb[26].mxu1 %v7432_v48  ;;  %860 = vmatmul.mubr.f32.gmra.mrb[42].mxu0 %v7432_v48 }
 0x217   :  { %704 = vmatprep.mubr.f32.mxu1 %v8405_v8  ;;  %865 = vmatprep.mubr.f32.mxu0 %v8405_v8 }
 0x21a   :  { %705 = vmatmul.mubr.f32.gmra.mrb[28].mxu1 %v7442_v4  ;;  %866 = vmatmul.mubr.f32.gmra.mrb[44].mxu0 %v7442_v4 }
 0x21b   :  { %710 = vmatprep.mubr.f32.mxu1 %v8405_v8  ;;  %871 = vmatprep.mubr.f32.mxu0 %v8405_v8 }
 0x21e   :  { %711 = vmatmul.mubr.f32.gmra.mrb[30].mxu1 %v7440_v0  ;;  %872 = vmatmul.mubr.f32.gmra.mrb[46].mxu0 %v7440_v0 }
 0x21f   :  { %942 = vmatprep.mubr.f32.mxu1 %v8405_v8  ;;  %1103 = vmatprep.mubr.f32.mxu0 %v8405_v8 }
 0x222   :  { %943 = vmatmul.mubr.f32.vlgmr.msra.gmra.mrb[32].mxu1 %v7386_v28  ;;  %1104 = vmatmul.mubr.f32.vlgmr.msra.gmra.mrb[48].mxu0 %v7386_v28  ;;  %v1353_v28 = vld [vmem:[#allocation11 + $0xc8] sm:$0xff] }
 0x223   :  { %948 = vmatprep.mubr.f32.mxu1 %v8405_v8  ;;  %1109 = vmatprep.mubr.f32.mxu0 %v8405_v8  ;;  %v5616_v55 = vpack.c.bf16 %v1357_v45, %v1353_v28 }
 0x224   :  { %5607 = vmatpush1.bf16.msra.mxu1 %v5606_v18  ;;  %5863 = vmatpush1.bf16.msra.mxu0 %v5862_v19  ;;  %v1368_v18 = vld [vmem:[#allocation11 + $0x140] sm:$0xff] }
 0x225   :  { %5609 = vmatprep.subr.bf16.mxu1 %v5608_v24  ;;  %5865 = vmatprep.subr.bf16.mxu0 %v5864_v25  ;;  %v1372_v19 = vld [vmem:[#allocation11 + $0x160] sm:$0xff]  ;;  %v1370_v24 = vld [vmem:[#allocation11 + $0x150] sm:$0xff] }
 0x226   :  { %949 = vmatmul.mubr.f32.gmra.mrb[34].mxu1 %v7384_v23  ;;  %1110 = vmatmul.mubr.f32.gmra.mrb[50].mxu0 %v7384_v23  ;;  %v1361_v23 = vld [vmem:[#allocation11 + $0x108] sm:$0xff]  ;;  %v1374_v25 = vld [vmem:[#allocation11 + $0x170] sm:$0xff]  ;;  %v5626_v30 = vpack.c.bf16 %v1372_v19, %v1368_v18  ;;  %v1411_v19 = vld [vmem:[#allocation11 + $0x298] sm:$0xff] }
 0x227   :  { %954 = vmatprep.mubr.f32.mxu1 %v8405_v8  ;;  %1115 = vmatprep.mubr.f32.mxu0 %v8405_v8  ;;  %v5620_v7 = vpack.c.bf16 %v1365_v60, %v1361_v23  ;;  %v5882_v31 = vpack.c.bf16 %v1374_v25, %v1370_v24  ;;  %v5890_v23 = vpack.c.bf16 %v1390_v53, %v1386_v52  ;;  %v1392_v60 = vld [vmem:[#allocation11 + $0x200] sm:$0xff]  ;;  %v1413_v18 = vld [vmem:[#allocation11 + $0x2a8] sm:$0xff] }
 0x228   :  { %5611 = vmatpush1.bf16.msra.mxu1 %v5610_v34  ;;  %5867 = vmatpush1.bf16.msra.mxu0 %v5866_v35  ;;  %v1380_v34 = vld [vmem:[#allocation11 + $0x1a0] sm:$0xff]  ;;  %v5638_v10 = vpack.c.bf16 %v1396_v61, %v1392_v60 }
 0x229   :  { %5613 = vmatprep.subr.bf16.mxu1 %v5612_v40  ;;  %5869 = vmatprep.subr.bf16.mxu0 %v5868_v41  ;;  %v1382_v40 = vld [vmem:[#allocation11 + $0x1b0] sm:$0xff]  ;;  %v1389_v41 = vld [vmem:[#allocation11 + $0x1e8] sm:$0xff]  ;;  %v5630_v28 = vpack.c.bf16 %v1380_v34, %v1376_v33  ;;  %v1408_v25 = vld [vmem:[#allocation11 + $0x280] sm:$0xff] }
 0x22a   :  { %955 = vmatmul.mubr.f32.gmra.mrb[36].mxu1 %v7394_v42  ;;  %1116 = vmatmul.mubr.f32.gmra.mrb[52].mxu0 %v7394_v42  ;;  %v1369_v42 = vld [vmem:[#allocation11 + $0x148] sm:$0xff]  ;;  %v5886_v45 = vpack.c.bf16 %v1382_v40, %v1378_v39  ;;  %v1419_v33 = vld [vmem:[#allocation11 + $0x2d8] sm:$0xff]  ;;  %v1416_v39 = vld [vmem:[#allocation11 + $0x2c0] sm:$0xff] }
 0x22b   :  { %960 = vmatprep.mubr.f32.mxu1 %v8405_v8  ;;  %1121 = vmatprep.mubr.f32.mxu0 %v8405_v8  ;;  %v5624_v20 = vpack.c.bf16 %v1373_v12, %v1369_v42  ;;  %v1400_v42 = vld [vmem:[#allocation11 + $0x240] sm:$0xff]  ;;  %v1423_v34 = vld [vmem:[#allocation11 + $0x2f8] sm:$0xff] }
 0x22c   :  { %5615 = vmatpush1.bf16.msra.mxu1 %v5614_v49  ;;  %5871 = vmatpush1.bf16.msra.mxu0 %v5870_v50  ;;  %v5888_v50 = vpack.c.bf16 %v1391_v44, %v1387_v43  ;;  %v1404_v12 = vld [vmem:[#allocation11 + $0x260] sm:$0xff]  ;;  %v1418_v43 = vld [vmem:[#allocation11 + $0x2d0] sm:$0xff] }
 0x22d   :  { %5617 = vmatprep.subr.bf16.mxu1 %v5616_v55  ;;  %5873 = vmatprep.subr.bf16.mxu0 %v5872_v57  ;;  %v1397_v55 = vld [vmem:[#allocation11 + $0x228] sm:$0xff]  ;;  %v1395_v57 = vld [vmem:[#allocation11 + $0x218] sm:$0xff]  ;;  %v1420_v40 = vld [vmem:[#allocation11 + $0x2e0] sm:$0xff] }
 0x22e   :  { %961 = vmatmul.mubr.f32.gmra.mrb[38].mxu1 %v7392_v37  ;;  %1122 = vmatmul.mubr.f32.gmra.mrb[54].mxu0 %v7392_v37  ;;  %v1377_v37 = vld [vmem:[#allocation11 + $0x188] sm:$0xff]  ;;  %v1422_v44 = vld [vmem:[#allocation11 + $0x2f0] sm:$0xff]  ;;  %v5650_v47 = vpack.c.bf16 %v1420_v40, %v1416_v39  ;;  %v1428_v52 = vld [vmem:[#allocation11 + $0x320] sm:$0xff] }
 0x22f   :  { %966 = vmatprep.mubr.f32.mxu1 %v8405_v8  ;;  %1127 = vmatprep.mubr.f32.mxu0 %v8405_v8  ;;  %v5628_v35 = vpack.c.bf16 %v1381_v26, %v1377_v37  ;;  %v1412_v37 = vld [vmem:[#allocation11 + $0x2a0] sm:$0xff] }
 0x230   :  { %5619 = vmatpush1.bf16.msra.mxu1 %v5618_v63  ;;  %5875 = vmatpush1.bf16.msra.mxu0 %v5874_v2  ;;  %v5892_v63 = vpack.c.bf16 %v1399_v58, %v1395_v57  ;;  %v1394_v2 = vld [vmem:[#allocation11 + $0x210] sm:$0xff]  ;;  %v1437_v58 = vld [vmem:[#allocation11 + $0x368] sm:$0xff] }
 0x231   :  { %5621 = vmatprep.subr.bf16.mxu1 %v5620_v7  ;;  %5877 = vmatprep.subr.bf16.mxu0 %v5876_v9  ;;  %v1403_v7 = vld [vmem:[#allocation11 + $0x258] sm:$0xff]  ;;  %v5894_v11 = vpack.c.bf16 %v1398_v3, %v1394_v2  ;;  %v1430_v57 = vld [vmem:[#allocation11 + $0x330] sm:$0xff] }
 0x232   :  { %967 = vmatmul.mubr.f32.gmra.mrb[40].mxu1 %v7402_v56  ;;  %1128 = vmatmul.mubr.f32.gmra.mrb[56].mxu0 %v7402_v56  ;;  %v1385_v56 = vld [vmem:[#allocation11 + $0x1c8] sm:$0xff]  ;;  %v1407_v9 = vld [vmem:[#allocation11 + $0x278] sm:$0xff] }
 0x233   :  { %972 = vmatprep.mubr.f32.mxu1 %v8405_v8  ;;  %1133 = vmatprep.mubr.f32.mxu0 %v8405_v8  ;;  %v5632_v49 = vpack.c.bf16 %v1389_v41, %v1385_v56  ;;  %v5896_v14 = vpack.c.bf16 %v1407_v9, %v1403_v7  ;;  %v5904_v41 = vpack.c.bf16 %v1423_v34, %v1419_v33  ;;  %v1445_v7 = vld [vmem:[#allocation11 + $0x3a8] sm:$0xff]  ;;  %v1443_v9 = vld [vmem:[#allocation11 + $0x398] sm:$0xff] }
 0x234   :  { %5623 = vmatpush1.bf16.msra.mxu1 %v5622_v15  ;;  %5879 = vmatpush1.bf16.msra.mxu0 %v5878_v17  ;;  %v1402_v15 = vld [vmem:[#allocation11 + $0x250] sm:$0xff]  ;;  %v1463_v33 = vld [vmem:[#allocation11 + $0x438] sm:$0xff] }
 0x235   :  { %5625 = vmatprep.subr.bf16.mxu1 %v5624_v20  ;;  %5881 = vmatprep.subr.bf16.mxu0 %v5880_v22  ;;  %v1406_v17 = vld [vmem:[#allocation11 + $0x270] sm:$0xff]  ;;  %v1415_v20 = vld [vmem:[#allocation11 + $0x2b8] sm:$0xff]  ;;  %v5642_v22 = vpack.c.bf16 %v1404_v12, %v1400_v42  ;;  %v1440_v12 = vld [vmem:[#allocation11 + $0x380] sm:$0xff] }
 0x236   :  { %973 = vmatmul.mubr.f32.gmra.mrb[42].mxu1 %v7400_v51  ;;  %1134 = vmatmul.mubr.f32.gmra.mrb[58].mxu0 %v7400_v51  ;;  %v1393_v51 = vld [vmem:[#allocation11 + $0x208] sm:$0xff]  ;;  %v5898_v24 = vpack.c.bf16 %v1406_v17, %v1402_v15  ;;  %v5900_v27 = vpack.c.bf16 %v1415_v20, %v1411_v19  ;;  %v1442_v17 = vld [vmem:[#allocation11 + $0x390] sm:$0xff]  ;;  %v1451_v19 = vld [vmem:[#allocation11 + $0x3d8] sm:$0xff] }
 0x237   :  { %978 = vmatprep.mubr.f32.mxu1 %v8405_v8  ;;  %1139 = vmatprep.mubr.f32.mxu0 %v8405_v8  ;;  %v5636_v62 = vpack.c.bf16 %v1397_v55, %v1393_v51  ;;  %v1426_v55 = vld [vmem:[#allocation11 + $0x310] sm:$0xff]  ;;  %v1455_v20 = vld [vmem:[#allocation11 + $0x3f8] sm:$0xff] }
 0x238   :  { %5627 = vmatpush1.bf16.msra.mxu1 %v5626_v30  ;;  %5883 = vmatpush1.bf16.msra.mxu0 %v5882_v31  ;;  %v1414_v30 = vld [vmem:[#allocation11 + $0x2b0] sm:$0xff]  ;;  %v1421_v31 = vld [vmem:[#allocation11 + $0x2e8] sm:$0xff]  ;;  %v5910_v61 = vpack.c.bf16 %v1430_v57, %v1426_v55 }
 0x239   :  { %5629 = vmatprep.subr.bf16.mxu1 %v5628_v35  ;;  %5885 = vmatprep.subr.bf16.mxu0 %v5884_v36  ;;  %v5646_v35 = vpack.c.bf16 %v1412_v37, %v1408_v25  ;;  %v5902_v36 = vpack.c.bf16 %v1414_v30, %v1410_v29  ;;  %v1448_v25 = vld [vmem:[#allocation11 + $0x3c0] sm:$0xff]  ;;  %v1450_v29 = vld [vmem:[#allocation11 + $0x3d0] sm:$0xff]  ;;  %v1469_v57 = vld [vmem:[#allocation11 + $0x468] sm:$0xff] }
 0x23a   :  { %979 = vmatmul.mubr.f32.gmra.mrb[44].mxu1 %v7410_v6  ;;  %1140 = vmatmul.mubr.f32.gmra.mrb[60].mxu0 %v7410_v6  ;;  %v1401_v6 = vld [vmem:[#allocation11 + $0x248] sm:$0xff]  ;;  %v1452_v37 = vld [vmem:[#allocation11 + $0x3e0] sm:$0xff]  ;;  %v1454_v30 = vld [vmem:[#allocation11 + $0x3f0] sm:$0xff] }
 0x23b   :  { %984 = vmatprep.mubr.f32.mxu1 %v8405_v8  ;;  %1145 = vmatprep.mubr.f32.mxu0 %v8405_v8  ;;  %v5640_v13 = vpack.c.bf16 %v1405_v5, %v1401_v6  ;;  %v1434_v6 = vld [vmem:[#allocation11 + $0x350] sm:$0xff]  ;;  %v5666_v34 = vpack.c.bf16 %v1452_v37, %v1448_v25 }
 0x23c   :  { %5631 = vmatpush1.bf16.msra.mxu1 %v5630_v28  ;;  %5887 = vmatpush1.bf16.msra.mxu0 %v5886_v45  ;;  %v1429_v28 = vld [vmem:[#allocation11 + $0x328] sm:$0xff]  ;;  %v1427_v45 = vld [vmem:[#allocation11 + $0x318] sm:$0xff]  ;;  %v1438_v5 = vld [vmem:[#allocation11 + $0x370] sm:$0xff] }
 0x23d   :  { %5633 = vmatprep.subr.bf16.mxu1 %v5632_v49  ;;  %5889 = vmatprep.subr.bf16.mxu0 %v5888_v50  ;;  %v5906_v49 = vpack.c.bf16 %v1422_v44, %v1418_v43  ;;  %v1424_v50 = vld [vmem:[#allocation11 + $0x300] sm:$0xff]  ;;  %v5908_v51 = vpack.c.bf16 %v1431_v46, %v1427_v45  ;;  %v5914_v42 = vpack.c.bf16 %v1438_v5, %v1434_v6 }
 0x23e   :  { %985 = vmatmul.mubr.f32.gmra.mrb[46].mxu1 %v7408_v1  ;;  %1146 = vmatmul.mubr.f32.gmra.mrb[62].mxu0 %v7408_v1  ;;  %v1409_v1 = vld [vmem:[#allocation11 + $0x288] sm:$0xff]  ;;  %v5654_v60 = vpack.c.bf16 %v1428_v52, %v1424_v50  ;;  %v1456_v45 = vld [vmem:[#allocation11 + $0x400] sm:$0xff]  ;;  %v1458_v52 = vld [vmem:[#allocation11 + $0x410] sm:$0xff] }
 0x23f   :  { %990 = vmatprep.mubr.f32.mxu1 %v8405_v8  ;;  %1151 = vmatprep.mubr.f32.mxu0 %v8405_v8  ;;  %v5644_v26 = vpack.c.bf16 %v1413_v18, %v1409_v1  ;;  %v1446_v1 = vld [vmem:[#allocation11 + $0x3b0] sm:$0xff]  ;;  %v1453_v18 = vld [vmem:[#allocation11 + $0x3e8] sm:$0xff]  ;;  %v1460_v46 = vld [vmem:[#allocation11 + $0x420] sm:$0xff] }
 0x240   :  { %5635 = vmatpush1.bf16.msra.mxu1 %v5634_v59  ;;  %5891 = vmatpush1.bf16.msra.mxu0 %v5890_v23  ;;  %v1435_v59 = vld [vmem:[#allocation11 + $0x358] sm:$0xff] }
 0x241   :  { %5637 = vmatprep.subr.bf16.mxu1 %v5636_v62  ;;  %5893 = vmatprep.subr.bf16.mxu0 %v5892_v63  ;;  %v1439_v23 = vld [vmem:[#allocation11 + $0x378] sm:$0xff]  ;;  %v1432_v62 = vld [vmem:[#allocation11 + $0x340] sm:$0xff] }
 0x242   :  { %991 = vmatmul.mubr.f32.gmra.mrb[48].mxu1 %v7418_v21  ;;  %1152 = vmatmul.mubr.f32.gmra.mrb[64].mxu0 %v7418_v21  ;;  %v1417_v21 = vld [vmem:[#allocation11 + $0x2c8] sm:$0xff]  ;;  %v1436_v63 = vld [vmem:[#allocation11 + $0x360] sm:$0xff]  ;;  %v5912_v3 = vpack.c.bf16 %v1439_v23, %v1435_v59 }
 0x243   :  { %996 = vmatprep.mubr.f32.mxu1 %v8405_v8  ;;  %1157 = vmatprep.mubr.f32.mxu0 %v8405_v8  ;;  %v5648_v56 = vpack.c.bf16 %v1421_v31, %v1417_v21  ;;  %v1461_v21 = vld [vmem:[#allocation11 + $0x428] sm:$0xff]  ;;  %v1459_v31 = vld [vmem:[#allocation11 + $0x418] sm:$0xff] }
 0x244   :  { %5639 = vmatpush1.bf16.msra.mxu1 %v5638_v10  ;;  %5895 = vmatpush1.bf16.msra.mxu0 %v5894_v11  ;;  %v1447_v10 = vld [vmem:[#allocation11 + $0x3b8] sm:$0xff]  ;;  %v5658_v11 = vpack.c.bf16 %v1436_v63, %v1432_v62  ;;  %v5924_v39 = vpack.c.bf16 %v1463_v33, %v1459_v31  ;;  %v1464_v63 = vld [vmem:[#allocation11 + $0x440] sm:$0xff]  ;;  %v1485_v33 = vld [vmem:[#allocation11 + $0x4e8] sm:$0xff] }
 0x245   :  { %5641 = vmatprep.subr.bf16.mxu1 %v5640_v13  ;;  %5897 = vmatprep.subr.bf16.mxu0 %v5896_v14  ;;  %v1444_v13 = vld [vmem:[#allocation11 + $0x3a0] sm:$0xff]  ;;  %v5916_v15 = vpack.c.bf16 %v1447_v10, %v1443_v9  ;;  %v1466_v10 = vld [vmem:[#allocation11 + $0x450] sm:$0xff] }
 0x246   :  { %997 = vmatmul.mubr.f32.gmra.mrb[50].mxu1 %v7416_v16  ;;  %1158 = vmatmul.mubr.f32.gmra.mrb[66].mxu0 %v7416_v16  ;;  %v1425_v16 = vld [vmem:[#allocation11 + $0x308] sm:$0xff] }
 0x247   :  { %1002 = vmatprep.mubr.f32.mxu1 %v8405_v8  ;;  %1163 = vmatprep.mubr.f32.mxu0 %v8405_v8  ;;  %v5652_v53 = vpack.c.bf16 %v1429_v28, %v1425_v16 }
 0x248   :  { %5643 = vmatpush1.bf16.msra.mxu1 %v5642_v22  ;;  %5899 = vmatpush1.bf16.msra.mxu0 %v5898_v24  ;;  %v5662_v22 = vpack.c.bf16 %v1444_v13, %v1440_v12  ;;  %v5918_v24 = vpack.c.bf16 %v1446_v1, %v1442_v17  ;;  %v1477_v13 = vld [vmem:[#allocation11 + $0x4a8] sm:$0xff] }
 0x249   :  { %5645 = vmatprep.subr.bf16.mxu1 %v5644_v26  ;;  %5901 = vmatprep.subr.bf16.mxu0 %v5900_v27  ;;  %v5920_v27 = vpack.c.bf16 %v1455_v20, %v1451_v19  ;;  %v1472_v20 = vld [vmem:[#allocation11 + $0x480] sm:$0xff] }
 0x24a   :  { %1003 = vmatmul.mubr.f32.gmra.mrb[52].mxu1 %v7426_v38  ;;  %1164 = vmatmul.mubr.f32.gmra.mrb[68].mxu0 %v7426_v38  ;;  %v1433_v38 = vld [vmem:[#allocation11 + $0x348] sm:$0xff] }
 0x24b   :  { %1008 = vmatprep.mubr.f32.mxu1 %v8405_v8  ;;  %1169 = vmatprep.mubr.f32.mxu0 %v8405_v8  ;;  %v5656_v2 = vpack.c.bf16 %v1437_v58, %v1433_v38  ;;  %v1467_v38 = vld [vmem:[#allocation11 + $0x458] sm:$0xff] }
 0x24c   :  { %5647 = vmatpush1.bf16.msra.mxu1 %v5646_v35  ;;  %5903 = vmatpush1.bf16.msra.mxu0 %v5902_v36  ;;  %v5922_v35 = vpack.c.bf16 %v1454_v30, %v1450_v29  ;;  %v1471_v58 = vld [vmem:[#allocation11 + $0x478] sm:$0xff]  ;;  %v1474_v30 = vld [vmem:[#allocation11 + $0x490] sm:$0xff] }
 0x24d   :  { %5649 = vmatprep.subr.bf16.mxu1 %v5648_v56  ;;  %5905 = vmatprep.subr.bf16.mxu0 %v5904_v41  ;;  %v7547_v41 = vld [vmem:[#allocation10] sm:$0xff]  ;;  %v5928_v9 = vpack.c.bf16 %v1471_v58, %v1467_v38  ;;  %v1482_v38 = vld [vmem:[#allocation11 + $0x4d0] sm:$0xff] }
 0x24e   :  { %1009 = vmatmul.mubr.f32.gmra.mrb[54].mxu1 %v7424_v32  ;;  %1170 = vmatmul.mubr.f32.gmra.mrb[70].mxu0 %v7424_v32  ;;  %v1441_v32 = vld [vmem:[#allocation11 + $0x388] sm:$0xff]  ;;  %v1486_v58 = vld [vmem:[#allocation11 + $0x4f0] sm:$0xff] }
 0x24f   :  { %1014 = vmatprep.mubr.f32.mxu1 %v8405_v8  ;;  %1175 = vmatprep.mubr.f32.mxu0 %v8405_v8  ;;  %v5660_v14 = vpack.c.bf16 %v1445_v7, %v1441_v32 }
 0x250   :  { %5651 = vmatpush1.bf16.msra.mxu1 %v5650_v47  ;;  %5907 = vmatpush1.bf16.msra.mxu0 %v5906_v49 }
 0x251   :  { %5653 = vmatprep.subr.bf16.mxu1 %v5652_v53  ;;  %5909 = vmatprep.subr.bf16.mxu0 %v5908_v51  ;;  %v1462_v53 = vld [vmem:[#allocation11 + $0x430] sm:$0xff]  ;;  %v1465_v51 = vld [vmem:[#allocation11 + $0x448] sm:$0xff] }
 0x252   :  { %1015 = vmatmul.mubr.f32.gmra.mrb[56].mxu1 %v7434_v54  ;;  %1176 = vmatmul.mubr.f32.gmra.mrb[72].mxu0 %v7434_v54  ;;  %v1449_v54 = vld [vmem:[#allocation11 + $0x3c8] sm:$0xff]  ;;  %v5926_v62 = vpack.c.bf16 %v1462_v53, %v1458_v52  ;;  %v5672_v7 = vpack.c.bf16 %v1469_v57, %v1465_v51 }
 0x253   :  { %1020 = vmatprep.mubr.f32.mxu1 %v8405_v8  ;;  %1181 = vmatprep.mubr.f32.mxu0 %v8405_v8  ;;  %v5664_v26 = vpack.c.bf16 %v1453_v18, %v1449_v54 }
 0x254   :  { %5655 = vmatpush1.bf16.msra.mxu1 %v5654_v60  ;;  %5911 = vmatpush1.bf16.msra.mxu0 %v5910_v61  ;;  %v5670_v61 = vpack.c.bf16 %v1460_v46, %v1456_v45  ;;  %v1480_v46 = vld [vmem:[#allocation11 + $0x4c0] sm:$0xff] }
 0x255   :  { %5657 = vmatprep.subr.bf16.mxu1 %v5656_v2  ;;  %5913 = vmatprep.subr.bf16.mxu0 %v5912_v3  ;;  %v1468_v2 = vld [vmem:[#allocation11 + $0x460] sm:$0xff] }
 0x256   :  { %1021 = vmatmul.mubr.f32.gmra.mrb[58].mxu1 %v7432_v48  ;;  %1182 = vmatmul.mubr.f32.gmra.mrb[74].mxu0 %v7432_v48  ;;  %v1457_v48 = vld [vmem:[#allocation11 + $0x408] sm:$0xff]  ;;  %v5674_v18 = vpack.c.bf16 %v1468_v2, %v1464_v63  ;;  %v1495_v63 = vld [vmem:[#allocation11 + $0x538] sm:$0xff] }
 0x257   :  { %1026 = vmatprep.mubr.f32.mxu1 %v8405_v8  ;;  %1187 = vmatprep.mubr.f32.mxu0 %v8405_v8  ;;  %v5668_v36 = vpack.c.bf16 %v1461_v21, %v1457_v48  ;;  %v1478_v48 = vld [vmem:[#allocation11 + $0x4b0] sm:$0xff]  ;;  %v1481_v21 = vld [vmem:[#allocation11 + $0x4c8] sm:$0xff] }
 0x258   :  { %5659 = vmatpush1.bf16.msra.mxu1 %v5658_v11  ;;  %5915 = vmatpush1.bf16.msra.mxu0 %v5914_v42  ;;  %v1470_v11 = vld [vmem:[#allocation11 + $0x470] sm:$0xff]  ;;  %v1473_v42 = vld [vmem:[#allocation11 + $0x488] sm:$0xff]  ;;  %v5934_v45 = vpack.c.bf16 %v1478_v48, %v1474_v30  ;;  %v1496_v48 = vld [vmem:[#allocation11 + $0x540] sm:$0xff] }
 0x259   :  { %5661 = vmatprep.subr.bf16.mxu1 %v5660_v14  ;;  %5917 = vmatprep.subr.bf16.mxu0 %v5916_v15  ;;  %v1475_v14 = vld [vmem:[#allocation11 + $0x498] sm:$0xff]  ;;  %v5930_v19 = vpack.c.bf16 %v1470_v11, %v1466_v10  ;;  %v1492_v10 = vld [vmem:[#allocation11 + $0x520] sm:$0xff] }
 0x25a   :  { %1027 = vmatmul.mubr.f32.gmra.mrb[60].mxu1 %v7442_v4  ;;  %1188 = vmatmul.mubr.f32.gmra.mrb[76].mxu0 %v7442_v4  ;;  %v516_v4 = vlaneseq  ;;  %v1479_v15 = vld [vmem:[#allocation11 + $0x4b8] sm:$0xff] }
 0x25b   :  { %1032 = vmatprep.mubr.f32.mxu1 %v8405_v8  ;;  %1193 = vmatprep.mubr.f32.mxu0 %v8405_v8  ;;  %v5932_v29 = vpack.c.bf16 %v1479_v15, %v1475_v14  ;;  %v1574_v8 = vld [vmem:[#allocation11 + $0x7b0] sm:$0xff] }
 0x25c   :  { %5663 = vmatpush1.bf16.msra.mxu1 %v5662_v22  ;;  %5919 = vmatpush1.bf16.msra.mxu0 %v5918_v24  ;;  %v7542_v40 = vshrl.u32 %v516_v4, 7  ;;  %v1476_v22 = vld [vmem:[#allocation11 + $0x4a0] sm:$0xff] }
 0x25d   :  { %5665 = vmatprep.subr.bf16.mxu1 %v5664_v26  ;;  %5921 = vmatprep.subr.bf16.mxu0 %v5920_v27  ;;  %v5676_v27 = vpack.c.bf16 %v1477_v13, %v1473_v42 }
 0x25e   :  { %1033 = vmatmul.mubr.f32.gmra.mrb[62].mxu1 %v7440_v0  ;;  %1194 = vmatmul.mubr.f32.gmra.mrb[78].mxu0 %v7440_v0  ;;  %v7545_v56 = vsub.s32 0, %v7542_v40  ;;  %v7550_v43 = vsub.s32 1, %v7542_v40 }
 0x260   :  { %5667 = vmatpush1.bf16.msra.mxu1 %v5666_v34  ;;  %5923 = vmatpush1.bf16.msra.mxu0 %v5922_v35  ;;  %8412 = vst [vmem:[#allocation32_spill] sm:$0xff] %v7545_v56  ;;  %8413 = vst [vmem:[#allocation33_spill] sm:$0xff] %v7550_v43  ;;  %v7554_v44 = vrot.slane %v7547_v41, %v7545_v56  ;;  %v7558_v0 = vrot.slane %v7547_v41, %v7550_v43  ;;  %v1483_v34 = vld [vmem:[#allocation11 + $0x4d8] sm:$0xff]  ;;  %v1594_v43 = vld [vmem:[#allocation11 + $0x850] sm:$0xff] }
 0x261   :  { %5669 = vmatprep.subr.bf16.mxu1 %v5668_v36  ;;  %5925 = vmatprep.subr.bf16.mxu0 %v5924_v39  ;;  %v1487_v35 = vld [vmem:[#allocation11 + $0x4f8] sm:$0xff]  ;;  %v1605_v56 = vld [vmem:[#allocation11 + $0x8a8] sm:$0xff] }
 0x262   :  { %v5936_v57 = vpack.c.bf16 %v1487_v35, %v1483_v34 }
 0x2b5   :  { %v622_v16 = vpop.f32.mrb[0].mxu1  ;;  %v7560_v28 = vpop.f32.mrb[16].mxu0 }
 0x2b6   :  { %v623_v47 = vadd.f32 %v622_v16, %v7554_v44  ;;  %v624_v49 = vpop.f32.mrb[1].mxu1  ;;  %v7563_v50 = vpop.f32.mrb[17].mxu0  ;;  %v5678_v16 = vpack.c.bf16 %v1476_v22, %v1472_v20  ;;  %v1501_v20 = vld [vmem:[#allocation11 + $0x568] sm:$0xff]  ;;  %v1499_v22 = vld [vmem:[#allocation11 + $0x558] sm:$0xff] }
 0x2b7   :  { %v625_v55 = vadd.f32 %v624_v49, %v7558_v0 }
 0x2b8   :  { %v1200_v3 = vmax.f32 %v623_v47, 0.0  ;;  %v1484_v47 = vld [vmem:[#allocation11 + $0x4e0] sm:$0xff] }
 0x2b9   :  { %v1201_v59 = vmax.f32 %v625_v55, 0.0  ;;  %v628_v23 = vpop.f32.mrb[2].mxu1  ;;  %v7566_v60 = vpop.f32.mrb[18].mxu0  ;;  %v5680_v55 = vpack.c.bf16 %v1485_v33, %v1481_v21  ;;  %v1500_v21 = vld [vmem:[#allocation11 + $0x560] sm:$0xff] }
 0x2ba   :  { %v629_v6 = vadd.f32 %v628_v23, %v7554_v44  ;;  %v630_v5 = vpop.f32.mrb[3].mxu1  ;;  %v7569_v32 = vpop.f32.mrb[19].mxu0 }
 0x2bb   :  { %v631_v12 = vadd.f32 %v630_v5, %v7558_v0  ;;  %1905 = vmatprep.mubr.f32.mxu1 %v1201_v59  ;;  %2549 = vmatprep.mubr.f32.mxu0 %v1201_v59  ;;  %v1489_v59 = vld [vmem:[#allocation11 + $0x508] sm:$0xff]  ;;  %v5682_v5 = vpack.c.bf16 %v1484_v47, %v1480_v46 }
 0x2bc   :  { %1906 = vmatmul.mubr.f32.vlgmr.msra.gmra.mrb[64].mxu1 %v1200_v3  ;;  %2550 = vmatmul.mubr.f32.vlgmr.msra.gmra.mrb[80].mxu0 %v1200_v3  ;;  %v1208_v24 = vmax.f32 %v629_v6, 0.0  ;;  %v1505_v46 = vld [vmem:[#allocation11 + $0x588] sm:$0xff] }
 0x2bd   :  { %v1209_v17 = vmax.f32 %v631_v12, 0.0  ;;  %v634_v1 = vpop.f32.mrb[4].mxu1  ;;  %v7572_v54 = vpop.f32.mrb[20].mxu0  ;;  %5671 = vmatpush1.bf16.msra.mxu1 %v5670_v61  ;;  %5927 = vmatpush1.bf16.msra.mxu0 %v5926_v62  ;;  %v1493_v61 = vld [vmem:[#allocation11 + $0x528] sm:$0xff]  ;;  %v1491_v62 = vld [vmem:[#allocation11 + $0x518] sm:$0xff] }
 0x2be   :  { %v635_v25 = vadd.f32 %v634_v1, %v7554_v44  ;;  %v636_v37 = vpop.f32.mrb[5].mxu1  ;;  %v7575_v26 = vpop.f32.mrb[21].mxu0  ;;  %5673 = vmatprep.subr.bf16.mxu1 %v5672_v7  ;;  %5929 = vmatprep.subr.bf16.mxu0 %v5928_v9  ;;  %v5938_v7 = vpack.c.bf16 %v1486_v58, %v1482_v38  ;;  %v1488_v9 = vld [vmem:[#allocation11 + $0x500] sm:$0xff]  ;;  %v5684_v14 = vpack.c.bf16 %v1493_v61, %v1489_v59  ;;  %v1494_v1 = vld [vmem:[#allocation11 + $0x530] sm:$0xff] }
 0x2bf   :  { %v637_v31 = vadd.f32 %v636_v37, %v7558_v0  ;;  %1911 = vmatprep.mubr.f32.mxu1 %v1209_v17  ;;  %2555 = vmatprep.mubr.f32.mxu0 %v1209_v17  ;;  %v5940_v15 = vpack.c.bf16 %v1495_v63, %v1491_v62  ;;  %v1490_v17 = vld [vmem:[#allocation11 + $0x510] sm:$0xff]  ;;  %v5690_v58 = vpack.c.bf16 %v1500_v21, %v1496_v48  ;;  %v1508_v61 = vld [vmem:[#allocation11 + $0x5a0] sm:$0xff] }
 0x2c0   :  { %1912 = vmatmul.mubr.f32.gmra.mrb[66].mxu1 %v1208_v24  ;;  %2556 = vmatmul.mubr.f32.gmra.mrb[82].mxu0 %v1208_v24  ;;  %v1216_v49 = vmax.f32 %v635_v25, 0.0  ;;  %v1503_v24 = vld [vmem:[#allocation11 + $0x578] sm:$0xff]  ;;  %v5942_v30 = vpack.c.bf16 %v1494_v1, %v1490_v17 }
 0x2c1   :  { %v1217_v36 = vmax.f32 %v637_v31, 0.0  ;;  %v640_v39 = vpop.f32.mrb[6].mxu1  ;;  %v7578_v4 = vpop.f32.mrb[22].mxu0  ;;  %5675 = vmatpush1.bf16.msra.mxu1 %v5674_v18  ;;  %5931 = vmatpush1.bf16.msra.mxu0 %v5930_v19  ;;  %v1497_v18 = vld [vmem:[#allocation11 + $0x548] sm:$0xff] }
 0x2c2   :  { %v641_v52 = vadd.f32 %v640_v39, %v7554_v44  ;;  %v642_v53 = vpop.f32.mrb[7].mxu1  ;;  %v7581_v51 = vpop.f32.mrb[23].mxu0  ;;  %5677 = vmatprep.subr.bf16.mxu1 %v5676_v27  ;;  %5933 = vmatprep.subr.bf16.mxu0 %v5932_v29  ;;  %v5686_v29 = vpack.c.bf16 %v1492_v10, %v1488_v9  ;;  %v5944_v39 = vpack.c.bf16 %v1503_v24, %v1499_v22  ;;  %v1506_v9 = vld [vmem:[#allocation11 + $0x590] sm:$0xff]  ;;  %v1512_v22 = vld [vmem:[#allocation11 + $0x5c0] sm:$0xff] }
 0x2c3   :  { %v643_v23 = vadd.f32 %v642_v53, %v7558_v0  ;;  %1917 = vmatprep.mubr.f32.mxu1 %v1217_v36  ;;  %2561 = vmatprep.mubr.f32.mxu0 %v1217_v36  ;;  %v5688_v36 = vpack.c.bf16 %v1501_v20, %v1497_v18  ;;  %v1511_v53 = vld [vmem:[#allocation11 + $0x5b8] sm:$0xff]  ;;  %v1510_v10 = vld [vmem:[#allocation11 + $0x5b0] sm:$0xff]  ;;  %v1516_v24 = vld [vmem:[#allocation11 + $0x5e0] sm:$0xff] }
 0x2c4   :  { %1918 = vmatmul.mubr.f32.gmra.mrb[68].mxu1 %v1216_v49  ;;  %2562 = vmatmul.mubr.f32.gmra.mrb[84].mxu0 %v1216_v49  ;;  %v1224_v11 = vmax.f32 %v641_v52, 0.0  ;;  %v1509_v49 = vld [vmem:[#allocation11 + $0x5a8] sm:$0xff]  ;;  %v1507_v52 = vld [vmem:[#allocation11 + $0x598] sm:$0xff]  ;;  %v5950_v20 = vpack.c.bf16 %v1510_v10, %v1506_v9 }
 0x2c5   :  { %v1225_v2 = vmax.f32 %v643_v23, 0.0  ;;  %v646_v3 = vpop.f32.mrb[8].mxu1  ;;  %v7584_v6 = vpop.f32.mrb[24].mxu0  ;;  %5679 = vmatpush1.bf16.msra.mxu1 %v5678_v16  ;;  %5935 = vmatpush1.bf16.msra.mxu0 %v5934_v45  ;;  %v1498_v16 = vld [vmem:[#allocation11 + $0x550] sm:$0xff]  ;;  %v1504_v23 = vld [vmem:[#allocation11 + $0x580] sm:$0xff]  ;;  %v1533_v10 = vld [vmem:[#allocation11 + $0x668] sm:$0xff] }
 0x2c6   :  { %v647_v42 = vadd.f32 %v646_v3, %v7554_v44  ;;  %v648_v12 = vpop.f32.mrb[9].mxu1  ;;  %v7587_v13 = vpop.f32.mrb[25].mxu0  ;;  %5681 = vmatprep.subr.bf16.mxu1 %v5680_v55  ;;  %5937 = vmatprep.subr.bf16.mxu0 %v5936_v57  ;;  %v1502_v45 = vld [vmem:[#allocation11 + $0x570] sm:$0xff] }
 0x2c7   :  { %v649_v19 = vadd.f32 %v648_v12, %v7558_v0  ;;  %1923 = vmatprep.mubr.f32.mxu1 %v1225_v2  ;;  %2567 = vmatprep.mubr.f32.mxu0 %v1225_v2  ;;  %v5946_v59 = vpack.c.bf16 %v1502_v45, %v1498_v16  ;;  %v1517_v12 = vld [vmem:[#allocation11 + $0x5e8] sm:$0xff]  ;;  %v1523_v16 = vld [vmem:[#allocation11 + $0x618] sm:$0xff] }
 0x2c8   :  { %1924 = vmatmul.mubr.f32.gmra.mrb[70].mxu1 %v1224_v11  ;;  %2568 = vmatmul.mubr.f32.gmra.mrb[86].mxu0 %v1224_v11  ;;  %v1232_v31 = vmax.f32 %v647_v42, 0.0  ;;  %v1513_v11 = vld [vmem:[#allocation11 + $0x5c8] sm:$0xff]  ;;  %v1527_v45 = vld [vmem:[#allocation11 + $0x638] sm:$0xff] }
 0x2c9   :  { %v1233_v25 = vmax.f32 %v649_v19, 0.0  ;;  %v652_v37 = vpop.f32.mrb[10].mxu1  ;;  %v7590_v27 = vpop.f32.mrb[26].mxu0  ;;  %5683 = vmatpush1.bf16.msra.mxu1 %v5682_v5  ;;  %5939 = vmatpush1.bf16.msra.mxu0 %v5938_v7  ;;  %v5692_v5 = vpack.c.bf16 %v1509_v49, %v1505_v46  ;;  %v5948_v7 = vpack.c.bf16 %v1511_v53, %v1507_v52  ;;  %v5694_v19 = vpack.c.bf16 %v1508_v61, %v1504_v23 }
 0x2ca   :  { %v653_v33 = vadd.f32 %v652_v37, %v7554_v44  ;;  %v654_v34 = vpop.f32.mrb[11].mxu1  ;;  %v7593_v35 = vpop.f32.mrb[27].mxu0  ;;  %5685 = vmatprep.subr.bf16.mxu1 %v5684_v14  ;;  %5941 = vmatprep.subr.bf16.mxu0 %v5940_v15  ;;  %v1515_v14 = vld [vmem:[#allocation11 + $0x5d8] sm:$0xff]  ;;  %v5696_v48 = vpack.c.bf16 %v1517_v12, %v1513_v11  ;;  %v5698_v52 = vpack.c.bf16 %v1516_v24, %v1512_v22 }
 0x2cb   :  { %v655_v47 = vadd.f32 %v654_v34, %v7558_v0  ;;  %1929 = vmatprep.mubr.f32.mxu1 %v1233_v25  ;;  %2573 = vmatprep.mubr.f32.mxu0 %v1233_v25  ;;  %v1519_v15 = vld [vmem:[#allocation11 + $0x5f8] sm:$0xff]  ;;  %v1521_v34 = vld [vmem:[#allocation11 + $0x608] sm:$0xff] }
 0x2cc   :  { %1930 = vmatmul.mubr.f32.gmra.mrb[72].mxu1 %v1232_v31  ;;  %2574 = vmatmul.mubr.f32.gmra.mrb[88].mxu0 %v1232_v31  ;;  %v1240_v62 = vmax.f32 %v653_v33, 0.0  ;;  %v5952_v21 = vpack.c.bf16 %v1519_v15, %v1515_v14  ;;  %v1514_v31 = vld [vmem:[#allocation11 + $0x5d0] sm:$0xff]  ;;  %v1531_v11 = vld [vmem:[#allocation11 + $0x658] sm:$0xff] }
 0x2cd   :  { %v1241_v55 = vmax.f32 %v655_v47, 0.0  ;;  %v658_v57 = vpop.f32.mrb[12].mxu1  ;;  %v7596_v38 = vpop.f32.mrb[28].mxu0  ;;  %5687 = vmatpush1.bf16.msra.mxu1 %v5686_v29  ;;  %5943 = vmatpush1.bf16.msra.mxu0 %v5942_v30  ;;  %v1518_v33 = vld [vmem:[#allocation11 + $0x5f0] sm:$0xff] }
 0x2ce   :  { %v659_v63 = vadd.f32 %v658_v57, %v7554_v44  ;;  %v660_v2 = vpop.f32.mrb[13].mxu1  ;;  %v7599_v3 = vpop.f32.mrb[29].mxu0  ;;  %5689 = vmatprep.subr.bf16.mxu1 %v5688_v36  ;;  %5945 = vmatprep.subr.bf16.mxu0 %v5944_v39  ;;  %v1525_v39 = vld [vmem:[#allocation11 + $0x628] sm:$0xff]  ;;  %v5954_v53 = vpack.c.bf16 %v1518_v33, %v1514_v31  ;;  %v1524_v57 = vld [vmem:[#allocation11 + $0x620] sm:$0xff]  ;;  %v1534_v31 = vld [vmem:[#allocation11 + $0x670] sm:$0xff] }
 0x2cf   :  { %v661_v42 = vadd.f32 %v660_v2, %v7558_v0  ;;  %1935 = vmatprep.mubr.f32.mxu1 %v1241_v55  ;;  %2579 = vmatprep.mubr.f32.mxu0 %v1241_v55  ;;  %v1520_v55 = vld [vmem:[#allocation11 + $0x600] sm:$0xff]  ;;  %v1522_v2 = vld [vmem:[#allocation11 + $0x610] sm:$0xff]  ;;  %v1537_v33 = vld [vmem:[#allocation11 + $0x688] sm:$0xff] }
 0x2d0   :  { %1936 = vmatmul.mubr.f32.gmra.mrb[74].mxu1 %v1240_v62  ;;  %2580 = vmatmul.mubr.f32.gmra.mrb[90].mxu0 %v1240_v62  ;;  %v1248_v25 = vmax.f32 %v659_v63, 0.0  ;;  %v5700_v62 = vpack.c.bf16 %v1525_v39, %v1521_v34  ;;  %v5956_v63 = vpack.c.bf16 %v1527_v45, %v1523_v16  ;;  %v1539_v39 = vld [vmem:[#allocation11 + $0x698] sm:$0xff] }
 0x2d1   :  { %v1249_v17 = vmax.f32 %v661_v42, 0.0  ;;  %v664_v1 = vpop.f32.mrb[14].mxu1  ;;  %v7602_v18 = vpop.f32.mrb[30].mxu0  ;;  %5691 = vmatpush1.bf16.msra.mxu1 %v5690_v58  ;;  %5947 = vmatpush1.bf16.msra.mxu0 %v5946_v59  ;;  %v1535_v42 = vld [vmem:[#allocation11 + $0x678] sm:$0xff] }
 0x2d2   :  { %v665_v37 = vadd.f32 %v664_v1, %v7554_v44  ;;  %v666_v29 = vpop.f32.mrb[15].mxu1  ;;  %v7605_v30 = vpop.f32.mrb[31].mxu0  ;;  %5693 = vmatprep.subr.bf16.mxu1 %v5692_v5  ;;  %5949 = vmatprep.subr.bf16.mxu0 %v5948_v7  ;;  %v1526_v5 = vld [vmem:[#allocation11 + $0x630] sm:$0xff]  ;;  %v1529_v7 = vld [vmem:[#allocation11 + $0x648] sm:$0xff]  ;;  %v1543_v16 = vld [vmem:[#allocation11 + $0x6b8] sm:$0xff] }
 0x2d3   :  { %v667_v36 = vadd.f32 %v666_v29, %v7558_v0  ;;  %1941 = vmatprep.mubr.f32.mxu1 %v1249_v17  ;;  %2585 = vmatprep.mubr.f32.mxu0 %v1249_v17  ;;  %v5702_v17 = vpack.c.bf16 %v1524_v57, %v1520_v55  ;;  %v5958_v1 = vpack.c.bf16 %v1526_v5, %v1522_v2  ;;  %v1536_v55 = vld [vmem:[#allocation11 + $0x680] sm:$0xff]  ;;  %v1538_v5 = vld [vmem:[#allocation11 + $0x690] sm:$0xff] }
 0x2d4   :  { %1942 = vmatmul.mubr.f32.gmra.mrb[76].mxu1 %v1248_v25  ;;  %2586 = vmatmul.mubr.f32.gmra.mrb[92].mxu0 %v1248_v25  ;;  %v1256_v58 = vmax.f32 %v665_v37, 0.0  ;;  %v5704_v29 = vpack.c.bf16 %v1533_v10, %v1529_v7  ;;  %v1540_v57 = vld [vmem:[#allocation11 + $0x6a0] sm:$0xff]  ;;  %v5964_v2 = vpack.c.bf16 %v1543_v16, %v1539_v39  ;;  %v1542_v7 = vld [vmem:[#allocation11 + $0x6b0] sm:$0xff]  ;;  %v1553_v39 = vld [vmem:[#allocation11 + $0x708] sm:$0xff] }
 0x2d5   :  { %v1257_v46 = vmax.f32 %v667_v36, 0.0  ;;  %v670_v47 = vpop.f32.mrb[16].mxu1  ;;  %v7608_v49 = vpop.f32.mrb[32].mxu0  ;;  %5695 = vmatpush1.bf16.msra.mxu1 %v5694_v19  ;;  %5951 = vmatpush1.bf16.msra.mxu0 %v5950_v20  ;;  %v1528_v19 = vld [vmem:[#allocation11 + $0x640] sm:$0xff]  ;;  %v1541_v36 = vld [vmem:[#allocation11 + $0x6a8] sm:$0xff] }
 0x2d6   :  { %v671_v59 = vadd.f32 %v670_v47, %v7554_v44  ;;  %v672_v23 = vpop.f32.mrb[17].mxu1  ;;  %v7611_v61 = vpop.f32.mrb[33].mxu0  ;;  %5697 = vmatprep.subr.bf16.mxu1 %v5696_v48  ;;  %5953 = vmatprep.subr.bf16.mxu0 %v5952_v21  ;;  %v1532_v20 = vld [vmem:[#allocation11 + $0x660] sm:$0xff]  ;;  %v5960_v48 = vpack.c.bf16 %v1535_v42, %v1531_v11  ;;  %v1530_v21 = vld [vmem:[#allocation11 + $0x650] sm:$0xff]  ;;  %v1549_v11 = vld [vmem:[#allocation11 + $0x6e8] sm:$0xff] }
 0x2d7   :  { %v673_v9 = vadd.f32 %v672_v23, %v7558_v0  ;;  %1947 = vmatprep.mubr.f32.mxu1 %v1257_v46  ;;  %2591 = vmatprep.mubr.f32.mxu0 %v1257_v46  ;;  %v1547_v42 = vld [vmem:[#allocation11 + $0x6d8] sm:$0xff] }
 0x2d8   :  { %1948 = vmatmul.mubr.f32.gmra.mrb[78].mxu1 %v1256_v58  ;;  %2592 = vmatmul.mubr.f32.gmra.mrb[94].mxu0 %v1256_v58  ;;  %v1264_v22 = vmax.f32 %v671_v59, 0.0 }
 0x2d9   :  { %v1265_v12 = vmax.f32 %v673_v9, 0.0  ;;  %v676_v14 = vpop.f32.mrb[18].mxu1  ;;  %v7614_v15 = vpop.f32.mrb[34].mxu0  ;;  %5699 = vmatpush1.bf16.msra.mxu1 %v5698_v52  ;;  %5955 = vmatpush1.bf16.msra.mxu0 %v5954_v53  ;;  %v5706_v52 = vpack.c.bf16 %v1532_v20, %v1528_v19  ;;  %v5962_v53 = vpack.c.bf16 %v1534_v31, %v1530_v21  ;;  %v1545_v9 = vld [vmem:[#allocation11 + $0x6c8] sm:$0xff]  ;;  %v5710_v19 = vpack.c.bf16 %v1540_v57, %v1536_v55 }
 0x2da   :  { %v677_v24 = vadd.f32 %v676_v14, %v7554_v44  ;;  %v678_v25 = vpop.f32.mrb[19].mxu1  ;;  %v7617_v37 = vpop.f32.mrb[35].mxu0  ;;  %5701 = vmatprep.subr.bf16.mxu1 %v5700_v62  ;;  %5957 = vmatprep.subr.bf16.mxu0 %v5956_v63  ;;  %v5708_v63 = vpack.c.bf16 %v1541_v36, %v1537_v33  ;;  %v5966_v20 = vpack.c.bf16 %v1542_v7, %v1538_v5  ;;  %v1550_v36 = vld [vmem:[#allocation11 + $0x6f0] sm:$0xff] }
 0x2db   :  { %v679_v34 = vadd.f32 %v678_v25, %v7558_v0  ;;  %1953 = vmatprep.mubr.f32.mxu1 %v1265_v12  ;;  %2597 = vmatprep.mubr.f32.mxu0 %v1265_v12  ;;  %v1551_v12 = vld [vmem:[#allocation11 + $0x6f8] sm:$0xff]  ;;  %v5712_v31 = vpack.c.bf16 %v1549_v11, %v1545_v9 }
 0x2dc   :  { %1954 = vmatmul.mubr.f32.gmra.mrb[80].mxu1 %v1264_v22  ;;  %2598 = vmatmul.mubr.f32.gmra.mrb[96].mxu0 %v1264_v22  ;;  %v1272_v58 = vmax.f32 %v677_v24, 0.0  ;;  %v1544_v22 = vld [vmem:[#allocation11 + $0x6c0] sm:$0xff]  ;;  %v5968_v33 = vpack.c.bf16 %v1551_v12, %v1547_v42  ;;  %v1554_v42 = vld [vmem:[#allocation11 + $0x710] sm:$0xff] }
 0x2dd   :  { %v1273_v45 = vmax.f32 %v679_v34, 0.0  ;;  %v682_v46 = vpop.f32.mrb[20].mxu1  ;;  %v7620_v47 = vpop.f32.mrb[36].mxu0  ;;  %5703 = vmatpush1.bf16.msra.mxu1 %v5702_v17  ;;  %5959 = vmatpush1.bf16.msra.mxu0 %v5958_v1  ;;  %v1548_v24 = vld [vmem:[#allocation11 + $0x6e0] sm:$0xff]  ;;  %v1546_v34 = vld [vmem:[#allocation11 + $0x6d0] sm:$0xff] }
 0x2de   :  { %v683_v59 = vadd.f32 %v682_v46, %v7554_v44  ;;  %v684_v23 = vpop.f32.mrb[21].mxu1  ;;  %v7623_v62 = vpop.f32.mrb[37].mxu0  ;;  %5705 = vmatprep.subr.bf16.mxu1 %v5704_v29  ;;  %5961 = vmatprep.subr.bf16.mxu0 %v5960_v48  ;;  %v1555_v46 = vld [vmem:[#allocation11 + $0x718] sm:$0xff]  ;;  %v1558_v12 = vld [vmem:[#allocation11 + $0x730] sm:$0xff] }
 0x2df   :  { %v685_v10 = vadd.f32 %v684_v23, %v7558_v0  ;;  %1959 = vmatprep.mubr.f32.mxu1 %v1273_v45  ;;  %2603 = vmatprep.mubr.f32.mxu0 %v1273_v45  ;;  %v1557_v45 = vld [vmem:[#allocation11 + $0x728] sm:$0xff]  ;;  %v1552_v23 = vld [vmem:[#allocation11 + $0x700] sm:$0xff] }
 0x2e0   :  { %1960 = vmatmul.mubr.f32.gmra.mrb[82].mxu1 %v1272_v58  ;;  %2604 = vmatmul.mubr.f32.gmra.mrb[98].mxu0 %v1272_v58  ;;  %v1280_v25 = vmax.f32 %v683_v59, 0.0  ;;  %v5714_v58 = vpack.c.bf16 %v1548_v24, %v1544_v22  ;;  %v5970_v59 = vpack.c.bf16 %v1550_v36, %v1546_v34  ;;  %v1567_v22 = vld [vmem:[#allocation11 + $0x778] sm:$0xff]  ;;  %v1564_v34 = vld [vmem:[#allocation11 + $0x760] sm:$0xff] }
 0x2e1   :  { %v1281_v14 = vmax.f32 %v685_v10, 0.0  ;;  %v688_v17 = vpop.f32.mrb[22].mxu1  ;;  %v7626_v1 = vpop.f32.mrb[38].mxu0  ;;  %5707 = vmatpush1.bf16.msra.mxu1 %v5706_v52  ;;  %5963 = vmatpush1.bf16.msra.mxu0 %v5962_v53  ;;  %v1559_v52 = vld [vmem:[#allocation11 + $0x738] sm:$0xff]  ;;  %v5716_v10 = vpack.c.bf16 %v1557_v45, %v1553_v39 }
 0x2e2   :  { %v689_v29 = vadd.f32 %v688_v17, %v7554_v44  ;;  %v690_v48 = vpop.f32.mrb[23].mxu1  ;;  %v7629_v21 = vpop.f32.mrb[39].mxu0  ;;  %5709 = vmatprep.subr.bf16.mxu1 %v5708_v63  ;;  %5965 = vmatprep.subr.bf16.mxu0 %v5964_v2  ;;  %v1556_v63 = vld [vmem:[#allocation11 + $0x720] sm:$0xff]  ;;  %v5972_v11 = vpack.c.bf16 %v1559_v52, %v1555_v46 }
 0x2e3   :  { %v691_v16 = vadd.f32 %v690_v48, %v7558_v0  ;;  %1965 = vmatprep.mubr.f32.mxu1 %v1281_v14  ;;  %2609 = vmatprep.mubr.f32.mxu0 %v1281_v14  ;;  %v1561_v14 = vld [vmem:[#allocation11 + $0x748] sm:$0xff]  ;;  %v5718_v48 = vpack.c.bf16 %v1556_v63, %v1552_v23  ;;  %v1571_v63 = vld [vmem:[#allocation11 + $0x798] sm:$0xff] }
 0x2e4   :  { %1966 = vmatmul.mubr.f32.gmra.mrb[84].mxu1 %v1280_v25  ;;  %2610 = vmatmul.mubr.f32.gmra.mrb[100].mxu0 %v1280_v25  ;;  %v1288_v2 = vmax.f32 %v689_v29, 0.0  ;;  %v1573_v23 = vld [vmem:[#allocation11 + $0x7a8] sm:$0xff] }
 0x2e5   :  { %v1289_v53 = vmax.f32 %v691_v16, 0.0  ;;  %v694_v55 = vpop.f32.mrb[24].mxu1  ;;  %v7632_v57 = vpop.f32.mrb[40].mxu0  ;;  %5711 = vmatpush1.bf16.msra.mxu1 %v5710_v19  ;;  %5967 = vmatpush1.bf16.msra.mxu0 %v5966_v20  ;;  %v1565_v19 = vld [vmem:[#allocation11 + $0x768] sm:$0xff]  ;;  %v1563_v20 = vld [vmem:[#allocation11 + $0x758] sm:$0xff] }
 0x2e6   :  { %v695_v5 = vadd.f32 %v694_v55, %v7554_v44  ;;  %v696_v7 = vpop.f32.mrb[25].mxu1  ;;  %v7635_v9 = vpop.f32.mrb[41].mxu0  ;;  %5713 = vmatprep.subr.bf16.mxu1 %v5712_v31  ;;  %5969 = vmatprep.subr.bf16.mxu0 %v5968_v33  ;;  %v5974_v31 = vpack.c.bf16 %v1558_v12, %v1554_v42  ;;  %v1560_v33 = vld [vmem:[#allocation11 + $0x740] sm:$0xff]  ;;  %v5720_v46 = vpack.c.bf16 %v1565_v19, %v1561_v14  ;;  %v1566_v55 = vld [vmem:[#allocation11 + $0x770] sm:$0xff] }
 0x2e7   :  { %v697_v17 = vadd.f32 %v696_v7, %v7558_v0  ;;  %1971 = vmatprep.mubr.f32.mxu1 %v1289_v53  ;;  %2615 = vmatprep.mubr.f32.mxu0 %v1289_v53  ;;  %v5976_v52 = vpack.c.bf16 %v1567_v22, %v1563_v20  ;;  %v1562_v53 = vld [vmem:[#allocation11 + $0x750] sm:$0xff]  ;;  %v5722_v12 = vpack.c.bf16 %v1564_v34, %v1560_v33  ;;  %v1572_v19 = vld [vmem:[#allocation11 + $0x7a0] sm:$0xff]  ;;  %v1577_v7 = vld [vmem:[#allocation11 + $0x7c8] sm:$0xff] }
 0x2e8   :  { %1972 = vmatmul.mubr.f32.gmra.mrb[86].mxu1 %v1288_v2  ;;  %2616 = vmatmul.mubr.f32.gmra.mrb[102].mxu0 %v1288_v2  ;;  %v1296_v36 = vmax.f32 %v695_v5, 0.0  ;;  %v1569_v2 = vld [vmem:[#allocation11 + $0x788] sm:$0xff]  ;;  %v1575_v5 = vld [vmem:[#allocation11 + $0x7b8] sm:$0xff]  ;;  %v5978_v14 = vpack.c.bf16 %v1566_v55, %v1562_v53 }
 0x2e9   :  { %v1297_v24 = vmax.f32 %v697_v17, 0.0  ;;  %v700_v25 = vpop.f32.mrb[26].mxu1  ;;  %v7638_v29 = vpop.f32.mrb[42].mxu0  ;;  %5715 = vmatpush1.bf16.msra.mxu1 %v5714_v58  ;;  %5971 = vmatpush1.bf16.msra.mxu0 %v5970_v59  ;;  %v8407_v58 = vsub.s32 3, %v7542_v40  ;;  %v1568_v17 = vld [vmem:[#allocation11 + $0x780] sm:$0xff]  ;;  %v1581_v33 = vld [vmem:[#allocation11 + $0x7e8] sm:$0xff] }
 0x2ea   :  { %v701_v39 = vadd.f32 %v700_v25, %v7554_v44  ;;  %v702_v16 = vpop.f32.mrb[27].mxu1  ;;  %v7641_v45 = vpop.f32.mrb[43].mxu0  ;;  %5717 = vmatprep.subr.bf16.mxu1 %v5716_v10  ;;  %5973 = vmatprep.subr.bf16.mxu0 %v5972_v11  ;;  %v1579_v34 = vld [vmem:[#allocation11 + $0x7d8] sm:$0xff] }
 0x2eb   :  { %v703_v59 = vadd.f32 %v702_v16, %v7558_v0  ;;  %1977 = vmatprep.mubr.f32.mxu1 %v1297_v24  ;;  %2621 = vmatprep.mubr.f32.mxu0 %v1297_v24  ;;  %v5980_v16 = vpack.c.bf16 %v1575_v5, %v1571_v63 }
 0x2ec   :  { %1978 = vmatmul.mubr.f32.gmra.mrb[88].mxu1 %v1296_v36  ;;  %2622 = vmatmul.mubr.f32.gmra.mrb[104].mxu0 %v1296_v36  ;;  %v1304_v20 = vmax.f32 %v701_v39, 0.0  ;;  %v5724_v36 = vpack.c.bf16 %v1573_v23, %v1569_v2  ;;  %v1583_v39 = vld [vmem:[#allocation11 + $0x7f8] sm:$0xff]  ;;  %v5726_v23 = vpack.c.bf16 %v1572_v19, %v1568_v17  ;;  %v1585_v17 = vld [vmem:[#allocation11 + $0x808] sm:$0xff] }
 0x2ed   :  { %v1305_v10 = vmax.f32 %v703_v59, 0.0  ;;  %v706_v11 = vpop.f32.mrb[28].mxu1  ;;  %v7646_v42 = vpop.f32.mrb[44].mxu0  ;;  %5719 = vmatpush1.bf16.msra.mxu1 %v5718_v48  ;;  %5975 = vmatpush1.bf16.msra.mxu0 %v5974_v31  ;;  %v1570_v59 = vld [vmem:[#allocation11 + $0x790] sm:$0xff]  ;;  %v7654_v48 = vrot.slane %v7547_v41, %v8407_v58  ;;  %v5984_v58 = vpack.c.bf16 %v1583_v39, %v1579_v34  ;;  %v1587_v19 = vld [vmem:[#allocation11 + $0x818] sm:$0xff] }
 0x2ee   :  { %v707_v22 = vadd.f32 %v706_v11, %v7554_v44  ;;  %v708_v24 = vpop.f32.mrb[29].mxu1  ;;  %v7649_v25 = vpop.f32.mrb[45].mxu0  ;;  %5721 = vmatprep.subr.bf16.mxu1 %v5720_v46  ;;  %5977 = vmatprep.subr.bf16.mxu0 %v5976_v52  ;;  %v8414_v46 = vsub.s32 2, %v7542_v40  ;;  %v5982_v63 = vpack.c.bf16 %v1574_v8, %v1570_v59  ;;  %v1578_v8 = vld [vmem:[#allocation11 + $0x7d0] sm:$0xff] }
 0x2ef   :  { %v709_v31 = vadd.f32 %v708_v24, %v7558_v0  ;;  %1983 = vmatprep.mubr.f32.mxu1 %v1305_v10  ;;  %2627 = vmatprep.mubr.f32.mxu0 %v1305_v10 }
 0x2f0   :  { %1984 = vmatmul.mubr.f32.gmra.mrb[90].mxu1 %v1304_v20  ;;  %2628 = vmatmul.mubr.f32.gmra.mrb[106].mxu0 %v1304_v20  ;;  %v7660_v52 = vrot.slane %v7547_v41, %v8414_v46  ;;  %v1312_v5 = vmax.f32 %v707_v22, 0.0  ;;  %v5728_v20 = vpack.c.bf16 %v1581_v33, %v1577_v7  ;;  %v1576_v41 = vld [vmem:[#allocation11 + $0x7c0] sm:$0xff]  ;;  %v1591_v22 = vld [vmem:[#allocation11 + $0x838] sm:$0xff] }
 0x2f1   :  { %v1313_v53 = vmax.f32 %v709_v31, 0.0  ;;  %v712_v55 = vpop.f32.mrb[30].mxu1  ;;  %v7662_v2 = vpop.f32.mrb[46].mxu0  ;;  %5723 = vmatpush1.bf16.msra.mxu1 %v5722_v12  ;;  %5979 = vmatpush1.bf16.msra.mxu0 %v5978_v14  ;;  %v1580_v46 = vld [vmem:[#allocation11 + $0x7e0] sm:$0xff]  ;;  %v786_v31 = vadd.f32 %v7563_v50, %v7654_v48  ;;  %v1582_v14 = vld [vmem:[#allocation11 + $0x7f0] sm:$0xff] }
 0x2f2   :  { %v713_v10 = vadd.f32 %v712_v55, %v7554_v44  ;;  %v714_v11 = vpop.f32.mrb[31].mxu1  ;;  %v7665_v24 = vpop.f32.mrb[47].mxu0  ;;  %5725 = vmatprep.subr.bf16.mxu1 %v5724_v36  ;;  %5981 = vmatprep.subr.bf16.mxu0 %v5980_v16  ;;  %v1589_v44 = vld [vmem:[#allocation11 + $0x828] sm:$0xff]  ;;  %v5730_v50 = vpack.c.bf16 %v1580_v46, %v1576_v41  ;;  %v5986_v39 = vpack.c.bf16 %v1582_v14, %v1578_v8  ;;  %v1586_v41 = vld [vmem:[#allocation11 + $0x810] sm:$0xff] }
 0x2f3   :  { %v715_v12 = vadd.f32 %v714_v11, %v7558_v0  ;;  %1989 = vmatprep.mubr.f32.mxu1 %v1313_v53  ;;  %2633 = vmatprep.mubr.f32.mxu0 %v1313_v53  ;;  %v784_v0 = vadd.f32 %v7560_v28, %v7660_v52  ;;  %v1203_v53 = vmax.f32 %v786_v31, 0.0  ;;  %v792_v55 = vadd.f32 %v7569_v32, %v7654_v48  ;;  %v1588_v11 = vld [vmem:[#allocation11 + $0x820] sm:$0xff]  ;;  %v1590_v28 = vld [vmem:[#allocation11 + $0x830] sm:$0xff]  ;;  %v1597_v46 = vld [vmem:[#allocation11 + $0x868] sm:$0xff] }
 0x2f4   :  { %1990 = vmatmul.mubr.f32.gmra.mrb[92].mxu1 %v1312_v5  ;;  %2634 = vmatmul.mubr.f32.gmra.mrb[108].mxu0 %v1312_v5  ;;  %v1320_v59 = vmax.f32 %v713_v10, 0.0  ;;  %v1584_v5 = vld [vmem:[#allocation11 + $0x800] sm:$0xff]  ;;  %v1593_v10 = vld [vmem:[#allocation11 + $0x848] sm:$0xff]  ;;  %v1599_v32 = vld [vmem:[#allocation11 + $0x878] sm:$0xff]  ;;  %v790_v8 = vadd.f32 %v7566_v60, %v7660_v52 }
 0x2f5   :  { %v1321_v36 = vmax.f32 %v715_v12, 0.0  ;;  %v7670_v7 = vpop.f32.mrb[32].mxu1  ;;  %v7672_v16 = vpop.f32.mrb[48].mxu0  ;;  %5727 = vmatpush1.bf16.msra.mxu1 %v5726_v23  ;;  %5983 = vmatpush1.bf16.msra.mxu0 %v5982_v63  ;;  %v5732_v23 = vpack.c.bf16 %v1589_v44, %v1585_v17  ;;  %v5988_v63 = vpack.c.bf16 %v1591_v22, %v1587_v19  ;;  %v1202_v31 = vmax.f32 %v784_v0, 0.0  ;;  %v1596_v0 = vld [vmem:[#allocation11 + $0x860] sm:$0xff] }
 0x2f6   :  { %8415 = vst [vmem:[#allocation34_spill] sm:$0xff] %v7672_v16  ;;  %v7676_v33 = vpop.f32.mrb[33].mxu1  ;;  %v7678_v34 = vpop.f32.mrb[49].mxu0  ;;  %5729 = vmatprep.subr.bf16.mxu1 %v5728_v20  ;;  %5985 = vmatprep.subr.bf16.mxu0 %v5984_v58  ;;  %v1595_v20 = vld [vmem:[#allocation11 + $0x858] sm:$0xff]  ;;  %v5734_v44 = vpack.c.bf16 %v1588_v11, %v1584_v5  ;;  %v1211_v19 = vmax.f32 %v792_v55, 0.0  ;;  %v798_v22 = vadd.f32 %v7575_v26, %v7654_v48  ;;  %v1701_v16 = vld [vmem:[#allocation11 + $0xba8] sm:$0xff] }
 0x2f7   :  { %8416 = vst [vmem:[#allocation35_spill] sm:$0xff] %v7678_v34  ;;  %1995 = vmatprep.mubr.f32.mxu1 %v1321_v36  ;;  %2639 = vmatprep.mubr.f32.mxu0 %v1321_v36  ;;  %v5990_v36 = vpack.c.bf16 %v1590_v28, %v1586_v41  ;;  %v5992_v60 = vpack.c.bf16 %v1599_v32, %v1595_v20  ;;  %v1603_v55 = vld [vmem:[#allocation11 + $0x898] sm:$0xff]  ;;  %v1698_v34 = vld [vmem:[#allocation11 + $0xb90] sm:$0xff] }
 0x2f8   :  { %1996 = vmatmul.mubr.f32.gmra.mrb[94].mxu1 %v1320_v59  ;;  %2640 = vmatmul.mubr.f32.gmra.mrb[110].mxu0 %v1320_v59  ;;  %v1592_v59 = vld [vmem:[#allocation11 + $0x840] sm:$0xff]  ;;  %v1607_v26 = vld [vmem:[#allocation11 + $0x8b8] sm:$0xff] }
 0x2f9   :  { %v7682_v12 = vpop.f32.mrb[34].mxu1  ;;  %v7684_v58 = vpop.f32.mrb[50].mxu0  ;;  %5731 = vmatpush1.bf16.msra.mxu1 %v5730_v50  ;;  %2066 = vmatprep.mubr.f32.mxu1 %v1203_v53  ;;  %v5736_v50 = vpack.c.bf16 %v1597_v46, %v1593_v10  ;;  %v5738_v28 = vpack.c.bf16 %v1596_v0, %v1592_v59  ;;  %v1219_v10 = vmax.f32 %v798_v22, 0.0  ;;  %v804_v46 = vadd.f32 %v7581_v51, %v7654_v48  ;;  %v1611_v51 = vld [vmem:[#allocation11 + $0x8d8] sm:$0xff] }
 0x2fa   :  { %8417 = vst [vmem:[#allocation36_spill] sm:$0xff] %v7684_v58  ;;  %5987 = vmatpush1.bf16.msra.mxu0 %v5986_v39  ;;  %2710 = vmatprep.mubr.f32.mxu0 %v1203_v53  ;;  %v7688_v14 = vpop.f32.mrb[35].mxu1  ;;  %v7690_v17 = vpop.f32.mrb[51].mxu0  ;;  %v1598_v39 = vld [vmem:[#allocation11 + $0x870] sm:$0xff]  ;;  %v1601_v53 = vld [vmem:[#allocation11 + $0x888] sm:$0xff] }
 0x2fb   :  { %8418 = vst [vmem:[#allocation37_spill] sm:$0xff] %v7690_v17  ;;  %5733 = vmatprep.subr.bf16.mxu1 %v5732_v23  ;;  %5989 = vmatprep.subr.bf16.mxu0 %v5988_v63  ;;  %v1210_v23 = vmax.f32 %v790_v8, 0.0  ;;  %v796_v63 = vadd.f32 %v7572_v54, %v7660_v52  ;;  %v5994_v20 = vpack.c.bf16 %v1598_v39, %v1594_v43  ;;  %v1604_v8 = vld [vmem:[#allocation11 + $0x8a0] sm:$0xff]  ;;  %v1613_v17 = vld [vmem:[#allocation11 + $0x8e8] sm:$0xff] }
 0x2fc   :  { %2067 = vmatmul.mubr.f32.vlgmr.msra.gmra.mrb[64].mxu1 %v1202_v31  ;;  %v5740_v32 = vpack.c.bf16 %v1605_v56, %v1601_v53  ;;  %v5996_v54 = vpack.c.bf16 %v1607_v26, %v1603_v55  ;;  %v802_v56 = vadd.f32 %v7578_v4, %v7660_v52  ;;  %v810_v39 = vadd.f32 %v7587_v13, %v7654_v48  ;;  %v1608_v26 = vld [vmem:[#allocation11 + $0x8c0] sm:$0xff]  ;;  %v1619_v13 = vld [vmem:[#allocation11 + $0x918] sm:$0xff] }
 0x2fd   :  { %2711 = vmatmul.mubr.f32.vlgmr.msra.gmra.mrb[80].mxu0 %v1202_v31  ;;  %v7694_v58 = vpop.f32.mrb[36].mxu1  ;;  %v7696_v5 = vpop.f32.mrb[52].mxu0  ;;  %2072 = vmatprep.mubr.f32.mxu1 %v1211_v19  ;;  %v1600_v31 = vld [vmem:[#allocation11 + $0x880] sm:$0xff] }
 0x2fe   :  { %8419 = vst [vmem:[#allocation38_spill] sm:$0xff] %v7696_v5  ;;  %5735 = vmatpush1.bf16.msra.mxu1 %v5734_v44  ;;  %2716 = vmatprep.mubr.f32.mxu0 %v1211_v19  ;;  %v7700_v11 = vpop.f32.mrb[37].mxu1  ;;  %v7702_v41 = vpop.f32.mrb[53].mxu0  ;;  %v1602_v5 = vld [vmem:[#allocation11 + $0x890] sm:$0xff]  ;;  %v1609_v19 = vld [vmem:[#allocation11 + $0x8c8] sm:$0xff]  ;;  %v5742_v0 = vpack.c.bf16 %v1604_v8, %v1600_v31 }
 0x2ff   :  { %8420 = vst [vmem:[#allocation39_spill] sm:$0xff] %v7702_v41  ;;  %5991 = vmatpush1.bf16.msra.mxu0 %v5990_v36  ;;  %5737 = vmatprep.subr.bf16.mxu1 %v5736_v50  ;;  %v1606_v44 = vld [vmem:[#allocation11 + $0x8b0] sm:$0xff]  ;;  %v1615_v36 = vld [vmem:[#allocation11 + $0x8f8] sm:$0xff]  ;;  %v1218_v50 = vmax.f32 %v796_v63, 0.0  ;;  %v5744_v55 = vpack.c.bf16 %v1613_v17, %v1609_v19  ;;  %v808_v17 = vadd.f32 %v7584_v6, %v7660_v52 }
 0x300   :  { %2073 = vmatmul.mubr.f32.gmra.mrb[66].mxu1 %v1210_v23  ;;  %5993 = vmatprep.subr.bf16.mxu0 %v5992_v60  ;;  %v1227_v60 = vmax.f32 %v804_v46, 0.0  ;;  %v5998_v53 = vpack.c.bf16 %v1606_v44, %v1602_v5  ;;  %v1610_v63 = vld [vmem:[#allocation11 + $0x8d0] sm:$0xff]  ;;  %v6000_v4 = vpack.c.bf16 %v1615_v36, %v1611_v51  ;;  %v816_v44 = vadd.f32 %v7593_v35, %v7654_v48  ;;  %v1616_v36 = vld [vmem:[#allocation11 + $0x900] sm:$0xff]  ;;  %v1627_v35 = vld [vmem:[#allocation11 + $0x958] sm:$0xff] }
 0x301   :  { %2717 = vmatmul.mubr.f32.gmra.mrb[82].mxu0 %v1210_v23  ;;  %v7706_v41 = vpop.f32.mrb[38].mxu1  ;;  %v7708_v22 = vpop.f32.mrb[54].mxu0  ;;  %2078 = vmatprep.mubr.f32.mxu1 %v1219_v10  ;;  %v1612_v23 = vld [vmem:[#allocation11 + $0x8e0] sm:$0xff] }
 0x302   :  { %8421 = vst [vmem:[#allocation40_spill] sm:$0xff] %v7708_v22  ;;  %5739 = vmatpush1.bf16.msra.mxu1 %v5738_v28  ;;  %2722 = vmatprep.mubr.f32.mxu0 %v1219_v10  ;;  %v7712_v43 = vpop.f32.mrb[39].mxu1  ;;  %v7714_v59 = vpop.f32.mrb[55].mxu0  ;;  %v1614_v28 = vld [vmem:[#allocation11 + $0x8f0] sm:$0xff]  ;;  %v1617_v10 = vld [vmem:[#allocation11 + $0x908] sm:$0xff]  ;;  %v5746_v8 = vpack.c.bf16 %v1612_v23, %v1608_v26 }
 0x303   :  { %8422 = vst [vmem:[#allocation41_spill] sm:$0xff] %v7714_v59  ;;  %5995 = vmatpush1.bf16.msra.mxu0 %v5994_v20  ;;  %5741 = vmatprep.subr.bf16.mxu1 %v5740_v32  ;;  %v1621_v22 = vld [vmem:[#allocation11 + $0x928] sm:$0xff]  ;;  %v1623_v20 = vld [vmem:[#allocation11 + $0x938] sm:$0xff]  ;;  %v1226_v32 = vmax.f32 %v802_v56, 0.0  ;;  %v6002_v19 = vpack.c.bf16 %v1614_v28, %v1610_v63  ;;  %v1618_v56 = vld [vmem:[#allocation11 + $0x910] sm:$0xff]  ;;  %v822_v28 = vadd.f32 %v7599_v3, %v7654_v48 }
 0x304   :  { %2079 = vmatmul.mubr.f32.gmra.mrb[68].mxu1 %v1218_v50  ;;  %5997 = vmatprep.subr.bf16.mxu0 %v5996_v54  ;;  %v1235_v54 = vmax.f32 %v810_v39, 0.0  ;;  %v5748_v51 = vpack.c.bf16 %v1621_v22, %v1617_v10  ;;  %v6004_v6 = vpack.c.bf16 %v1623_v20, %v1619_v13  ;;  %v814_v22 = vadd.f32 %v7590_v27, %v7660_v52  ;;  %v1624_v20 = vld [vmem:[#allocation11 + $0x940] sm:$0xff]  ;;  %v1635_v3 = vld [vmem:[#allocation11 + $0x998] sm:$0xff] }
 0x305   :  { %2723 = vmatmul.mubr.f32.gmra.mrb[84].mxu0 %v1218_v50  ;;  %v7718_v59 = vpop.f32.mrb[40].mxu1  ;;  %v7720_v46 = vpop.f32.mrb[56].mxu0  ;;  %2084 = vmatprep.mubr.f32.mxu1 %v1227_v60  ;;  %v1620_v50 = vld [vmem:[#allocation11 + $0x920] sm:$0xff] }
 0x306   :  { %8423 = vst [vmem:[#allocation42_spill] sm:$0xff] %v7720_v46  ;;  %5743 = vmatpush1.bf16.msra.mxu1 %v5742_v0  ;;  %2728 = vmatprep.mubr.f32.mxu0 %v1227_v60  ;;  %v7724_v5 = vpop.f32.mrb[41].mxu1  ;;  %v7726_v31 = vpop.f32.mrb[57].mxu0  ;;  %v1622_v0 = vld [vmem:[#allocation11 + $0x930] sm:$0xff]  ;;  %v1625_v60 = vld [vmem:[#allocation11 + $0x948] sm:$0xff]  ;;  %v5750_v63 = vpack.c.bf16 %v1620_v50, %v1616_v36 }
 0x307   :  { %8424 = vst [vmem:[#allocation43_spill] sm:$0xff] %v7726_v31  ;;  %5999 = vmatpush1.bf16.msra.mxu0 %v5998_v53  ;;  %5745 = vmatprep.subr.bf16.mxu1 %v5744_v55  ;;  %v1629_v46 = vld [vmem:[#allocation11 + $0x968] sm:$0xff]  ;;  %v1631_v53 = vld [vmem:[#allocation11 + $0x978] sm:$0xff]  ;;  %v1234_v55 = vmax.f32 %v808_v17, 0.0  ;;  %v6006_v10 = vpack.c.bf16 %v1622_v0, %v1618_v56  ;;  %v1626_v17 = vld [vmem:[#allocation11 + $0x950] sm:$0xff]  ;;  %v828_v0 = vadd.f32 %v7605_v30, %v7654_v48 }
 0x308   :  { %2085 = vmatmul.mubr.f32.gmra.mrb[70].mxu1 %v1226_v32  ;;  %6001 = vmatprep.subr.bf16.mxu0 %v6000_v4  ;;  %v1243_v4 = vmax.f32 %v816_v44, 0.0  ;;  %v5752_v13 = vpack.c.bf16 %v1629_v46, %v1625_v60  ;;  %v6008_v27 = vpack.c.bf16 %v1631_v53, %v1627_v35  ;;  %v820_v46 = vadd.f32 %v7596_v38, %v7660_v52  ;;  %v1632_v53 = vld [vmem:[#allocation11 + $0x980] sm:$0xff]  ;;  %v1643_v30 = vld [vmem:[#allocation11 + $0x9d8] sm:$0xff] }
 0x309   :  { %2729 = vmatmul.mubr.f32.gmra.mrb[86].mxu0 %v1226_v32  ;;  %v7730_v31 = vpop.f32.mrb[42].mxu1  ;;  %v7732_v39 = vpop.f32.mrb[58].mxu0  ;;  %2090 = vmatprep.mubr.f32.mxu1 %v1235_v54  ;;  %v1628_v32 = vld [vmem:[#allocation11 + $0x960] sm:$0xff] }
 0x30a   :  { %8425 = vst [vmem:[#allocation44_spill] sm:$0xff] %v7732_v39  ;;  %5747 = vmatpush1.bf16.msra.mxu1 %v5746_v8  ;;  %2734 = vmatprep.mubr.f32.mxu0 %v1235_v54  ;;  %v7736_v26 = vpop.f32.mrb[43].mxu1  ;;  %v7738_v23 = vpop.f32.mrb[59].mxu0  ;;  %v1630_v8 = vld [vmem:[#allocation11 + $0x970] sm:$0xff]  ;;  %v1633_v54 = vld [vmem:[#allocation11 + $0x988] sm:$0xff]  ;;  %v5754_v56 = vpack.c.bf16 %v1628_v32, %v1624_v20 }
 0x30b   :  { %8426 = vst [vmem:[#allocation45_spill] sm:$0xff] %v7738_v23  ;;  %6003 = vmatpush1.bf16.msra.mxu0 %v6002_v19  ;;  %5749 = vmatprep.subr.bf16.mxu1 %v5748_v51  ;;  %v1637_v39 = vld [vmem:[#allocation11 + $0x9a8] sm:$0xff]  ;;  %v1639_v19 = vld [vmem:[#allocation11 + $0x9b8] sm:$0xff]  ;;  %v1242_v51 = vmax.f32 %v814_v22, 0.0  ;;  %v6010_v60 = vpack.c.bf16 %v1630_v8, %v1626_v17  ;;  %v1634_v22 = vld [vmem:[#allocation11 + $0x990] sm:$0xff]  ;;  %v834_v8 = vadd.f32 %v7611_v61, %v7654_v48 }
 0x30c   :  { %2091 = vmatmul.mubr.f32.gmra.mrb[72].mxu1 %v1234_v55  ;;  %6005 = vmatprep.subr.bf16.mxu0 %v6004_v6  ;;  %v1251_v6 = vmax.f32 %v822_v28, 0.0  ;;  %v5756_v35 = vpack.c.bf16 %v1637_v39, %v1633_v54  ;;  %v6012_v38 = vpack.c.bf16 %v1639_v19, %v1635_v3  ;;  %v826_v39 = vadd.f32 %v7602_v18, %v7660_v52  ;;  %v1640_v19 = vld [vmem:[#allocation11 + $0x9c0] sm:$0xff]  ;;  %v1651_v61 = vld [vmem:[#allocation11 + $0xa18] sm:$0xff] }
 0x30d   :  { %2735 = vmatmul.mubr.f32.gmra.mrb[88].mxu0 %v1234_v55  ;;  %v7742_v23 = vpop.f32.mrb[44].mxu1  ;;  %v7744_v44 = vpop.f32.mrb[60].mxu0  ;;  %2096 = vmatprep.mubr.f32.mxu1 %v1243_v4  ;;  %v1636_v55 = vld [vmem:[#allocation11 + $0x9a0] sm:$0xff] }
 0x30e   :  { %8427 = vst [vmem:[#allocation46_spill] sm:$0xff] %v7744_v44  ;;  %5751 = vmatpush1.bf16.msra.mxu1 %v5750_v63  ;;  %2740 = vmatprep.mubr.f32.mxu0 %v1243_v4  ;;  %v7748_v36 = vpop.f32.mrb[45].mxu1  ;;  %v7750_v50 = vpop.f32.mrb[61].mxu0  ;;  %v1638_v63 = vld [vmem:[#allocation11 + $0x9b0] sm:$0xff]  ;;  %v1641_v4 = vld [vmem:[#allocation11 + $0x9c8] sm:$0xff]  ;;  %v5758_v17 = vpack.c.bf16 %v1636_v55, %v1632_v53 }
 0x30f   :  { %8428 = vst [vmem:[#allocation47_spill] sm:$0xff] %v7750_v50  ;;  %6007 = vmatpush1.bf16.msra.mxu0 %v6006_v10  ;;  %5753 = vmatprep.subr.bf16.mxu1 %v5752_v13  ;;  %v1645_v44 = vld [vmem:[#allocation11 + $0x9e8] sm:$0xff]  ;;  %v1647_v10 = vld [vmem:[#allocation11 + $0x9f8] sm:$0xff]  ;;  %v1250_v13 = vmax.f32 %v820_v46, 0.0  ;;  %v6014_v54 = vpack.c.bf16 %v1638_v63, %v1634_v22  ;;  %v1642_v46 = vld [vmem:[#allocation11 + $0x9d0] sm:$0xff]  ;;  %v840_v63 = vadd.f32 %v7617_v37, %v7654_v48 }
 0x310   :  { %2097 = vmatmul.mubr.f32.gmra.mrb[74].mxu1 %v1242_v51  ;;  %6009 = vmatprep.subr.bf16.mxu0 %v6008_v27  ;;  %v1259_v27 = vmax.f32 %v828_v0, 0.0  ;;  %v5760_v3 = vpack.c.bf16 %v1645_v44, %v1641_v4  ;;  %v6016_v18 = vpack.c.bf16 %v1647_v10, %v1643_v30  ;;  %v832_v44 = vadd.f32 %v7608_v49, %v7660_v52  ;;  %v1648_v10 = vld [vmem:[#allocation11 + $0xa00] sm:$0xff]  ;;  %v1659_v37 = vld [vmem:[#allocation11 + $0xa58] sm:$0xff] }
 0x311   :  { %2741 = vmatmul.mubr.f32.gmra.mrb[90].mxu0 %v1242_v51  ;;  %v7754_v50 = vpop.f32.mrb[46].mxu1  ;;  %v7756_v28 = vpop.f32.mrb[62].mxu0  ;;  %2102 = vmatprep.mubr.f32.mxu1 %v1251_v6  ;;  %v1644_v51 = vld [vmem:[#allocation11 + $0x9e0] sm:$0xff] }
 0x312   :  { %8429 = vst [vmem:[#allocation48_spill] sm:$0xff] %v7756_v28  ;;  %5755 = vmatpush1.bf16.msra.mxu1 %v5754_v56  ;;  %2746 = vmatprep.mubr.f32.mxu0 %v1251_v6  ;;  %v7760_v20 = vpop.f32.mrb[47].mxu1  ;;  %v7762_v32 = vpop.f32.mrb[63].mxu0  ;;  %v1646_v56 = vld [vmem:[#allocation11 + $0x9f0] sm:$0xff]  ;;  %v1649_v6 = vld [vmem:[#allocation11 + $0xa08] sm:$0xff]  ;;  %v5762_v22 = vpack.c.bf16 %v1644_v51, %v1640_v19 }
 0x313   :  { %8430 = vst [vmem:[#allocation49_spill] sm:$0xff] %v7762_v32  ;;  %6011 = vmatpush1.bf16.msra.mxu0 %v6010_v60  ;;  %5757 = vmatprep.subr.bf16.mxu1 %v5756_v35  ;;  %v1653_v28 = vld [vmem:[#allocation11 + $0xa28] sm:$0xff]  ;;  %v1655_v60 = vld [vmem:[#allocation11 + $0xa38] sm:$0xff]  ;;  %v1258_v35 = vmax.f32 %v826_v39, 0.0  ;;  %v6018_v4 = vpack.c.bf16 %v1646_v56, %v1642_v46  ;;  %v1650_v39 = vld [vmem:[#allocation11 + $0xa10] sm:$0xff]  ;;  %v846_v56 = vadd.f32 %v7623_v62, %v7654_v48 }
 0x314   :  { %2103 = vmatmul.mubr.f32.gmra.mrb[76].mxu1 %v1250_v13  ;;  %6013 = vmatprep.subr.bf16.mxu0 %v6012_v38  ;;  %v1267_v38 = vmax.f32 %v834_v8, 0.0  ;;  %v5764_v30 = vpack.c.bf16 %v1653_v28, %v1649_v6  ;;  %v6020_v49 = vpack.c.bf16 %v1655_v60, %v1651_v61  ;;  %v838_v28 = vadd.f32 %v7614_v15, %v7660_v52  ;;  %v1656_v60 = vld [vmem:[#allocation11 + $0xa40] sm:$0xff]  ;;  %v1667_v62 = vld [vmem:[#allocation11 + $0xa98] sm:$0xff] }
 0x315   :  { %2747 = vmatmul.mubr.f32.gmra.mrb[92].mxu0 %v1250_v13  ;;  %v7766_v32 = vpop.f32.mrb[48].mxu1  ;;  %v7768_v0 = vpop.f32.mrb[64].mxu0  ;;  %2108 = vmatprep.mubr.f32.mxu1 %v1259_v27  ;;  %v1652_v13 = vld [vmem:[#allocation11 + $0xa20] sm:$0xff] }
 0x316   :  { %8431 = vst [vmem:[#allocation50_spill] sm:$0xff] %v7768_v0  ;;  %5759 = vmatpush1.bf16.msra.mxu1 %v5758_v17  ;;  %2752 = vmatprep.mubr.f32.mxu0 %v1259_v27  ;;  %v7772_v53 = vpop.f32.mrb[49].mxu1  ;;  %v7774_v55 = vpop.f32.mrb[65].mxu0  ;;  %v1654_v17 = vld [vmem:[#allocation11 + $0xa30] sm:$0xff]  ;;  %v1657_v27 = vld [vmem:[#allocation11 + $0xa48] sm:$0xff]  ;;  %v5766_v46 = vpack.c.bf16 %v1652_v13, %v1648_v10 }
 0x317   :  { %8432 = vst [vmem:[#allocation51_spill] sm:$0xff] %v7774_v55  ;;  %6015 = vmatpush1.bf16.msra.mxu0 %v6014_v54  ;;  %5761 = vmatprep.subr.bf16.mxu1 %v5760_v3  ;;  %v1661_v0 = vld [vmem:[#allocation11 + $0xa68] sm:$0xff]  ;;  %v1663_v54 = vld [vmem:[#allocation11 + $0xa78] sm:$0xff]  ;;  %v1266_v3 = vmax.f32 %v832_v44, 0.0  ;;  %v6022_v6 = vpack.c.bf16 %v1654_v17, %v1650_v39  ;;  %v1658_v44 = vld [vmem:[#allocation11 + $0xa50] sm:$0xff]  ;;  %v852_v17 = vadd.f32 %v7629_v21, %v7654_v48 }
 0x318   :  { %2109 = vmatmul.mubr.f32.gmra.mrb[78].mxu1 %v1258_v35  ;;  %6017 = vmatprep.subr.bf16.mxu0 %v6016_v18  ;;  %v1275_v18 = vmax.f32 %v840_v63, 0.0  ;;  %v5768_v61 = vpack.c.bf16 %v1661_v0, %v1657_v27  ;;  %v6024_v15 = vpack.c.bf16 %v1663_v54, %v1659_v37  ;;  %v844_v0 = vadd.f32 %v7620_v47, %v7660_v52  ;;  %v1664_v54 = vld [vmem:[#allocation11 + $0xa80] sm:$0xff]  ;;  %v1675_v21 = vld [vmem:[#allocation11 + $0xad8] sm:$0xff] }
 0x319   :  { %2753 = vmatmul.mubr.f32.gmra.mrb[94].mxu0 %v1258_v35  ;;  %v7778_v55 = vpop.f32.mrb[50].mxu1  ;;  %v7780_v8 = vpop.f32.mrb[66].mxu0  ;;  %2114 = vmatprep.mubr.f32.mxu1 %v1267_v38  ;;  %v1660_v35 = vld [vmem:[#allocation11 + $0xa60] sm:$0xff] }
 0x31a   :  { %8433 = vst [vmem:[#allocation52_spill] sm:$0xff] %v7780_v8  ;;  %5763 = vmatpush1.bf16.msra.mxu1 %v5762_v22  ;;  %2758 = vmatprep.mubr.f32.mxu0 %v1267_v38  ;;  %v7784_v19 = vpop.f32.mrb[51].mxu1  ;;  %v7786_v51 = vpop.f32.mrb[67].mxu0  ;;  %v1662_v22 = vld [vmem:[#allocation11 + $0xa70] sm:$0xff]  ;;  %v1665_v38 = vld [vmem:[#allocation11 + $0xa88] sm:$0xff]  ;;  %v5770_v39 = vpack.c.bf16 %v1660_v35, %v1656_v60 }
 0x31b   :  { %8434 = vst [vmem:[#allocation53_spill] sm:$0xff] %v7786_v51  ;;  %6019 = vmatpush1.bf16.msra.mxu0 %v6018_v4  ;;  %5765 = vmatprep.subr.bf16.mxu1 %v5764_v30  ;;  %v1669_v8 = vld [vmem:[#allocation11 + $0xaa8] sm:$0xff]  ;;  %v1671_v4 = vld [vmem:[#allocation11 + $0xab8] sm:$0xff]  ;;  %v1274_v30 = vmax.f32 %v838_v28, 0.0  ;;  %v6026_v27 = vpack.c.bf16 %v1662_v22, %v1658_v44  ;;  %v1666_v28 = vld [vmem:[#allocation11 + $0xa90] sm:$0xff]  ;;  %v858_v22 = vadd.f32 %v7635_v9, %v7654_v48 }
 0x31c   :  { %2115 = vmatmul.mubr.f32.gmra.mrb[80].mxu1 %v1266_v3  ;;  %6021 = vmatprep.subr.bf16.mxu0 %v6020_v49  ;;  %v1283_v49 = vmax.f32 %v846_v56, 0.0  ;;  %v5772_v37 = vpack.c.bf16 %v1669_v8, %v1665_v38  ;;  %v6028_v47 = vpack.c.bf16 %v1671_v4, %v1667_v62  ;;  %v850_v8 = vadd.f32 %v7626_v1, %v7660_v52  ;;  %v1672_v4 = vld [vmem:[#allocation11 + $0xac0] sm:$0xff]  ;;  %v1683_v9 = vld [vmem:[#allocation11 + $0xb18] sm:$0xff] }
 0x31d   :  { %2759 = vmatmul.mubr.f32.gmra.mrb[96].mxu0 %v1266_v3  ;;  %v7790_v51 = vpop.f32.mrb[52].mxu1  ;;  %v7792_v63 = vpop.f32.mrb[68].mxu0  ;;  %2120 = vmatprep.mubr.f32.mxu1 %v1275_v18  ;;  %v1668_v3 = vld [vmem:[#allocation11 + $0xaa0] sm:$0xff] }
 0x31e   :  { %8435 = vst [vmem:[#allocation54_spill] sm:$0xff] %v7792_v63  ;;  %5767 = vmatpush1.bf16.msra.mxu1 %v5766_v46  ;;  %2764 = vmatprep.mubr.f32.mxu0 %v1275_v18  ;;  %v7796_v10 = vpop.f32.mrb[53].mxu1  ;;  %v7798_v13 = vpop.f32.mrb[69].mxu0  ;;  %v1670_v46 = vld [vmem:[#allocation11 + $0xab0] sm:$0xff]  ;;  %v1673_v18 = vld [vmem:[#allocation11 + $0xac8] sm:$0xff]  ;;  %v5774_v44 = vpack.c.bf16 %v1668_v3, %v1664_v54 }
 0x31f   :  { %8436 = vst [vmem:[#allocation55_spill] sm:$0xff] %v7798_v13  ;;  %6023 = vmatpush1.bf16.msra.mxu0 %v6022_v6  ;;  %5769 = vmatprep.subr.bf16.mxu1 %v5768_v61  ;;  %v1677_v63 = vld [vmem:[#allocation11 + $0xae8] sm:$0xff]  ;;  %v1679_v6 = vld [vmem:[#allocation11 + $0xaf8] sm:$0xff]  ;;  %v1282_v61 = vmax.f32 %v844_v0, 0.0  ;;  %v6030_v38 = vpack.c.bf16 %v1670_v46, %v1666_v28  ;;  %v1674_v0 = vld [vmem:[#allocation11 + $0xad0] sm:$0xff]  ;;  %v864_v46 = vadd.f32 %v7641_v45, %v7654_v48 }
 0x320   :  { %2121 = vmatmul.mubr.f32.gmra.mrb[82].mxu1 %v1274_v30  ;;  %6025 = vmatprep.subr.bf16.mxu0 %v6024_v15  ;;  %v1291_v15 = vmax.f32 %v852_v17, 0.0  ;;  %v5776_v62 = vpack.c.bf16 %v1677_v63, %v1673_v18  ;;  %v6032_v1 = vpack.c.bf16 %v1679_v6, %v1675_v21  ;;  %v856_v63 = vadd.f32 %v7632_v57, %v7660_v52  ;;  %v1680_v6 = vld [vmem:[#allocation11 + $0xb00] sm:$0xff]  ;;  %v1691_v45 = vld [vmem:[#allocation11 + $0xb58] sm:$0xff] }
 0x321   :  { %2765 = vmatmul.mubr.f32.gmra.mrb[98].mxu0 %v1274_v30  ;;  %v7802_v13 = vpop.f32.mrb[54].mxu1  ;;  %v7804_v56 = vpop.f32.mrb[70].mxu0  ;;  %2126 = vmatprep.mubr.f32.mxu1 %v1283_v49  ;;  %v1676_v30 = vld [vmem:[#allocation11 + $0xae0] sm:$0xff] }
 0x322   :  { %8437 = vst [vmem:[#allocation56_spill] sm:$0xff] %v7804_v56  ;;  %5771 = vmatpush1.bf16.msra.mxu1 %v5770_v39  ;;  %2770 = vmatprep.mubr.f32.mxu0 %v1283_v49  ;;  %v7808_v60 = vpop.f32.mrb[55].mxu1  ;;  %v7810_v35 = vpop.f32.mrb[71].mxu0  ;;  %v1678_v39 = vld [vmem:[#allocation11 + $0xaf0] sm:$0xff]  ;;  %v1681_v49 = vld [vmem:[#allocation11 + $0xb08] sm:$0xff]  ;;  %v5778_v28 = vpack.c.bf16 %v1676_v30, %v1672_v4  ;;  %v538_v4 = vsub.s32 5, %v7542_v40 }
 0x323   :  { %8438 = vst [vmem:[#allocation57_spill] sm:$0xff] %v7810_v35  ;;  %6027 = vmatpush1.bf16.msra.mxu0 %v6026_v27  ;;  %5773 = vmatprep.subr.bf16.mxu1 %v5772_v37  ;;  %v1685_v56 = vld [vmem:[#allocation11 + $0xb28] sm:$0xff]  ;;  %v1687_v27 = vld [vmem:[#allocation11 + $0xb38] sm:$0xff]  ;;  %v1290_v37 = vmax.f32 %v850_v8, 0.0  ;;  %v6034_v18 = vpack.c.bf16 %v1678_v39, %v1674_v0  ;;  %v1682_v8 = vld [vmem:[#allocation11 + $0xb10] sm:$0xff]  ;;  %v1307_v39 = vmax.f32 %v864_v46, 0.0 }
 0x324   :  { %2127 = vmatmul.mubr.f32.gmra.mrb[84].mxu1 %v1282_v61  ;;  %6029 = vmatprep.subr.bf16.mxu0 %v6028_v47  ;;  %v1299_v47 = vmax.f32 %v858_v22, 0.0  ;;  %v5780_v21 = vpack.c.bf16 %v1685_v56, %v1681_v49  ;;  %v6036_v57 = vpack.c.bf16 %v1687_v27, %v1683_v9  ;;  %v862_v56 = vadd.f32 %v7638_v29, %v7660_v52  ;;  %v1690_v29 = vld [vmem:[#allocation11 + $0xb50] sm:$0xff] }
 0x325   :  { %2771 = vmatmul.mubr.f32.gmra.mrb[100].mxu0 %v1282_v61  ;;  %v7814_v35 = vpop.f32.mrb[56].mxu1  ;;  %v7816_v17 = vpop.f32.mrb[72].mxu0  ;;  %2132 = vmatprep.mubr.f32.mxu1 %v1291_v15  ;;  %v1684_v61 = vld [vmem:[#allocation11 + $0xb20] sm:$0xff]  ;;  %v870_v49 = vadd.f32 %v7649_v25, %v7654_v48  ;;  %v1699_v25 = vld [vmem:[#allocation11 + $0xb98] sm:$0xff] }
 0x326   :  { %8439 = vst [vmem:[#allocation58_spill] sm:$0xff] %v7816_v17  ;;  %5775 = vmatpush1.bf16.msra.mxu1 %v5774_v44  ;;  %2776 = vmatprep.mubr.f32.mxu0 %v1291_v15  ;;  %v7820_v54 = vpop.f32.mrb[57].mxu1  ;;  %v7822_v3 = vpop.f32.mrb[73].mxu0  ;;  %v1686_v44 = vld [vmem:[#allocation11 + $0xb30] sm:$0xff]  ;;  %v1689_v15 = vld [vmem:[#allocation11 + $0xb48] sm:$0xff] }
 0x327   :  { %8440 = vst [vmem:[#allocation59_spill] sm:$0xff] %v7822_v3  ;;  %6031 = vmatpush1.bf16.msra.mxu0 %v6030_v38  ;;  %5777 = vmatprep.subr.bf16.mxu1 %v5776_v62  ;;  %v1693_v17 = vld [vmem:[#allocation11 + $0xb68] sm:$0xff]  ;;  %v1695_v38 = vld [vmem:[#allocation11 + $0xb78] sm:$0xff]  ;;  %v1298_v62 = vmax.f32 %v856_v63, 0.0  ;;  %v6038_v9 = vpack.c.bf16 %v1686_v44, %v1682_v8  ;;  %v1692_v63 = vld [vmem:[#allocation11 + $0xb60] sm:$0xff] }
 0x328   :  { %2133 = vmatmul.mubr.f32.gmra.mrb[86].mxu1 %v1290_v37  ;;  %6033 = vmatprep.subr.bf16.mxu0 %v6032_v1  ;;  %v5782_v1 = vpack.c.bf16 %v1684_v61, %v1680_v6  ;;  %v5784_v27 = vpack.c.bf16 %v1693_v17, %v1689_v15  ;;  %v1306_v17 = vmax.f32 %v862_v56, 0.0  ;;  %v7846_v61 = vld [vmem:[#allocation10] sm:$0xff]  ;;  %v1696_v56 = vld [vmem:[#allocation11 + $0xb80] sm:$0xff] }
 0x329   :  { %2777 = vmatmul.mubr.f32.gmra.mrb[102].mxu0 %v1290_v37  ;;  %v7826_v3 = vpop.f32.mrb[58].mxu1  ;;  %v7828_v22 = vpop.f32.mrb[74].mxu0  ;;  %2138 = vmatprep.mubr.f32.mxu1 %v1299_v47  ;;  %v1688_v37 = vld [vmem:[#allocation11 + $0xb40] sm:$0xff]  ;;  %v7849_v8 = vrot.slane %v7846_v61, %v538_v4 }
 0x32a   :  { %8441 = vst [vmem:[#allocation60_spill] sm:$0xff] %v7828_v22  ;;  %5779 = vmatpush1.bf16.msra.mxu1 %v5778_v28  ;;  %2782 = vmatprep.mubr.f32.mxu0 %v1299_v47  ;;  %v7833_v30 = vpop.f32.mrb[59].mxu1  ;;  %v7835_v0 = vpop.f32.mrb[75].mxu0  ;;  %v6040_v28 = vpack.c.bf16 %v1695_v38, %v1691_v45  ;;  %v1694_v47 = vld [vmem:[#allocation11 + $0xb70] sm:$0xff]  ;;  %v1697_v22 = vld [vmem:[#allocation11 + $0xb88] sm:$0xff]  ;;  %v5786_v15 = vpack.c.bf16 %v1692_v63, %v1688_v37  ;;  %v1315_v45 = vmax.f32 %v870_v49, 0.0 }
 0x32b   :  { %8442 = vst [vmem:[#allocation61_spill] sm:$0xff] %v7835_v0  ;;  %6035 = vmatpush1.bf16.msra.mxu0 %v6034_v18  ;;  %5781 = vmatprep.subr.bf16.mxu1 %v5780_v21  ;;  %v534_v0 = vsub.s32 4, %v7542_v40  ;;  %v1703_v18 = vld [vmem:[#allocation11 + $0xbb8] sm:$0xff]  ;;  %v868_v21 = vadd.f32 %v7646_v42, %v7660_v52  ;;  %v876_v38 = vadd.f32 %v7665_v24, %v7654_v48 }
 0x32c   :  { %2139 = vmatmul.mubr.f32.gmra.mrb[88].mxu1 %v1298_v62  ;;  %6037 = vmatprep.subr.bf16.mxu0 %v6036_v57  ;;  %v5788_v42 = vpack.c.bf16 %v1701_v16, %v1697_v22  ;;  %v6044_v4 = vpack.c.bf16 %v1703_v18, %v1699_v25  ;;  %v1707_v48 = vld [vmem:[#allocation11 + $0xbd8] sm:$0xff]  ;;  %v874_v16 = vadd.f32 %v7662_v2, %v7660_v52  ;;  %v1704_v18 = vld [vmem:[#allocation11 + $0xbc0] sm:$0xff]  ;;  %v1706_v2 = vld [vmem:[#allocation11 + $0xbd0] sm:$0xff] }
 0x32d   :  { %2783 = vmatmul.mubr.f32.gmra.mrb[104].mxu0 %v1298_v62  ;;  %v7840_v46 = vpop.f32.mrb[60].mxu1  ;;  %v7842_v6 = vpop.f32.mrb[76].mxu0  ;;  %2144 = vmatprep.mubr.f32.mxu1 %v1307_v39  ;;  %v6042_v62 = vpack.c.bf16 %v1694_v47, %v1690_v29  ;;  %v1711_v24 = vld [vmem:[#allocation11 + $0xbf8] sm:$0xff]  ;;  %v7864_v22 = vrot.slane %v7846_v61, %v534_v0  ;;  %v1323_v29 = vmax.f32 %v876_v38, 0.0  ;;  %v1708_v52 = vld [vmem:[#allocation11 + $0xbe0] sm:$0xff] }
 0x32e   :  { %8443 = vst [vmem:[#allocation62_spill] sm:$0xff] %v7840_v46  ;;  %8444 = vst [vmem:[#allocation63_spill] sm:$0xff] %v7842_v6  ;;  %5783 = vmatpush1.bf16.msra.mxu1 %v5782_v1  ;;  %2788 = vmatprep.mubr.f32.mxu0 %v1307_v39  ;;  %v7851_v57 = vpop.f32.mrb[61].mxu1  ;;  %v7853_v44 = vpop.f32.mrb[77].mxu0  ;;  %v1700_v6 = vld [vmem:[#allocation11 + $0xba0] sm:$0xff]  ;;  %v1702_v1 = vld [vmem:[#allocation11 + $0xbb0] sm:$0xff]  ;;  %v6048_v0 = vpack.c.bf16 %v1711_v24, %v1707_v48 }
 0x32f   :  { %8445 = vst [vmem:[#allocation64_spill] sm:$0xff] %v7853_v44  ;;  %6039 = vmatpush1.bf16.msra.mxu0 %v6038_v9  ;;  %5785 = vmatprep.subr.bf16.mxu1 %v5784_v27  ;;  %v1705_v39 = vld [vmem:[#allocation11 + $0xbc8] sm:$0xff]  ;;  %v1314_v9 = vmax.f32 %v868_v21, 0.0  ;;  %v5790_v63 = vpack.c.bf16 %v1700_v6, %v1696_v56  ;;  %v6046_v47 = vpack.c.bf16 %v1702_v1, %v1698_v34  ;;  %v1715_v6 = vld [vmem:[#allocation11 + $0xc18] sm:$0xff]  ;;  %v1322_v38 = vmax.f32 %v874_v16, 0.0  ;;  %v1712_v1 = vld [vmem:[#allocation11 + $0xc00] sm:$0xff] }
 0x330   :  { %2145 = vmatmul.mubr.f32.gmra.mrb[90].mxu1 %v1306_v17  ;;  %6041 = vmatprep.subr.bf16.mxu0 %v6040_v28  ;;  %v1709_v46 = vld [vmem:[#allocation11 + $0xbe8] sm:$0xff]  ;;  %v947_v28 = vadd.f32 %v7676_v33, %v7849_v8  ;;  %v5794_v33 = vpack.c.bf16 %v1708_v52, %v1704_v18  ;;  %v945_v34 = vadd.f32 %v7670_v7, %v7864_v22  ;;  %v1714_v48 = vld [vmem:[#allocation11 + $0xc10] sm:$0xff]  ;;  %v1723_v7 = vld [vmem:[#allocation11 + $0xc58] sm:$0xff] }
 0x331   :  { %2789 = vmatmul.mubr.f32.gmra.mrb[106].mxu0 %v1306_v17  ;;  %v7857_v44 = vpop.f32.mrb[62].mxu1  ;;  %v7859_v49 = vpop.f32.mrb[78].mxu0  ;;  %2150 = vmatprep.mubr.f32.mxu1 %v1315_v45  ;;  %v5792_v25 = vpack.c.bf16 %v1709_v46, %v1705_v39  ;;  %v1710_v17 = vld [vmem:[#allocation11 + $0xbf0] sm:$0xff]  ;;  %v1713_v21 = vld [vmem:[#allocation11 + $0xc08] sm:$0xff]  ;;  %v953_v56 = vadd.f32 %v7688_v14, %v7849_v8  ;;  %v1716_v39 = vld [vmem:[#allocation11 + $0xc20] sm:$0xff] }
 0x332   :  { %5787 = vmatpush1.bf16.msra.mxu1 %v5786_v15  ;;  %2794 = vmatprep.mubr.f32.mxu0 %v1315_v45  ;;  %v7866_v27 = vpop.f32.mrb[63].mxu1  ;;  %v7868_v37 = vpop.f32.mrb[79].mxu0  ;;  %v1717_v15 = vld [vmem:[#allocation11 + $0xc28] sm:$0xff]  ;;  %v1719_v45 = vld [vmem:[#allocation11 + $0xc38] sm:$0xff]  ;;  %v1205_v46 = vmax.f32 %v947_v28, 0.0  ;;  %v1718_v24 = vld [vmem:[#allocation11 + $0xc30] sm:$0xff]  ;;  %v951_v28 = vadd.f32 %v7682_v12, %v7864_v22  ;;  %v5798_v14 = vpack.c.bf16 %v1716_v39, %v1712_v1 }
 0x333   :  { %6043 = vmatpush1.bf16.msra.mxu0 %v6042_v62  ;;  %5789 = vmatprep.subr.bf16.mxu1 %v5788_v42  ;;  %v6050_v62 = vpack.c.bf16 %v1710_v17, %v1706_v2  ;;  %v5796_v42 = vpack.c.bf16 %v1717_v15, %v1713_v21  ;;  %v1725_v16 = vld [vmem:[#allocation11 + $0xc68] sm:$0xff]  ;;  %v6054_v18 = vpack.c.bf16 %v1718_v24, %v1714_v48  ;;  %v1720_v2 = vld [vmem:[#allocation11 + $0xc40] sm:$0xff]  ;;  %v1722_v17 = vld [vmem:[#allocation11 + $0xc50] sm:$0xff] }
 0x334   :  { %2151 = vmatmul.mubr.f32.gmra.mrb[92].mxu1 %v1314_v9  ;;  %6045 = vmatprep.subr.bf16.mxu0 %v6044_v4  ;;  %v6052_v4 = vpack.c.bf16 %v1719_v45, %v1715_v6  ;;  %v1726_v15 = vld [vmem:[#allocation11 + $0xc70] sm:$0xff]  ;;  %v1729_v6 = vld [vmem:[#allocation11 + $0xc88] sm:$0xff]  ;;  %v1731_v12 = vld [vmem:[#allocation11 + $0xc98] sm:$0xff] }
 0x335   :  { %2795 = vmatmul.mubr.f32.gmra.mrb[108].mxu0 %v1314_v9  ;;  %2156 = vmatprep.mubr.f32.mxu1 %v1323_v29  ;;  %v1721_v9 = vld [vmem:[#allocation11 + $0xc48] sm:$0xff]  ;;  %v1732_v1 = vld [vmem:[#allocation11 + $0xca0] sm:$0xff]  ;;  %v1730_v39 = vld [vmem:[#allocation11 + $0xc90] sm:$0xff] }
 0x336   :  { %5791 = vmatpush1.bf16.msra.mxu1 %v5790_v63  ;;  %2800 = vmatprep.mubr.f32.mxu0 %v1323_v29  ;;  %v1727_v63 = vld [vmem:[#allocation11 + $0xc78] sm:$0xff]  ;;  %v1204_v29 = vmax.f32 %v945_v34, 0.0  ;;  %v5800_v52 = vpack.c.bf16 %v1725_v16, %v1721_v9  ;;  %v1733_v45 = vld [vmem:[#allocation11 + $0xca8] sm:$0xff]  ;;  %v957_v34 = vadd.f32 %v7694_v58, %v7864_v22  ;;  %v1734_v24 = vld [vmem:[#allocation11 + $0xcb0] sm:$0xff] }
 0x337   :  { %6047 = vmatpush1.bf16.msra.mxu0 %v6046_v47  ;;  %5793 = vmatprep.subr.bf16.mxu1 %v5792_v25  ;;  %v1213_v47 = vmax.f32 %v953_v56, 0.0  ;;  %v959_v25 = vadd.f32 %v7700_v11, %v7849_v8  ;;  %v6056_v21 = vpack.c.bf16 %v1727_v63, %v1723_v7  ;;  %v5804_v56 = vpack.c.bf16 %v1733_v45, %v1729_v6  ;;  %v1737_v9 = vld [vmem:[#allocation11 + $0xcc8] sm:$0xff]  ;;  %v1739_v16 = vld [vmem:[#allocation11 + $0xcd8] sm:$0xff] }
 0x338   :  { %2157 = vmatmul.mubr.f32.gmra.mrb[94].mxu1 %v1322_v38  ;;  %6049 = vmatprep.subr.bf16.mxu0 %v6048_v0  ;;  %v1724_v0 = vld [vmem:[#allocation11 + $0xc60] sm:$0xff]  ;;  %v1741_v58 = vld [vmem:[#allocation11 + $0xce8] sm:$0xff]  ;;  %v1743_v7 = vld [vmem:[#allocation11 + $0xcf8] sm:$0xff]  ;;  %v1220_v63 = vmax.f32 %v957_v34, 0.0 }
 0x339   :  { %2801 = vmatmul.mubr.f32.gmra.mrb[110].mxu0 %v1322_v38  ;;  %2227 = vmatprep.mubr.f32.mxu1 %v1205_v46  ;;  %v1735_v38 = vld [vmem:[#allocation11 + $0xcb8] sm:$0xff]  ;;  %v5802_v11 = vpack.c.bf16 %v1724_v0, %v1720_v2  ;;  %v1738_v2 = vld [vmem:[#allocation11 + $0xcd0] sm:$0xff]  ;;  %v6064_v0 = vpack.c.bf16 %v1743_v7, %v1739_v16  ;;  %v983_v16 = vadd.f32 %v7748_v36, %v7849_v8 }
 0x33a   :  { %5795 = vmatpush1.bf16.msra.mxu1 %v5794_v33  ;;  %2871 = vmatprep.mubr.f32.mxu0 %v1205_v46  ;;  %v1212_v33 = vmax.f32 %v951_v28, 0.0  ;;  %v1221_v46 = vmax.f32 %v959_v25, 0.0  ;;  %v6060_v48 = vpack.c.bf16 %v1735_v38, %v1731_v12  ;;  %v5808_v25 = vpack.c.bf16 %v1741_v58, %v1737_v9  ;;  %v1751_v6 = vld [vmem:[#allocation11 + $0xd38] sm:$0xff] }
 0x33b   :  { %6051 = vmatpush1.bf16.msra.mxu0 %v6050_v62  ;;  %5797 = vmatprep.subr.bf16.mxu1 %v5796_v42  ;;  %v965_v62 = vadd.f32 %v7712_v43, %v7849_v8  ;;  %v6058_v42 = vpack.c.bf16 %v1726_v15, %v1722_v17  ;;  %v963_v43 = vadd.f32 %v7706_v41, %v7864_v22  ;;  %v1742_v17 = vld [vmem:[#allocation11 + $0xcf0] sm:$0xff]  ;;  %v1749_v41 = vld [vmem:[#allocation11 + $0xd28] sm:$0xff]  ;;  %v1747_v15 = vld [vmem:[#allocation11 + $0xd18] sm:$0xff] }
 0x33c   :  { %6053 = vmatprep.subr.bf16.mxu0 %v6052_v4  ;;  %v1728_v4 = vld [vmem:[#allocation11 + $0xc80] sm:$0xff]  ;;  %v6066_v34 = vpack.c.bf16 %v1742_v17, %v1738_v2  ;;  %v981_v36 = vadd.f32 %v7742_v23, %v7864_v22  ;;  %v1253_v17 = vmax.f32 %v983_v16, 0.0  ;;  %v1773_v23 = vld [vmem:[#allocation11 + $0xde8] sm:$0xff]  ;;  %v1783_v16 = vld [vmem:[#allocation11 + $0xe38] sm:$0xff] }
 0x33d   :  { %2228 = vmatmul.mubr.f32.vlgmr.msra.gmra.mrb[64].mxu1 %v1204_v29  ;;  %v1229_v28 = vmax.f32 %v965_v62, 0.0  ;;  %v1228_v45 = vmax.f32 %v963_v43, 0.0  ;;  %v1748_v62 = vld [vmem:[#allocation11 + $0xd20] sm:$0xff] }
 0x33e   :  { %2872 = vmatmul.mubr.f32.vlgmr.msra.gmra.mrb[80].mxu0 %v1204_v29  ;;  %2233 = vmatprep.mubr.f32.mxu1 %v1213_v47  ;;  %v5806_v29 = vpack.c.bf16 %v1732_v1, %v1728_v4  ;;  %v1750_v4 = vld [vmem:[#allocation11 + $0xd30] sm:$0xff]  ;;  %v1753_v1 = vld [vmem:[#allocation11 + $0xd48] sm:$0xff]  ;;  %v1752_v43 = vld [vmem:[#allocation11 + $0xd40] sm:$0xff] }
 0x33f   :  { %5799 = vmatpush1.bf16.msra.mxu1 %v5798_v14  ;;  %2877 = vmatprep.mubr.f32.mxu0 %v1213_v47  ;;  %v971_v14 = vadd.f32 %v7724_v5, %v7849_v8  ;;  %v6062_v47 = vpack.c.bf16 %v1734_v24, %v1730_v39  ;;  %v969_v5 = vadd.f32 %v7718_v59, %v7864_v22  ;;  %v1757_v59 = vld [vmem:[#allocation11 + $0xd68] sm:$0xff]  ;;  %v1755_v39 = vld [vmem:[#allocation11 + $0xd58] sm:$0xff] }
 0x340   :  { %6055 = vmatpush1.bf16.msra.mxu0 %v6054_v18  ;;  %5801 = vmatprep.subr.bf16.mxu1 %v5800_v52  ;;  %v1736_v18 = vld [vmem:[#allocation11 + $0xcc0] sm:$0xff] }
 0x341   :  { %2234 = vmatmul.mubr.f32.gmra.mrb[66].mxu1 %v1212_v33  ;;  %6057 = vmatprep.subr.bf16.mxu0 %v6056_v21  ;;  %v1740_v52 = vld [vmem:[#allocation11 + $0xce0] sm:$0xff]  ;;  %v1745_v21 = vld [vmem:[#allocation11 + $0xd08] sm:$0xff]  ;;  %v1237_v38 = vmax.f32 %v971_v14, 0.0  ;;  %v1236_v24 = vmax.f32 %v969_v5, 0.0  ;;  %v1762_v5 = vld [vmem:[#allocation11 + $0xd90] sm:$0xff] }
 0x342   :  { %2878 = vmatmul.mubr.f32.gmra.mrb[82].mxu0 %v1212_v33  ;;  %2239 = vmatprep.mubr.f32.mxu1 %v1221_v46  ;;  %v5810_v12 = vpack.c.bf16 %v1740_v52, %v1736_v18  ;;  %v977_v33 = vadd.f32 %v7736_v26, %v7849_v8  ;;  %v975_v26 = vadd.f32 %v7730_v31, %v7864_v22  ;;  %v1765_v31 = vld [vmem:[#allocation11 + $0xda8] sm:$0xff]  ;;  %v1763_v18 = vld [vmem:[#allocation11 + $0xd98] sm:$0xff] }
 0x343   :  { %5803 = vmatpush1.bf16.msra.mxu1 %v5802_v11  ;;  %2883 = vmatprep.mubr.f32.mxu0 %v1221_v46  ;;  %v5812_v11 = vpack.c.bf16 %v1749_v41, %v1745_v21  ;;  %v1744_v46 = vld [vmem:[#allocation11 + $0xd00] sm:$0xff]  ;;  %v1767_v52 = vld [vmem:[#allocation11 + $0xdb8] sm:$0xff]  ;;  %v989_v21 = vadd.f32 %v7760_v20, %v7849_v8  ;;  %v987_v20 = vadd.f32 %v7754_v50, %v7864_v22  ;;  %v1781_v50 = vld [vmem:[#allocation11 + $0xe28] sm:$0xff] }
 0x344   :  { %6059 = vmatpush1.bf16.msra.mxu0 %v6058_v42  ;;  %5805 = vmatprep.subr.bf16.mxu1 %v5804_v56  ;;  %v1746_v42 = vld [vmem:[#allocation11 + $0xd10] sm:$0xff]  ;;  %v6068_v56 = vpack.c.bf16 %v1751_v6, %v1747_v15  ;;  %v5814_v9 = vpack.c.bf16 %v1748_v62, %v1744_v46  ;;  %v1245_v58 = vmax.f32 %v977_v33, 0.0  ;;  %v1244_v2 = vmax.f32 %v975_v26, 0.0  ;;  %v1760_v6 = vld [vmem:[#allocation11 + $0xd80] sm:$0xff]  ;;  %v1769_v33 = vld [vmem:[#allocation11 + $0xdc8] sm:$0xff] }
 0x345   :  { %2240 = vmatmul.mubr.f32.gmra.mrb[68].mxu1 %v1220_v63  ;;  %6061 = vmatprep.subr.bf16.mxu0 %v6060_v48  ;;  %v1759_v48 = vld [vmem:[#allocation11 + $0xd78] sm:$0xff]  ;;  %v6070_v7 = vpack.c.bf16 %v1750_v4, %v1746_v42  ;;  %v1252_v46 = vmax.f32 %v981_v36, 0.0  ;;  %v1261_v42 = vmax.f32 %v989_v21, 0.0  ;;  %v1774_v26 = vld [vmem:[#allocation11 + $0xdf0] sm:$0xff] }
 0x346   :  { %2884 = vmatmul.mubr.f32.gmra.mrb[84].mxu0 %v1220_v63  ;;  %2245 = vmatprep.mubr.f32.mxu1 %v1229_v28  ;;  %v5816_v63 = vpack.c.bf16 %v1757_v59, %v1753_v1  ;;  %v6072_v14 = vpack.c.bf16 %v1759_v48, %v1755_v39  ;;  %v5824_v1 = vpack.c.bf16 %v1773_v23, %v1769_v33  ;;  %v1768_v59 = vld [vmem:[#allocation11 + $0xdc0] sm:$0xff]  ;;  %v1770_v48 = vld [vmem:[#allocation11 + $0xdd0] sm:$0xff]  ;;  %v1787_v36 = vld [vmem:[#allocation11 + $0xe58] sm:$0xff] }
 0x347   :  { %5807 = vmatpush1.bf16.msra.mxu1 %v5806_v29  ;;  %2889 = vmatprep.mubr.f32.mxu0 %v1229_v28  ;;  %v1756_v29 = vld [vmem:[#allocation11 + $0xd60] sm:$0xff]  ;;  %v1754_v28 = vld [vmem:[#allocation11 + $0xd50] sm:$0xff] }
 0x348   :  { %6063 = vmatpush1.bf16.msra.mxu0 %v6062_v47  ;;  %5809 = vmatprep.subr.bf16.mxu1 %v5808_v25  ;;  %v1758_v47 = vld [vmem:[#allocation11 + $0xd70] sm:$0xff]  ;;  %v1761_v25 = vld [vmem:[#allocation11 + $0xd88] sm:$0xff]  ;;  %v1772_v39 = vld [vmem:[#allocation11 + $0xde0] sm:$0xff] }
 0x349   :  { %2246 = vmatmul.mubr.f32.gmra.mrb[70].mxu1 %v1228_v45  ;;  %6065 = vmatprep.subr.bf16.mxu0 %v6064_v0  ;;  %v5818_v0 = vpack.c.bf16 %v1756_v29, %v1752_v43  ;;  %v6074_v41 = vpack.c.bf16 %v1758_v47, %v1754_v28  ;;  %v5820_v15 = vpack.c.bf16 %v1765_v31, %v1761_v25  ;;  %v1776_v47 = vld [vmem:[#allocation11 + $0xe00] sm:$0xff]  ;;  %v1778_v31 = vld [vmem:[#allocation11 + $0xe10] sm:$0xff] }
 0x34a   :  { %2890 = vmatmul.mubr.f32.gmra.mrb[86].mxu0 %v1228_v45  ;;  %2251 = vmatprep.mubr.f32.mxu1 %v1237_v38  ;;  %v1764_v45 = vld [vmem:[#allocation11 + $0xda0] sm:$0xff]  ;;  %v1001_v29 = vadd.f32 %v7784_v19, %v7849_v8  ;;  %v6082_v28 = vpack.c.bf16 %v1774_v26, %v1770_v48  ;;  %v999_v19 = vadd.f32 %v7778_v55, %v7864_v22  ;;  %v1790_v23 = vld [vmem:[#allocation11 + $0xe70] sm:$0xff]  ;;  %v1797_v55 = vld [vmem:[#allocation11 + $0xea8] sm:$0xff] }
 0x34b   :  { %5811 = vmatpush1.bf16.msra.mxu1 %v5810_v12  ;;  %2895 = vmatprep.mubr.f32.mxu0 %v1237_v38  ;;  %v6076_v12 = vpack.c.bf16 %v1767_v52, %v1763_v18  ;;  %v1766_v38 = vld [vmem:[#allocation11 + $0xdb0] sm:$0xff]  ;;  %v5822_v62 = vpack.c.bf16 %v1764_v45, %v1760_v6  ;;  %v1780_v25 = vld [vmem:[#allocation11 + $0xe20] sm:$0xff] }
 0x34c   :  { %6067 = vmatpush1.bf16.msra.mxu0 %v6066_v34  ;;  %5813 = vmatprep.subr.bf16.mxu1 %v5812_v11  ;;  %v1771_v34 = vld [vmem:[#allocation11 + $0xdd8] sm:$0xff]  ;;  %v6078_v4 = vpack.c.bf16 %v1766_v38, %v1762_v5  ;;  %v1782_v52 = vld [vmem:[#allocation11 + $0xe30] sm:$0xff]  ;;  %v5830_v21 = vpack.c.bf16 %v1780_v25, %v1776_v47  ;;  %v1784_v5 = vld [vmem:[#allocation11 + $0xe40] sm:$0xff] }
 0x34d   :  { %2252 = vmatmul.mubr.f32.gmra.mrb[72].mxu1 %v1236_v24  ;;  %6069 = vmatprep.subr.bf16.mxu0 %v6068_v56  ;;  %v1775_v11 = vld [vmem:[#allocation11 + $0xdf8] sm:$0xff]  ;;  %v995_v56 = vadd.f32 %v7772_v53, %v7849_v8  ;;  %v993_v53 = vadd.f32 %v7766_v32, %v7864_v22  ;;  %v1789_v32 = vld [vmem:[#allocation11 + $0xe68] sm:$0xff]  ;;  %v6086_v6 = vpack.c.bf16 %v1782_v52, %v1778_v31  ;;  %v1786_v38 = vld [vmem:[#allocation11 + $0xe50] sm:$0xff] }
 0x34e   :  { %2896 = vmatmul.mubr.f32.gmra.mrb[88].mxu0 %v1236_v24  ;;  %2257 = vmatprep.mubr.f32.mxu1 %v1245_v58  ;;  %v6080_v24 = vpack.c.bf16 %v1775_v11, %v1771_v34  ;;  %v1793_v34 = vld [vmem:[#allocation11 + $0xe88] sm:$0xff]  ;;  %v1795_v11 = vld [vmem:[#allocation11 + $0xe98] sm:$0xff]  ;;  %v1794_v48 = vld [vmem:[#allocation11 + $0xe90] sm:$0xff] }
 0x34f   :  { %5815 = vmatpush1.bf16.msra.mxu1 %v5814_v9  ;;  %2901 = vmatprep.mubr.f32.mxu0 %v1245_v58  ;;  %v1777_v9 = vld [vmem:[#allocation11 + $0xe08] sm:$0xff]  ;;  %v1779_v58 = vld [vmem:[#allocation11 + $0xe18] sm:$0xff]  ;;  %v1269_v43 = vmax.f32 %v995_v56, 0.0  ;;  %v1013_v56 = vadd.f32 %v7808_v60, %v7849_v8  ;;  %v1798_v26 = vld [vmem:[#allocation11 + $0xeb0] sm:$0xff]  ;;  %v1011_v60 = vadd.f32 %v7802_v13, %v7864_v22 }
 0x350   :  { %6071 = vmatpush1.bf16.msra.mxu0 %v6070_v7  ;;  %5817 = vmatprep.subr.bf16.mxu1 %v5816_v63  ;;  %v1260_v7 = vmax.f32 %v987_v20, 0.0  ;;  %v5826_v63 = vpack.c.bf16 %v1772_v39, %v1768_v59  ;;  %v6084_v18 = vpack.c.bf16 %v1783_v16, %v1779_v58  ;;  %v1276_v20 = vmax.f32 %v999_v19, 0.0  ;;  %v1792_v59 = vld [vmem:[#allocation11 + $0xe80] sm:$0xff]  ;;  %v1807_v58 = vld [vmem:[#allocation11 + $0xef8] sm:$0xff]  ;;  %v1802_v47 = vld [vmem:[#allocation11 + $0xed0] sm:$0xff] }
 0x351   :  { %2258 = vmatmul.mubr.f32.gmra.mrb[74].mxu1 %v1244_v2  ;;  %6073 = vmatprep.subr.bf16.mxu0 %v6072_v14  ;;  %v5828_v14 = vpack.c.bf16 %v1781_v50, %v1777_v9  ;;  %v1796_v39 = vld [vmem:[#allocation11 + $0xea0] sm:$0xff]  ;;  %v1801_v9 = vld [vmem:[#allocation11 + $0xec8] sm:$0xff]  ;;  %v1803_v50 = vld [vmem:[#allocation11 + $0xed8] sm:$0xff] }
 0x352   :  { %2902 = vmatmul.mubr.f32.gmra.mrb[90].mxu0 %v1244_v2  ;;  %2263 = vmatprep.mubr.f32.mxu1 %v1253_v17  ;;  %v1785_v2 = vld [vmem:[#allocation11 + $0xe48] sm:$0xff]  ;;  %v6096_v25 = vpack.c.bf16 %v1807_v58, %v1803_v50  ;;  %v1806_v31 = vld [vmem:[#allocation11 + $0xef0] sm:$0xff]  ;;  %v1811_v52 = vld [vmem:[#allocation11 + $0xf18] sm:$0xff] }
 0x353   :  { %5819 = vmatpush1.bf16.msra.mxu1 %v5818_v0  ;;  %2907 = vmatprep.mubr.f32.mxu0 %v1253_v17  ;;  %v1791_v0 = vld [vmem:[#allocation11 + $0xe78] sm:$0xff]  ;;  %v1268_v17 = vmax.f32 %v993_v53, 0.0  ;;  %v5832_v45 = vpack.c.bf16 %v1789_v32, %v1785_v2  ;;  %v1293_v53 = vmax.f32 %v1013_v56, 0.0  ;;  %v1813_v13 = vld [vmem:[#allocation11 + $0xf28] sm:$0xff]  ;;  %v1292_v32 = vmax.f32 %v1011_v60, 0.0  ;;  %v1818_v56 = vld [vmem:[#allocation11 + $0xf50] sm:$0xff] }
 0x354   :  { %6075 = vmatpush1.bf16.msra.mxu0 %v6074_v41  ;;  %5821 = vmatprep.subr.bf16.mxu1 %v5820_v15  ;;  %v1277_v41 = vmax.f32 %v1001_v29, 0.0  ;;  %v1007_v15 = vadd.f32 %v7796_v10, %v7849_v8  ;;  %v6088_v33 = vpack.c.bf16 %v1791_v0, %v1787_v36  ;;  %v1005_v10 = vadd.f32 %v7790_v51, %v7864_v22  ;;  %v1805_v51 = vld [vmem:[#allocation11 + $0xee8] sm:$0xff]  ;;  %v1815_v2 = vld [vmem:[#allocation11 + $0xf38] sm:$0xff] }
 0x355   :  { %2264 = vmatmul.mubr.f32.gmra.mrb[76].mxu1 %v1252_v46  ;;  %6077 = vmatprep.subr.bf16.mxu0 %v6076_v12  ;;  %v1788_v12 = vld [vmem:[#allocation11 + $0xe60] sm:$0xff]  ;;  %v5840_v29 = vpack.c.bf16 %v1805_v51, %v1801_v9  ;;  %v6098_v19 = vpack.c.bf16 %v1806_v31, %v1802_v47  ;;  %v1837_v47 = vld [vmem:[#allocation11 + $0xfe8] sm:$0xff]  ;;  %v1839_v31 = vld [vmem:[#allocation11 + $0xff8] sm:$0xff] }
 0x356   :  { %2908 = vmatmul.mubr.f32.gmra.mrb[92].mxu0 %v1252_v46  ;;  %2269 = vmatprep.mubr.f32.mxu1 %v1261_v42  ;;  %v1799_v46 = vld [vmem:[#allocation11 + $0xeb8] sm:$0xff]  ;;  %v1284_v16 = vmax.f32 %v1005_v10, 0.0  ;;  %v8446_v9 = vld [vmem:[#allocation62_spill] sm:$0xff] }
 0x357   :  { %5823 = vmatpush1.bf16.msra.mxu1 %v5822_v62  ;;  %2913 = vmatprep.mubr.f32.mxu0 %v1261_v42  ;;  %v5834_v62 = vpack.c.bf16 %v1788_v12, %v1784_v5  ;;  %v1285_v42 = vmax.f32 %v1007_v15, 0.0  ;;  %v1812_v15 = vld [vmem:[#allocation11 + $0xf20] sm:$0xff]  ;;  %v1814_v5 = vld [vmem:[#allocation11 + $0xf30] sm:$0xff]  ;;  %v1817_v12 = vld [vmem:[#allocation11 + $0xf48] sm:$0xff]  ;;  %v1029_v51 = vadd.f32 %v8446_v9, %v7864_v22 }
 0x358   :  { %6079 = vmatpush1.bf16.msra.mxu0 %v6078_v4  ;;  %5825 = vmatprep.subr.bf16.mxu1 %v5824_v1  ;;  %v6090_v4 = vpack.c.bf16 %v1790_v23, %v1786_v38  ;;  %v5836_v1 = vpack.c.bf16 %v1797_v55, %v1793_v34  ;;  %v1819_v38 = vld [vmem:[#allocation11 + $0xf58] sm:$0xff]  ;;  %v546_v23 = vsub.s32 7, %v7542_v40  ;;  %v1023_v34 = vadd.f32 %v7826_v3, %v7864_v22  ;;  %v1829_v3 = vld [vmem:[#allocation11 + $0xfa8] sm:$0xff] }
 0x359   :  { %2270 = vmatmul.mubr.f32.gmra.mrb[78].mxu1 %v1260_v7  ;;  %6081 = vmatprep.subr.bf16.mxu0 %v6080_v24  ;;  %v6092_v24 = vpack.c.bf16 %v1799_v46, %v1795_v11  ;;  %v1031_v46 = vadd.f32 %v7851_v57, %v7849_v8  ;;  %v8457_v9 = vld [vmem:[#allocation45_spill] sm:$0xff] }
 0x35a   :  { %2914 = vmatmul.mubr.f32.gmra.mrb[94].mxu0 %v1260_v7  ;;  %2275 = vmatprep.mubr.f32.mxu1 %v1269_v43  ;;  %v5838_v7 = vpack.c.bf16 %v1796_v39, %v1792_v59  ;;  %v1825_v59 = vld [vmem:[#allocation11 + $0xf88] sm:$0xff]  ;;  %v542_v39 = vsub.s32 6, %v7542_v40  ;;  %v7931_v57 = vrot.slane %v7846_v61, %v546_v23 }
 0x35b   :  { %5827 = vmatpush1.bf16.msra.mxu1 %v5826_v63  ;;  %2919 = vmatprep.mubr.f32.mxu0 %v1269_v43  ;;  %v1019_v63 = vadd.f32 %v7820_v54, %v7849_v8  ;;  %v6094_v43 = vpack.c.bf16 %v1798_v26, %v1794_v48  ;;  %v1017_v54 = vadd.f32 %v7814_v35, %v7864_v22  ;;  %v1821_v35 = vld [vmem:[#allocation11 + $0xf68] sm:$0xff]  ;;  %v1827_v48 = vld [vmem:[#allocation11 + $0xf98] sm:$0xff]  ;;  %v1308_v26 = vmax.f32 %v1023_v34, 0.0 }
 0x35c   :  { %6083 = vmatpush1.bf16.msra.mxu0 %v6082_v28  ;;  %5829 = vmatprep.subr.bf16.mxu1 %v5828_v14  ;;  %v1800_v28 = vld [vmem:[#allocation11 + $0xec0] sm:$0xff]  ;;  %v5848_v10 = vpack.c.bf16 %v1821_v35, %v1817_v12  ;;  %v1317_v58 = vmax.f32 %v1031_v46, 0.0 }
 0x35d   :  { %2276 = vmatmul.mubr.f32.gmra.mrb[80].mxu1 %v1268_v17  ;;  %6085 = vmatprep.subr.bf16.mxu0 %v6084_v18  ;;  %v1804_v14 = vld [vmem:[#allocation11 + $0xee0] sm:$0xff]  ;;  %v1809_v18 = vld [vmem:[#allocation11 + $0xf08] sm:$0xff]  ;;  %v1301_v0 = vmax.f32 %v1019_v63, 0.0 }
 0x35e   :  { %2920 = vmatmul.mubr.f32.gmra.mrb[96].mxu0 %v1268_v17  ;;  %2281 = vmatprep.mubr.f32.mxu1 %v1277_v41  ;;  %v5842_v36 = vpack.c.bf16 %v1804_v14, %v1800_v28  ;;  %v1025_v17 = vadd.f32 %v7833_v30, %v7849_v8  ;;  %v1300_v30 = vmax.f32 %v1017_v54, 0.0  ;;  %v1828_v63 = vld [vmem:[#allocation11 + $0xfa0] sm:$0xff]  ;;  %v1830_v28 = vld [vmem:[#allocation11 + $0xfb0] sm:$0xff]  ;;  %v1833_v14 = vld [vmem:[#allocation11 + $0xfc8] sm:$0xff] }
 0x35f   :  { %5831 = vmatpush1.bf16.msra.mxu1 %v5830_v21  ;;  %2925 = vmatprep.mubr.f32.mxu0 %v1277_v41  ;;  %v5844_v21 = vpack.c.bf16 %v1813_v13, %v1809_v18  ;;  %v1808_v41 = vld [vmem:[#allocation11 + $0xf00] sm:$0xff]  ;;  %v7938_v18 = vrot.slane %v7846_v61, %v542_v39 }
 0x360   :  { %6087 = vmatpush1.bf16.msra.mxu0 %v6086_v6  ;;  %5833 = vmatprep.subr.bf16.mxu1 %v5832_v45  ;;  %v1810_v6 = vld [vmem:[#allocation11 + $0xf10] sm:$0xff]  ;;  %v6100_v45 = vpack.c.bf16 %v1815_v2, %v1811_v52  ;;  %v5846_v55 = vpack.c.bf16 %v1812_v15, %v1808_v41  ;;  %v1309_v11 = vmax.f32 %v1025_v17, 0.0  ;;  %v1836_v17 = vld [vmem:[#allocation11 + $0xfe0] sm:$0xff] }
 0x361   :  { %2282 = vmatmul.mubr.f32.gmra.mrb[82].mxu1 %v1276_v20  ;;  %6089 = vmatprep.subr.bf16.mxu0 %v6088_v33  ;;  %v1823_v33 = vld [vmem:[#allocation11 + $0xf78] sm:$0xff]  ;;  %v8447_v52 = vld [vmem:[#allocation35_spill] sm:$0xff]  ;;  %v8448_v41 = vld [vmem:[#allocation34_spill] sm:$0xff] }
 0x362   :  { %2926 = vmatmul.mubr.f32.gmra.mrb[98].mxu0 %v1276_v20  ;;  %2287 = vmatprep.mubr.f32.mxu1 %v1285_v42  ;;  %v6102_v20 = vpack.c.bf16 %v1814_v5, %v1810_v6  ;;  %v1108_v2 = vadd.f32 %v8447_v52, %v7931_v57  ;;  %v1106_v15 = vadd.f32 %v8448_v41, %v7938_v18  ;;  %v8449_v5 = vld [vmem:[#allocation37_spill] sm:$0xff] }
 0x363   :  { %5835 = vmatpush1.bf16.msra.mxu1 %v5834_v62  ;;  %2931 = vmatprep.mubr.f32.mxu0 %v1285_v42  ;;  %v1816_v62 = vld [vmem:[#allocation11 + $0xf40] sm:$0xff]  ;;  %v1114_v12 = vadd.f32 %v8449_v5, %v7931_v57 }
 0x364   :  { %6091 = vmatpush1.bf16.msra.mxu0 %v6090_v4  ;;  %5837 = vmatprep.subr.bf16.mxu1 %v5836_v1  ;;  %v1820_v42 = vld [vmem:[#allocation11 + $0xf60] sm:$0xff]  ;;  %v6104_v4 = vpack.c.bf16 %v1823_v33, %v1819_v38  ;;  %v1822_v1 = vld [vmem:[#allocation11 + $0xf70] sm:$0xff]  ;;  %v1207_v6 = vmax.f32 %v1108_v2, 0.0  ;;  %v1206_v35 = vmax.f32 %v1106_v15, 0.0 }
 0x365   :  { %2288 = vmatmul.mubr.f32.gmra.mrb[84].mxu1 %v1284_v16  ;;  %6093 = vmatprep.subr.bf16.mxu0 %v6092_v24  ;;  %v1831_v24 = vld [vmem:[#allocation11 + $0xfb8] sm:$0xff]  ;;  %v5850_v50 = vpack.c.bf16 %v1820_v42, %v1816_v62  ;;  %v6106_v60 = vpack.c.bf16 %v1822_v1, %v1818_v56  ;;  %v1215_v23 = vmax.f32 %v1114_v12, 0.0 }
 0x366   :  { %2932 = vmatmul.mubr.f32.gmra.mrb[100].mxu0 %v1284_v16  ;;  %2293 = vmatprep.mubr.f32.mxu1 %v1293_v53  ;;  %v1037_v16 = vadd.f32 %v7866_v27, %v7849_v8  ;;  %v1316_v8 = vmax.f32 %v1029_v51, 0.0  ;;  %v1035_v27 = vadd.f32 %v7857_v44, %v7864_v22  ;;  %v8450_v38 = vld [vmem:[#allocation36_spill] sm:$0xff]  ;;  %v1138_v51 = vadd.f32 %v8457_v9, %v7931_v57  ;;  %v8469_v12 = vld [vmem:[#allocation57_spill] sm:$0xff] }
 0x367   :  { %5839 = vmatpush1.bf16.msra.mxu1 %v5838_v7  ;;  %2937 = vmatprep.mubr.f32.mxu0 %v1293_v53  ;;  %v5852_v7 = vpack.c.bf16 %v1829_v3, %v1825_v59  ;;  %v1824_v53 = vld [vmem:[#allocation11 + $0xf80] sm:$0xff]  ;;  %v1112_v33 = vadd.f32 %v8450_v38, %v7938_v18  ;;  %v8454_v56 = vld [vmem:[#allocation40_spill] sm:$0xff]  ;;  %v8455_v59 = vld [vmem:[#allocation43_spill] sm:$0xff] }
 0x368   :  { %6095 = vmatpush1.bf16.msra.mxu0 %v6094_v43  ;;  %5841 = vmatprep.subr.bf16.mxu1 %v5840_v29  ;;  %v1826_v43 = vld [vmem:[#allocation11 + $0xf90] sm:$0xff]  ;;  %v6108_v29 = vpack.c.bf16 %v1831_v24, %v1827_v48  ;;  %v5854_v13 = vpack.c.bf16 %v1828_v63, %v1824_v53  ;;  %v1324_v44 = vmax.f32 %v1035_v27, 0.0  ;;  %v1132_v3 = vadd.f32 %v8455_v59, %v7931_v57  ;;  %v8456_v48 = vld [vmem:[#allocation42_spill] sm:$0xff] }
 0x369   :  { %2294 = vmatmul.mubr.f32.gmra.mrb[86].mxu1 %v1292_v32  ;;  %6097 = vmatprep.subr.bf16.mxu0 %v6096_v25  ;;  %v1835_v25 = vld [vmem:[#allocation11 + $0xfd8] sm:$0xff]  ;;  %v6110_v54 = vpack.c.bf16 %v1830_v28, %v1826_v43  ;;  %v1130_v24 = vadd.f32 %v8456_v48, %v7938_v18  ;;  %v8460_v43 = vld [vmem:[#allocation46_spill] sm:$0xff] }
 0x36a   :  { %2938 = vmatmul.mubr.f32.gmra.mrb[102].mxu0 %v1292_v32  ;;  %2299 = vmatprep.mubr.f32.mxu1 %v1301_v0  ;;  %v1325_v32 = vmax.f32 %v1037_v16, 0.0  ;;  %v6112_v61 = vpack.c.bf16 %v1839_v31, %v1835_v25  ;;  %v8462_v31 = vld [vmem:[#allocation48_spill] sm:$0xff] }
 0x36b   :  { %5843 = vmatpush1.bf16.msra.mxu1 %v5842_v36  ;;  %2943 = vmatprep.mubr.f32.mxu0 %v1301_v0  ;;  %v5856_v36 = vpack.c.bf16 %v1837_v47, %v1833_v14  ;;  %v1832_v0 = vld [vmem:[#allocation11 + $0xfc0] sm:$0xff] }
 0x36c   :  { %6099 = vmatpush1.bf16.msra.mxu0 %v6098_v19  ;;  %5845 = vmatprep.subr.bf16.mxu1 %v5844_v21  ;;  %v1834_v19 = vld [vmem:[#allocation11 + $0xfd0] sm:$0xff]  ;;  %v5858_v22 = vpack.c.bf16 %v1836_v17, %v1832_v0  ;;  %v8461_v14 = vld [vmem:[#allocation49_spill] sm:$0xff] }
 0x36d   :  { %2300 = vmatmul.mubr.f32.gmra.mrb[88].mxu1 %v1300_v30  ;;  %6101 = vmatprep.subr.bf16.mxu0 %v6100_v45  ;;  %v1838_v21 = vld [vmem:[#allocation11 + $0xff0] sm:$0xff]  ;;  %v1150_v47 = vadd.f32 %v8461_v14, %v7931_v57  ;;  %v8465_v0 = vld [vmem:[#allocation53_spill] sm:$0xff] }
 0x36e   :  { %2944 = vmatmul.mubr.f32.gmra.mrb[104].mxu0 %v1300_v30  ;;  %2305 = vmatprep.mubr.f32.mxu1 %v1309_v11  ;;  %v6114_v45 = vpack.c.bf16 %v1838_v21, %v1834_v19  ;;  %v8451_v30 = vld [vmem:[#allocation39_spill] sm:$0xff]  ;;  %v1162_v17 = vadd.f32 %v8465_v0, %v7931_v57  ;;  %v8466_v19 = vld [vmem:[#allocation52_spill] sm:$0xff] }
 0x36f   :  { %5847 = vmatpush1.bf16.msra.mxu1 %v5846_v55  ;;  %2949 = vmatprep.mubr.f32.mxu0 %v1309_v11  ;;  %v1120_v34 = vadd.f32 %v8451_v30, %v7931_v57  ;;  %v1214_v55 = vmax.f32 %v1112_v33, 0.0  ;;  %v8452_v11 = vld [vmem:[#allocation38_spill] sm:$0xff]  ;;  %v1263_v27 = vmax.f32 %v1150_v47, 0.0  ;;  %v1160_v21 = vadd.f32 %v8466_v19, %v7938_v18  ;;  %v8470_v33 = vld [vmem:[#allocation56_spill] sm:$0xff] }
 0x370   :  { %6103 = vmatpush1.bf16.msra.mxu0 %v6102_v20  ;;  %5849 = vmatprep.subr.bf16.mxu1 %v5848_v10  ;;  %v1118_v46 = vadd.f32 %v8452_v11, %v7938_v18  ;;  %v8453_v10 = vld [vmem:[#allocation41_spill] sm:$0xff] }
 0x371   :  { %2306 = vmatmul.mubr.f32.gmra.mrb[90].mxu1 %v1308_v26  ;;  %6105 = vmatprep.subr.bf16.mxu0 %v6104_v4  ;;  %v1223_v20 = vmax.f32 %v1120_v34, 0.0  ;;  %v1126_v62 = vadd.f32 %v8453_v10, %v7931_v57  ;;  %v1124_v4 = vadd.f32 %v8454_v56, %v7938_v18  ;;  %v1278_v15 = vmax.f32 %v1160_v21, 0.0  ;;  %v8471_v34 = vld [vmem:[#allocation59_spill] sm:$0xff] }
 0x372   :  { %2950 = vmatmul.mubr.f32.gmra.mrb[106].mxu0 %v1308_v26  ;;  %2311 = vmatprep.mubr.f32.mxu1 %v1317_v58  ;;  %v1222_v42 = vmax.f32 %v1118_v46, 0.0  ;;  %v1239_v26 = vmax.f32 %v1132_v3, 0.0  ;;  %v8472_v46 = vld [vmem:[#allocation58_spill] sm:$0xff]  ;;  %v8475_v3 = vld [vmem:[#allocation64_spill] sm:$0xff] }
 0x373   :  { %5851 = vmatpush1.bf16.msra.mxu1 %v5850_v50  ;;  %2955 = vmatprep.mubr.f32.mxu0 %v1317_v58  ;;  %v1231_v1 = vmax.f32 %v1126_v62, 0.0  ;;  %v1230_v39 = vmax.f32 %v1124_v4, 0.0  ;;  %v1238_v50 = vmax.f32 %v1130_v24, 0.0  ;;  %v8458_v58 = vld [vmem:[#allocation44_spill] sm:$0xff]  ;;  %v8473_v62 = vld [vmem:[#allocation61_spill] sm:$0xff]  ;;  %v8476_v24 = vld [vmem:[#allocation63_spill] sm:$0xff] }
 0x374   :  { %6107 = vmatpush1.bf16.msra.mxu0 %v6106_v60  ;;  %5853 = vmatprep.subr.bf16.mxu1 %v5852_v7  ;;  %v1136_v16 = vadd.f32 %v8458_v58, %v7938_v18  ;;  %v1247_v60 = vmax.f32 %v1138_v51, 0.0  ;;  %v8459_v7 = vld [vmem:[#allocation47_spill] sm:$0xff]  ;;  %v8474_v4 = vld [vmem:[#allocation60_spill] sm:$0xff]  ;;  %v1198_v51 = vadd.f32 %v7868_v37, %v7931_v57  ;;  %v1196_v58 = vadd.f32 %v7859_v49, %v7938_v18 }
 0x375   :  { %2312 = vmatmul.mubr.f32.gmra.mrb[92].mxu1 %v1316_v8  ;;  %6109 = vmatprep.subr.bf16.mxu0 %v6108_v29  ;;  %v1144_v53 = vadd.f32 %v8459_v7, %v7931_v57  ;;  %v1142_v29 = vadd.f32 %v8460_v43, %v7938_v18  ;;  %v8477_v7 = vmov 0.0  }
 0x376   :  { %2956 = vmatmul.mubr.f32.gmra.mrb[108].mxu0 %v1316_v8  ;;  %2317 = vmatprep.mubr.f32.mxu1 %v1325_v32  ;;  %v1246_v63 = vmax.f32 %v1136_v16, 0.0  ;;  %v1148_v8 = vadd.f32 %v8462_v31, %v7938_v18  ;;  %v1327_v16 = vmax.f32 %v1198_v51, 0.0 }
 0x377   :  { %5855 = vmatpush1.bf16.msra.mxu1 %v5854_v13  ;;  %2961 = vmatprep.mubr.f32.mxu0 %v1325_v32  ;;  %v1255_v28 = vmax.f32 %v1144_v53, 0.0  ;;  %v1254_v25 = vmax.f32 %v1142_v29, 0.0  ;;  %v8463_v13 = vld [vmem:[#allocation51_spill] sm:$0xff]  ;;  %v8464_v32 = vld [vmem:[#allocation50_spill] sm:$0xff] }
 0x378   :  { %6111 = vmatpush1.bf16.msra.mxu0 %v6110_v54  ;;  %5857 = vmatprep.subr.bf16.mxu1 %v5856_v36  ;;  %v1156_v52 = vadd.f32 %v8463_v13, %v7931_v57  ;;  %v1262_v2 = vmax.f32 %v1148_v8, 0.0  ;;  %v1154_v54 = vadd.f32 %v8464_v32, %v7938_v18 }
 0x379   :  { %2318 = vmatmul.mubr.f32.gmra.mrb[94].mxu1 %v1324_v44  ;;  %6113 = vmatprep.subr.bf16.mxu0 %v6112_v61 }
 0x37a   :  { %2962 = vmatmul.mubr.f32.gmra.mrb[110].mxu0 %v1324_v44  ;;  %2388 = vmatprep.mubr.f32.mxu1 %v1207_v6  ;;  %v1271_v36 = vmax.f32 %v1156_v52, 0.0  ;;  %v1270_v61 = vmax.f32 %v1154_v54, 0.0  ;;  %v1279_v44 = vmax.f32 %v1162_v17, 0.0 }
 0x37b   :  { %5859 = vmatpush1.bf16.msra.mxu1 %v5858_v22  ;;  %3032 = vmatprep.mubr.f32.mxu0 %v1207_v6  ;;  %v8467_v22 = vld [vmem:[#allocation55_spill] sm:$0xff]  ;;  %v8468_v6 = vld [vmem:[#allocation54_spill] sm:$0xff] }
 0x37c   :  { %6115 = vmatpush1.bf16.msra.mxu0 %v6114_v45  ;;  %v1168_v41 = vadd.f32 %v8467_v22, %v7931_v57  ;;  %v1166_v45 = vadd.f32 %v8468_v6, %v7938_v18 }
 0x37e   :  { %2389 = vmatmul.mubr.f32.vlgmr.msra.gmra.mrb[64].mxu1 %v1206_v35  ;;  %v1287_v5 = vmax.f32 %v1168_v41, 0.0  ;;  %v1286_v38 = vmax.f32 %v1166_v45, 0.0 }
 0x37f   :  { %3033 = vmatmul.mubr.f32.vlgmr.msra.gmra.mrb[80].mxu0 %v1206_v35  ;;  %2394 = vmatprep.mubr.f32.mxu1 %v1215_v23  ;;  %v1174_v35 = vadd.f32 %v8469_v12, %v7931_v57 }
 0x380   :  { %3038 = vmatprep.mubr.f32.mxu0 %v1215_v23  ;;  %v1172_v23 = vadd.f32 %v8470_v33, %v7938_v18 }
 0x381   :  { %v1295_v30 = vmax.f32 %v1174_v35, 0.0 }
 0x382   :  { %2395 = vmatmul.mubr.f32.gmra.mrb[66].mxu1 %v1214_v55  ;;  %v1294_v11 = vmax.f32 %v1172_v23, 0.0 }
 0x383   :  { %3039 = vmatmul.mubr.f32.gmra.mrb[82].mxu0 %v1214_v55  ;;  %2400 = vmatprep.mubr.f32.mxu1 %v1223_v20  ;;  %v1180_v55 = vadd.f32 %v8471_v34, %v7931_v57 }
 0x384   :  { %3044 = vmatprep.mubr.f32.mxu0 %v1223_v20  ;;  %v1178_v20 = vadd.f32 %v8472_v46, %v7938_v18 }
 0x385   :  { %v1303_v10 = vmax.f32 %v1180_v55, 0.0 }
 0x386   :  { %2401 = vmatmul.mubr.f32.gmra.mrb[68].mxu1 %v1222_v42  ;;  %v1302_v56 = vmax.f32 %v1178_v20, 0.0 }
 0x387   :  { %3045 = vmatmul.mubr.f32.gmra.mrb[84].mxu0 %v1222_v42  ;;  %2406 = vmatprep.mubr.f32.mxu1 %v1231_v1  ;;  %v1186_v42 = vadd.f32 %v8473_v62, %v7931_v57 }
 0x388   :  { %3050 = vmatprep.mubr.f32.mxu0 %v1231_v1  ;;  %v1184_v1 = vadd.f32 %v8474_v4, %v7938_v18 }
 0x389   :  { %v1311_v59 = vmax.f32 %v1186_v42, 0.0 }
 0x38a   :  { %2407 = vmatmul.mubr.f32.gmra.mrb[70].mxu1 %v1230_v39  ;;  %v1310_v48 = vmax.f32 %v1184_v1, 0.0 }
 0x38b   :  { %3051 = vmatmul.mubr.f32.gmra.mrb[86].mxu0 %v1230_v39  ;;  %2412 = vmatprep.mubr.f32.mxu1 %v1239_v26  ;;  %v1192_v39 = vadd.f32 %v8475_v3, %v7931_v57 }
 0x38c   :  { %3056 = vmatprep.mubr.f32.mxu0 %v1239_v26  ;;  %v1190_v26 = vadd.f32 %v8476_v24, %v7938_v18 }
 0x38d   :  { %v1319_v9 = vmax.f32 %v1192_v39, 0.0 }
 0x38e   :  { %2413 = vmatmul.mubr.f32.gmra.mrb[72].mxu1 %v1238_v50 }
 0x38f   :  { %3057 = vmatmul.mubr.f32.gmra.mrb[88].mxu0 %v1238_v50  ;;  %2418 = vmatprep.mubr.f32.mxu1 %v1247_v60  ;;  %v1318_v50 = vmax.f32 %v1190_v26, 0.0 }
 0x390   :  { %3062 = vmatprep.mubr.f32.mxu0 %v1247_v60  ;;  %v1326_v60 = vmax.f32 %v1196_v58, 0.0 }
 0x392   :  { %2419 = vmatmul.mubr.f32.gmra.mrb[74].mxu1 %v1246_v63 }
 0x393   :  { %3063 = vmatmul.mubr.f32.gmra.mrb[90].mxu0 %v1246_v63  ;;  %2424 = vmatprep.mubr.f32.mxu1 %v1255_v28 }
 0x394   :  { %3068 = vmatprep.mubr.f32.mxu0 %v1255_v28 }
 0x396   :  { %2425 = vmatmul.mubr.f32.gmra.mrb[76].mxu1 %v1254_v25 }
 0x397   :  { %3069 = vmatmul.mubr.f32.gmra.mrb[92].mxu0 %v1254_v25  ;;  %2430 = vmatprep.mubr.f32.mxu1 %v1263_v27 }
 0x398   :  { %3074 = vmatprep.mubr.f32.mxu0 %v1263_v27 }
 0x39a   :  { %2431 = vmatmul.mubr.f32.gmra.mrb[78].mxu1 %v1262_v2 }
 0x39b   :  { %3075 = vmatmul.mubr.f32.gmra.mrb[94].mxu0 %v1262_v2  ;;  %2436 = vmatprep.mubr.f32.mxu1 %v1271_v36 }
 0x39c   :  { %3080 = vmatprep.mubr.f32.mxu0 %v1271_v36 }
 0x39e   :  { %2437 = vmatmul.mubr.f32.gmra.mrb[80].mxu1 %v1270_v61 }
 0x39f   :  { %3081 = vmatmul.mubr.f32.gmra.mrb[96].mxu0 %v1270_v61  ;;  %2442 = vmatprep.mubr.f32.mxu1 %v1279_v44 }
 0x3a0   :  { %3086 = vmatprep.mubr.f32.mxu0 %v1279_v44 }
 0x3a2   :  { %2443 = vmatmul.mubr.f32.gmra.mrb[82].mxu1 %v1278_v15 }
 0x3a3   :  { %3087 = vmatmul.mubr.f32.gmra.mrb[98].mxu0 %v1278_v15  ;;  %2448 = vmatprep.mubr.f32.mxu1 %v1287_v5 }
 0x3a4   :  { %3092 = vmatprep.mubr.f32.mxu0 %v1287_v5 }
 0x3a6   :  { %2449 = vmatmul.mubr.f32.gmra.mrb[84].mxu1 %v1286_v38 }
 0x3a7   :  { %3093 = vmatmul.mubr.f32.gmra.mrb[100].mxu0 %v1286_v38  ;;  %2454 = vmatprep.mubr.f32.mxu1 %v1295_v30 }
 0x3a8   :  { %3098 = vmatprep.mubr.f32.mxu0 %v1295_v30 }
 0x3aa   :  { %2455 = vmatmul.mubr.f32.gmra.mrb[86].mxu1 %v1294_v11 }
 0x3ab   :  { %3099 = vmatmul.mubr.f32.gmra.mrb[102].mxu0 %v1294_v11  ;;  %2460 = vmatprep.mubr.f32.mxu1 %v1303_v10 }
 0x3ac   :  { %3104 = vmatprep.mubr.f32.mxu0 %v1303_v10 }
 0x3ae   :  { %2461 = vmatmul.mubr.f32.gmra.mrb[88].mxu1 %v1302_v56 }
 0x3af   :  { %3105 = vmatmul.mubr.f32.gmra.mrb[104].mxu0 %v1302_v56  ;;  %2466 = vmatprep.mubr.f32.mxu1 %v1311_v59 }
 0x3b0   :  { %3110 = vmatprep.mubr.f32.mxu0 %v1311_v59 }
 0x3b2   :  { %2467 = vmatmul.mubr.f32.gmra.mrb[90].mxu1 %v1310_v48 }
 0x3b3   :  { %3111 = vmatmul.mubr.f32.gmra.mrb[106].mxu0 %v1310_v48  ;;  %2472 = vmatprep.mubr.f32.mxu1 %v1319_v9 }
 0x3b4   :  { %3116 = vmatprep.mubr.f32.mxu0 %v1319_v9 }
 0x3b6   :  { %2473 = vmatmul.mubr.f32.gmra.mrb[92].mxu1 %v1318_v50 }
 0x3b7   :  { %3117 = vmatmul.mubr.f32.gmra.mrb[108].mxu0 %v1318_v50  ;;  %2478 = vmatprep.mubr.f32.mxu1 %v1327_v16 }
 0x3b8   :  { %3122 = vmatprep.mubr.f32.mxu0 %v1327_v16 }
 0x3ba   :  { %2479 = vmatmul.mubr.f32.gmra.mrb[94].mxu1 %v1326_v60 }
 0x3bb   :  { %3123 = vmatmul.mubr.f32.gmra.mrb[110].mxu0 %v1326_v60  ;;  %3214 = vmatprep.mubr.f32.mxu1 %v8477_v7 }
 0x3bc   :  { %3375 = vmatprep.mubr.f32.mxu0 %v8477_v7 }
 0x451   :  { %v2390_v37 = vpop.f32.mrb[64].mxu1 }
 0x452   :  { %v3034_v57 = vpop.f32.mrb[80].mxu0  ;;  %v2392_v53 = vpop.f32.mrb[65].mxu1 }
 0x453   :  { %v3036_v63 = vpop.f32.mrb[81].mxu0 }
 0x455   :  { %v2396_v43 = vpop.f32.mrb[66].mxu1 }
 0x456   :  { %v6118_v29 = vpack.c.bf16 %v2396_v43, %v2390_v37  ;;  %v3040_v49 = vpop.f32.mrb[82].mxu0  ;;  %v2398_v18 = vpop.f32.mrb[67].mxu1 }
 0x457   :  { %v6150_v28 = vpack.c.bf16 %v3040_v49, %v3034_v57  ;;  %v6116_v14 = vpack.c.bf16 %v2398_v18, %v2392_v53  ;;  %v3042_v47 = vpop.f32.mrb[83].mxu0 }
 0x458   :  { %v6148_v25 = vpack.c.bf16 %v3042_v47, %v3036_v63 }
 0x459   :  { %v2402_v31 = vpop.f32.mrb[68].mxu1  ;;  %6117 = vmatprep.subr.bf16.mxu1 %v6116_v14 }
 0x45a   :  { %v3046_v8 = vpop.f32.mrb[84].mxu0  ;;  %6149 = vmatprep.subr.bf16.mxu0 %v6148_v25  ;;  %v2404_v27 = vpop.f32.mrb[69].mxu1  ;;  %6119 = vmatpush1.bf16.msra.mxu1 %v6118_v29 }
 0x45b   :  { %v3048_v13 = vpop.f32.mrb[85].mxu0  ;;  %6151 = vmatpush1.bf16.msra.mxu0 %v6150_v28 }
 0x45d   :  { %v2408_v52 = vpop.f32.mrb[70].mxu1 }
 0x45e   :  { %v6122_v2 = vpack.c.bf16 %v2408_v52, %v2402_v31  ;;  %v3052_v32 = vpop.f32.mrb[86].mxu0  ;;  %v2410_v54 = vpop.f32.mrb[71].mxu1 }
 0x45f   :  { %v6154_v36 = vpack.c.bf16 %v3052_v32, %v3046_v8  ;;  %v6120_v0 = vpack.c.bf16 %v2410_v54, %v2404_v27  ;;  %v3054_v17 = vpop.f32.mrb[87].mxu0 }
 0x460   :  { %v6152_v61 = vpack.c.bf16 %v3054_v17, %v3048_v13 }
 0x461   :  { %v2414_v19 = vpop.f32.mrb[72].mxu1  ;;  %6121 = vmatprep.subr.bf16.mxu1 %v6120_v0 }
 0x462   :  { %v3058_v21 = vpop.f32.mrb[88].mxu0  ;;  %6153 = vmatprep.subr.bf16.mxu0 %v6152_v61  ;;  %v2416_v44 = vpop.f32.mrb[73].mxu1  ;;  %6123 = vmatpush1.bf16.msra.mxu1 %v6122_v2 }
 0x463   :  { %v3060_v22 = vpop.f32.mrb[89].mxu0  ;;  %6155 = vmatpush1.bf16.msra.mxu0 %v6154_v36 }
 0x465   :  { %v2420_v41 = vpop.f32.mrb[74].mxu1 }
 0x466   :  { %v6126_v15 = vpack.c.bf16 %v2420_v41, %v2414_v19  ;;  %v3064_v6 = vpop.f32.mrb[90].mxu0  ;;  %v2422_v45 = vpop.f32.mrb[75].mxu1 }
 0x467   :  { %v6158_v5 = vpack.c.bf16 %v3064_v6, %v3058_v21  ;;  %v6124_v12 = vpack.c.bf16 %v2422_v45, %v2416_v44  ;;  %v3066_v35 = vpop.f32.mrb[91].mxu0  ;;  %v3537_v44 = vld [vmem:[#allocation14 + $0x8] sm:$0xff] }
 0x468   :  { %v6156_v38 = vpack.c.bf16 %v3066_v35, %v3060_v22  ;;  %v3539_v22 = vld [vmem:[#allocation14 + $0x18] sm:$0xff] }
 0x469   :  { %v2426_v33 = vpop.f32.mrb[76].mxu1  ;;  %6125 = vmatprep.subr.bf16.mxu1 %v6124_v12 }
 0x46a   :  { %v3070_v23 = vpop.f32.mrb[92].mxu0  ;;  %6157 = vmatprep.subr.bf16.mxu0 %v6156_v38  ;;  %v2428_v30 = vpop.f32.mrb[77].mxu1  ;;  %6127 = vmatpush1.bf16.msra.mxu1 %v6126_v15  ;;  %v6180_v38 = vpack.c.bf16 %v3539_v22, %v3537_v44  ;;  %v3569_v44 = vld [vmem:[#allocation14 + $0x108] sm:$0xff]  ;;  %v3571_v22 = vld [vmem:[#allocation14 + $0x118] sm:$0xff] }
 0x46b   :  { %v3072_v34 = vpop.f32.mrb[93].mxu0  ;;  %6159 = vmatpush1.bf16.msra.mxu0 %v6158_v5 }
 0x46d   :  { %v2432_v55 = vpop.f32.mrb[78].mxu1 }
 0x46e   :  { %v6130_v11 = vpack.c.bf16 %v2432_v55, %v2426_v33  ;;  %v3076_v46 = vpop.f32.mrb[94].mxu0  ;;  %v2434_v20 = vpop.f32.mrb[79].mxu1  ;;  %v3543_v55 = vld [vmem:[#allocation14 + $0x38] sm:$0xff] }
 0x46f   :  { %v6162_v10 = vpack.c.bf16 %v3076_v46, %v3070_v23  ;;  %v6128_v62 = vpack.c.bf16 %v2434_v20, %v2428_v30  ;;  %v3078_v42 = vpop.f32.mrb[95].mxu0  ;;  %v3536_v23 = vld [vmem:[#allocation14] sm:$0xff]  ;;  %v3538_v30 = vld [vmem:[#allocation14 + $0x10] sm:$0xff] }
 0x470   :  { %v6160_v56 = vpack.c.bf16 %v3078_v42, %v3072_v34  ;;  %v3541_v34 = vld [vmem:[#allocation14 + $0x28] sm:$0xff]  ;;  %v3540_v20 = vld [vmem:[#allocation14 + $0x20] sm:$0xff] }
 0x471   :  { %v2438_v4 = vpop.f32.mrb[80].mxu1  ;;  %6129 = vmatprep.subr.bf16.mxu1 %v6128_v62  ;;  %v6184_v46 = vpack.c.bf16 %v3543_v55, %v3541_v34  ;;  %v6742_v62 = vld [vmem:[#allocation2] sm:$0xff] }
 0x472   :  { %v3082_v1 = vpop.f32.mrb[96].mxu0  ;;  %6161 = vmatprep.subr.bf16.mxu0 %v6160_v56  ;;  %v2440_v59 = vpop.f32.mrb[81].mxu1  ;;  %6131 = vmatpush1.bf16.msra.mxu1 %v6130_v11  ;;  %v6182_v11 = vpack.c.bf16 %v3538_v30, %v3536_v23  ;;  %v3545_v42 = vld [vmem:[#allocation14 + $0x48] sm:$0xff]  ;;  %v3547_v56 = vld [vmem:[#allocation14 + $0x58] sm:$0xff]  ;;  %v3572_v23 = vld [vmem:[#allocation14 + $0x120] sm:$0xff] }
 0x473   :  { %v3084_v3 = vpop.f32.mrb[97].mxu0  ;;  %6163 = vmatpush1.bf16.msra.mxu0 %v6162_v10  ;;  %v3542_v10 = vld [vmem:[#allocation14 + $0x30] sm:$0xff]  ;;  %v3577_v55 = vld [vmem:[#allocation14 + $0x148] sm:$0xff] }
 0x474   :  { %v3574_v30 = vld [vmem:[#allocation14 + $0x130] sm:$0xff] }
 0x475   :  { %v2444_v39 = vpop.f32.mrb[82].mxu1  ;;  %v6750_v34 = vld [vmem:[#allocation2 + $0x40] sm:$0xff] }
 0x476   :  { %v6134_v48 = vpack.c.bf16 %v2444_v39, %v2438_v4  ;;  %v3088_v24 = vpop.f32.mrb[98].mxu0  ;;  %v2446_v26 = vpop.f32.mrb[83].mxu1  ;;  %v6186_v4 = vpack.c.bf16 %v3542_v10, %v3540_v20  ;;  %v6743_v39 = vld [vmem:[#allocation2 + $0x8] sm:$0xff]  ;;  %v3576_v10 = vld [vmem:[#allocation14 + $0x140] sm:$0xff] }
 0x477   :  { %v6166_v9 = vpack.c.bf16 %v3088_v24, %v3082_v1  ;;  %v6132_v51 = vpack.c.bf16 %v2446_v26, %v2440_v59  ;;  %v3090_v50 = vpop.f32.mrb[99].mxu0  ;;  %v6188_v1 = vpack.c.bf16 %v3547_v56, %v3545_v42  ;;  %v3544_v59 = vld [vmem:[#allocation14 + $0x40] sm:$0xff]  ;;  %v3551_v24 = vld [vmem:[#allocation14 + $0x78] sm:$0xff]  ;;  %v3581_v56 = vld [vmem:[#allocation14 + $0x168] sm:$0xff] }
 0x478   :  { %v6164_v58 = vpack.c.bf16 %v3090_v50, %v3084_v3  ;;  %v3546_v3 = vld [vmem:[#allocation14 + $0x50] sm:$0xff] }
 0x479   :  { %v2450_v16 = vpop.f32.mrb[84].mxu1  ;;  %6133 = vmatprep.subr.bf16.mxu1 %v6132_v51  ;;  %v6190_v26 = vpack.c.bf16 %v3546_v3, %v3544_v59  ;;  %v3548_v51 = vld [vmem:[#allocation14 + $0x60] sm:$0xff]  ;;  %v3550_v50 = vld [vmem:[#allocation14 + $0x70] sm:$0xff] }
 0x47a   :  { %v3094_v60 = vpop.f32.mrb[100].mxu0  ;;  %6165 = vmatprep.subr.bf16.mxu0 %v6164_v58  ;;  %v2452_v37 = vpop.f32.mrb[85].mxu1  ;;  %6135 = vmatpush1.bf16.msra.mxu1 %v6134_v48  ;;  %v3549_v48 = vld [vmem:[#allocation14 + $0x68] sm:$0xff]  ;;  %v6744_v58 = vld [vmem:[#allocation2 + $0x10] sm:$0xff]  ;;  %v6751_v42 = vld [vmem:[#allocation2 + $0x48] sm:$0xff] }
 0x47b   :  { %v3096_v57 = vpop.f32.mrb[101].mxu0  ;;  %6167 = vmatpush1.bf16.msra.mxu0 %v6166_v9  ;;  %v6192_v9 = vpack.c.bf16 %v3551_v24, %v3549_v48  ;;  %v3580_v3 = vld [vmem:[#allocation14 + $0x160] sm:$0xff]  ;;  %v3585_v24 = vld [vmem:[#allocation14 + $0x188] sm:$0xff] }
 0x47c   :  { %v6752_v48 = vld [vmem:[#allocation2 + $0x50] sm:$0xff] }
 0x47d   :  { %v2456_v53 = vpop.f32.mrb[86].mxu1 }
 0x47e   :  { %v6138_v63 = vpack.c.bf16 %v2456_v53, %v2450_v16  ;;  %v3100_v43 = vpop.f32.mrb[102].mxu0  ;;  %v2458_v29 = vpop.f32.mrb[87].mxu1  ;;  %v3553_v16 = vld [vmem:[#allocation14 + $0x88] sm:$0xff]  ;;  %v3552_v53 = vld [vmem:[#allocation14 + $0x80] sm:$0xff] }
 0x47f   :  { %v6170_v49 = vpack.c.bf16 %v3100_v43, %v3094_v60  ;;  %v6136_v18 = vpack.c.bf16 %v2458_v29, %v2452_v37  ;;  %v3102_v28 = vpop.f32.mrb[103].mxu0  ;;  %v3555_v60 = vld [vmem:[#allocation14 + $0x98] sm:$0xff]  ;;  %v6194_v37 = vpack.c.bf16 %v3550_v50, %v3548_v51  ;;  %v6745_v43 = vld [vmem:[#allocation2 + $0x18] sm:$0xff] }
 0x480   :  { %v6168_v14 = vpack.c.bf16 %v3102_v28, %v3096_v57  ;;  %v6196_v57 = vpack.c.bf16 %v3555_v60, %v3553_v16  ;;  %v3557_v29 = vld [vmem:[#allocation14 + $0xa8] sm:$0xff]  ;;  %v3584_v50 = vld [vmem:[#allocation14 + $0x180] sm:$0xff] }
 0x481   :  { %v2462_v47 = vpop.f32.mrb[88].mxu1  ;;  %6137 = vmatprep.subr.bf16.mxu1 %v6136_v18  ;;  %v6753_v16 = vld [vmem:[#allocation2 + $0x58] sm:$0xff] }
 0x482   :  { %v3106_v25 = vpop.f32.mrb[104].mxu0  ;;  %6169 = vmatprep.subr.bf16.mxu0 %v6168_v14  ;;  %v2464_v31 = vpop.f32.mrb[89].mxu1  ;;  %6139 = vmatpush1.bf16.msra.mxu1 %v6138_v63  ;;  %v3554_v63 = vld [vmem:[#allocation14 + $0x90] sm:$0xff]  ;;  %v3556_v14 = vld [vmem:[#allocation14 + $0xa0] sm:$0xff]  ;;  %v3589_v60 = vld [vmem:[#allocation14 + $0x1a8] sm:$0xff] }
 0x483   :  { %v3108_v8 = vpop.f32.mrb[105].mxu0  ;;  %6171 = vmatpush1.bf16.msra.mxu0 %v6170_v49  ;;  %v3559_v49 = vld [vmem:[#allocation14 + $0xb8] sm:$0xff]  ;;  %v6198_v18 = vpack.c.bf16 %v3554_v63, %v3552_v53  ;;  %v3588_v63 = vld [vmem:[#allocation14 + $0x1a0] sm:$0xff] }
 0x484   :  { %v6200_v28 = vpack.c.bf16 %v3559_v49, %v3557_v29  ;;  %v6754_v29 = vld [vmem:[#allocation2 + $0x60] sm:$0xff] }
 0x485   :  { %v2468_v27 = vpop.f32.mrb[90].mxu1  ;;  %v3593_v49 = vld [vmem:[#allocation14 + $0x1c8] sm:$0xff] }
 0x486   :  { %v6142_v13 = vpack.c.bf16 %v2468_v27, %v2462_v47  ;;  %v3112_v52 = vpop.f32.mrb[106].mxu0  ;;  %v2470_v2 = vpop.f32.mrb[91].mxu1  ;;  %v3558_v47 = vld [vmem:[#allocation14 + $0xb0] sm:$0xff] }
 0x487   :  { %v6174_v32 = vpack.c.bf16 %v3112_v52, %v3106_v25  ;;  %v6140_v54 = vpack.c.bf16 %v2470_v2, %v2464_v31  ;;  %v3114_v36 = vpop.f32.mrb[107].mxu0  ;;  %v6746_v25 = vld [vmem:[#allocation2 + $0x20] sm:$0xff]  ;;  %v6202_v27 = vpack.c.bf16 %v3558_v47, %v3556_v14  ;;  %v3560_v52 = vld [vmem:[#allocation14 + $0xc0] sm:$0xff]  ;;  %v6755_v47 = vld [vmem:[#allocation2 + $0x68] sm:$0xff] }
 0x488   :  { %v6172_v0 = vpack.c.bf16 %v3114_v36, %v3108_v8  ;;  %v3561_v31 = vld [vmem:[#allocation14 + $0xc8] sm:$0xff]  ;;  %v3563_v8 = vld [vmem:[#allocation14 + $0xd8] sm:$0xff]  ;;  %v3562_v2 = vld [vmem:[#allocation14 + $0xd0] sm:$0xff] }
 0x489   :  { %v2474_v17 = vpop.f32.mrb[92].mxu1  ;;  %6141 = vmatprep.subr.bf16.mxu1 %v6140_v54  ;;  %v3565_v54 = vld [vmem:[#allocation14 + $0xe8] sm:$0xff]  ;;  %v3567_v36 = vld [vmem:[#allocation14 + $0xf8] sm:$0xff] }
 0x48a   :  { %v3118_v61 = vpop.f32.mrb[108].mxu0  ;;  %6173 = vmatprep.subr.bf16.mxu0 %v6172_v0  ;;  %v2476_v19 = vpop.f32.mrb[93].mxu1  ;;  %6143 = vmatpush1.bf16.msra.mxu1 %v6142_v13  ;;  %v6204_v13 = vpack.c.bf16 %v3563_v8, %v3561_v31  ;;  %v6206_v0 = vpack.c.bf16 %v3562_v2, %v3560_v52  ;;  %v6757_v31 = vld [vmem:[#allocation2 + $0x78] sm:$0xff]  ;;  %v3599_v2 = vld [vmem:[#allocation14 + $0x1f8] sm:$0xff] }
 0x48b   :  { %v3120_v21 = vpop.f32.mrb[109].mxu0  ;;  %6175 = vmatpush1.bf16.msra.mxu0 %v6174_v32  ;;  %v6747_v32 = vld [vmem:[#allocation2 + $0x28] sm:$0xff]  ;;  %v3592_v8 = vld [vmem:[#allocation14 + $0x1c0] sm:$0xff]  ;;  %v3597_v52 = vld [vmem:[#allocation14 + $0x1e8] sm:$0xff] }
 0x48d   :  { %v2480_v41 = vpop.f32.mrb[94].mxu1 }
 0x48e   :  { %v6146_v15 = vpack.c.bf16 %v2480_v41, %v2474_v17  ;;  %v3124_v6 = vpop.f32.mrb[110].mxu0  ;;  %v2482_v45 = vpop.f32.mrb[95].mxu1  ;;  %v6208_v17 = vpack.c.bf16 %v3567_v36, %v3565_v54  ;;  %v3596_v54 = vld [vmem:[#allocation14 + $0x1e0] sm:$0xff]  ;;  %v3598_v36 = vld [vmem:[#allocation14 + $0x1f0] sm:$0xff] }
 0x48f   :  { %v6178_v5 = vpack.c.bf16 %v3124_v6, %v3118_v61  ;;  %v6144_v12 = vpack.c.bf16 %v2482_v45, %v2476_v19  ;;  %v3126_v35 = vpop.f32.mrb[111].mxu0  ;;  %v3564_v61 = vld [vmem:[#allocation14 + $0xe0] sm:$0xff]  ;;  %v3566_v19 = vld [vmem:[#allocation14 + $0xf0] sm:$0xff] }
 0x490   :  { %v6176_v33 = vpack.c.bf16 %v3126_v35, %v3120_v21  ;;  %v6748_v21 = vld [vmem:[#allocation2 + $0x30] sm:$0xff]  ;;  %v6210_v41 = vpack.c.bf16 %v3566_v19, %v3564_v61  ;;  %v3570_v45 = vld [vmem:[#allocation14 + $0x110] sm:$0xff] }
 0x491   :  { %6145 = vmatprep.subr.bf16.mxu1 %v6144_v12  ;;  %v3568_v6 = vld [vmem:[#allocation14 + $0x100] sm:$0xff]  ;;  %v3573_v12 = vld [vmem:[#allocation14 + $0x128] sm:$0xff]  ;;  %v3575_v35 = vld [vmem:[#allocation14 + $0x138] sm:$0xff] }
 0x492   :  { %6177 = vmatprep.subr.bf16.mxu0 %v6176_v33  ;;  %6147 = vmatpush1.bf16.msra.mxu1 %v6146_v15  ;;  %v6212_v15 = vpack.c.bf16 %v3571_v22, %v3569_v44  ;;  %v6216_v33 = vpack.c.bf16 %v3575_v35, %v3573_v12  ;;  %v3603_v61 = vld [vmem:[#allocation14 + $0x218] sm:$0xff]  ;;  %v8478_v44 = vld [vmem:[#allocation32_spill] sm:$0xff]  ;;  %v3600_v12 = vld [vmem:[#allocation14 + $0x200] sm:$0xff] }
 0x493   :  { %6179 = vmatpush1.bf16.msra.mxu0 %v6178_v5  ;;  %6181 = vmatprep.subr.bf16.mxu1 %v6180_v38  ;;  %v6749_v5 = vld [vmem:[#allocation2 + $0x38] sm:$0xff]  ;;  %v6214_v38 = vpack.c.bf16 %v3570_v45, %v3568_v6  ;;  %v3602_v35 = vld [vmem:[#allocation14 + $0x210] sm:$0xff] }
 0x495   :  { %3215 = vmatmul.mubr.f32.vlgmr.msra.gmra.mrb[96].mxu1 %v6742_v62 }
 0x496   :  { %3220 = vmatprep.mubr.f32.mxu1 %v8477_v7  ;;  %3376 = vmatmul.mubr.f32.vlgmr.msra.gmra.mrb[112].mxu0 %v6742_v62  ;;  %v3578_v62 = vld [vmem:[#allocation14 + $0x150] sm:$0xff] }
 0x497   :  { %3381 = vmatprep.mubr.f32.mxu0 %v8477_v7  ;;  %6183 = vmatpush1.bf16.msra.mxu1 %v6182_v11  ;;  %v3579_v11 = vld [vmem:[#allocation14 + $0x158] sm:$0xff] }
 0x498   :  { %6185 = vmatprep.subr.bf16.mxu1 %v6184_v46  ;;  %v6218_v46 = vpack.c.bf16 %v3574_v30, %v3572_v23  ;;  %v6220_v20 = vpack.c.bf16 %v3579_v11, %v3577_v55  ;;  %v3605_v23 = vld [vmem:[#allocation14 + $0x228] sm:$0xff]  ;;  %v3607_v30 = vld [vmem:[#allocation14 + $0x238] sm:$0xff] }
 0x499   :  { %3221 = vmatmul.mubr.f32.gmra.mrb[98].mxu1 %v6743_v39 }
 0x49a   :  { %3226 = vmatprep.mubr.f32.mxu1 %v8477_v7  ;;  %3382 = vmatmul.mubr.f32.gmra.mrb[114].mxu0 %v6743_v39  ;;  %v3582_v39 = vld [vmem:[#allocation14 + $0x170] sm:$0xff] }
 0x49b   :  { %3387 = vmatprep.mubr.f32.mxu0 %v8477_v7  ;;  %6187 = vmatpush1.bf16.msra.mxu1 %v6186_v4  ;;  %v3583_v4 = vld [vmem:[#allocation14 + $0x178] sm:$0xff] }
 0x49c   :  { %6189 = vmatprep.subr.bf16.mxu1 %v6188_v1  ;;  %v6222_v1 = vpack.c.bf16 %v3578_v62, %v3576_v10  ;;  %v6224_v59 = vpack.c.bf16 %v3583_v4, %v3581_v56  ;;  %v3604_v56 = vld [vmem:[#allocation14 + $0x220] sm:$0xff]  ;;  %v3606_v4 = vld [vmem:[#allocation14 + $0x230] sm:$0xff] }
 0x49d   :  { %3227 = vmatmul.mubr.f32.gmra.mrb[100].mxu1 %v6744_v58 }
 0x49e   :  { %3232 = vmatprep.mubr.f32.mxu1 %v8477_v7  ;;  %3388 = vmatmul.mubr.f32.gmra.mrb[116].mxu0 %v6744_v58  ;;  %v3586_v58 = vld [vmem:[#allocation14 + $0x190] sm:$0xff] }
 0x49f   :  { %3393 = vmatprep.mubr.f32.mxu0 %v8477_v7  ;;  %6191 = vmatpush1.bf16.msra.mxu1 %v6190_v26  ;;  %v3587_v26 = vld [vmem:[#allocation14 + $0x198] sm:$0xff] }
 0x4a0   :  { %6193 = vmatprep.subr.bf16.mxu1 %v6192_v9  ;;  %v6226_v9 = vpack.c.bf16 %v3582_v39, %v3580_v3  ;;  %v6228_v51 = vpack.c.bf16 %v3587_v26, %v3585_v24  ;;  %v3609_v3 = vld [vmem:[#allocation14 + $0x248] sm:$0xff]  ;;  %v3611_v39 = vld [vmem:[#allocation14 + $0x258] sm:$0xff] }
 0x4a1   :  { %3233 = vmatmul.mubr.f32.gmra.mrb[102].mxu1 %v6745_v43 }
 0x4a2   :  { %3238 = vmatprep.mubr.f32.mxu1 %v8477_v7  ;;  %3394 = vmatmul.mubr.f32.gmra.mrb[118].mxu0 %v6745_v43  ;;  %v3590_v43 = vld [vmem:[#allocation14 + $0x1b0] sm:$0xff] }
 0x4a3   :  { %3399 = vmatprep.mubr.f32.mxu0 %v8477_v7  ;;  %6195 = vmatpush1.bf16.msra.mxu1 %v6194_v37  ;;  %v3591_v37 = vld [vmem:[#allocation14 + $0x1b8] sm:$0xff] }
 0x4a4   :  { %6197 = vmatprep.subr.bf16.mxu1 %v6196_v57  ;;  %v6230_v57 = vpack.c.bf16 %v3586_v58, %v3584_v50  ;;  %v6232_v53 = vpack.c.bf16 %v3591_v37, %v3589_v60  ;;  %v3608_v60 = vld [vmem:[#allocation14 + $0x240] sm:$0xff]  ;;  %v3610_v37 = vld [vmem:[#allocation14 + $0x250] sm:$0xff] }
 0x4a5   :  { %3239 = vmatmul.mubr.f32.gmra.mrb[104].mxu1 %v6746_v25 }
 0x4a6   :  { %3244 = vmatprep.mubr.f32.mxu1 %v8477_v7  ;;  %3400 = vmatmul.mubr.f32.gmra.mrb[120].mxu0 %v6746_v25  ;;  %v6756_v25 = vld [vmem:[#allocation2 + $0x70] sm:$0xff] }
 0x4a7   :  { %3405 = vmatprep.mubr.f32.mxu0 %v8477_v7  ;;  %6199 = vmatpush1.bf16.msra.mxu1 %v6198_v18  ;;  %v3595_v18 = vld [vmem:[#allocation14 + $0x1d8] sm:$0xff] }
 0x4a8   :  { %6201 = vmatprep.subr.bf16.mxu1 %v6200_v28  ;;  %v6234_v28 = vpack.c.bf16 %v3590_v43, %v3588_v63  ;;  %v6236_v14 = vpack.c.bf16 %v3595_v18, %v3593_v49  ;;  %v3613_v63 = vld [vmem:[#allocation14 + $0x268] sm:$0xff]  ;;  %v3615_v43 = vld [vmem:[#allocation14 + $0x278] sm:$0xff] }
 0x4a9   :  { %3245 = vmatmul.mubr.f32.gmra.mrb[106].mxu1 %v6747_v32 }
 0x4aa   :  { %3250 = vmatprep.mubr.f32.mxu1 %v8477_v7  ;;  %3406 = vmatmul.mubr.f32.gmra.mrb[122].mxu0 %v6747_v32  ;;  %v6240_v32 = vpack.c.bf16 %v3599_v2, %v3597_v52  ;;  %v3617_v2 = vld [vmem:[#allocation14 + $0x288] sm:$0xff] }
 0x4ab   :  { %3411 = vmatprep.mubr.f32.mxu0 %v8477_v7  ;;  %6203 = vmatpush1.bf16.msra.mxu1 %v6202_v27  ;;  %v3594_v27 = vld [vmem:[#allocation14 + $0x1d0] sm:$0xff] }
 0x4ac   :  { %6205 = vmatprep.subr.bf16.mxu1 %v6204_v13  ;;  %v6238_v13 = vpack.c.bf16 %v3594_v27, %v3592_v8  ;;  %v3612_v8 = vld [vmem:[#allocation14 + $0x260] sm:$0xff]  ;;  %v3614_v27 = vld [vmem:[#allocation14 + $0x270] sm:$0xff] }
 0x4ad   :  { %3251 = vmatmul.mubr.f32.gmra.mrb[108].mxu1 %v6748_v21 }
 0x4ae   :  { %3256 = vmatprep.mubr.f32.mxu1 %v8477_v7  ;;  %3412 = vmatmul.mubr.f32.gmra.mrb[124].mxu0 %v6748_v21  ;;  %v8039_v21 = vld [vmem:[#allocation13] sm:$0xf] }
 0x4af   :  { %3417 = vmatprep.mubr.f32.mxu0 %v8477_v7  ;;  %6207 = vmatpush1.bf16.msra.mxu1 %v6206_v0  ;;  %v6242_v0 = vpack.c.bf16 %v3598_v36, %v3596_v54  ;;  %v8043_v22 = vrot.slane %v8039_v21, %v8478_v44 }
 0x4b0   :  { %6209 = vmatprep.subr.bf16.mxu1 %v6208_v17  ;;  %v3601_v17 = vld [vmem:[#allocation14 + $0x208] sm:$0xff] }
 0x4b1   :  { %3257 = vmatmul.mubr.f32.gmra.mrb[110].mxu1 %v6749_v5  ;;  %v6244_v19 = vpack.c.bf16 %v3603_v61, %v3601_v17  ;;  %v6258_v17 = vpack.c.bf16 %v3614_v27, %v3612_v8 }
 0x4b2   :  { %3262 = vmatprep.mubr.f32.mxu1 %v8477_v7  ;;  %3418 = vmatmul.mubr.f32.gmra.mrb[126].mxu0 %v6749_v5 }
 0x4b3   :  { %3423 = vmatprep.mubr.f32.mxu0 %v8477_v7  ;;  %6211 = vmatpush1.bf16.msra.mxu1 %v6210_v41  ;;  %v8479_v41 = vld [vmem:[#allocation33_spill] sm:$0xff] }
 0x4b4   :  { %6213 = vmatprep.subr.bf16.mxu1 %v6212_v15  ;;  %v8047_v15 = vrot.slane %v8039_v21, %v8479_v41 }
 0x4b5   :  { %3263 = vmatmul.mubr.f32.gmra.mrb[112].mxu1 %v6750_v34 }
 0x4b6   :  { %3268 = vmatprep.mubr.f32.mxu1 %v8477_v7  ;;  %3424 = vmatmul.mubr.f32.gmra.mrb[128].mxu0 %v6750_v34 }
 0x4b7   :  { %3429 = vmatprep.mubr.f32.mxu0 %v8477_v7  ;;  %6215 = vmatpush1.bf16.msra.mxu1 %v6214_v38 }
 0x4b8   :  { %6217 = vmatprep.subr.bf16.mxu1 %v6216_v33 }
 0x4b9   :  { %3269 = vmatmul.mubr.f32.gmra.mrb[114].mxu1 %v6751_v42 }
 0x4ba   :  { %3274 = vmatprep.mubr.f32.mxu1 %v8477_v7  ;;  %3430 = vmatmul.mubr.f32.gmra.mrb[130].mxu0 %v6751_v42  ;;  %v6248_v42 = vpack.c.bf16 %v3607_v30, %v3605_v23  ;;  %v3621_v23 = vld [vmem:[#allocation14 + $0x2a8] sm:$0xff]  ;;  %v3623_v30 = vld [vmem:[#allocation14 + $0x2b8] sm:$0xff] }
 0x4bb   :  { %3435 = vmatprep.mubr.f32.mxu0 %v8477_v7  ;;  %6219 = vmatpush1.bf16.msra.mxu1 %v6218_v46  ;;  %v6246_v46 = vpack.c.bf16 %v3602_v35, %v3600_v12  ;;  %v3618_v12 = vld [vmem:[#allocation14 + $0x290] sm:$0xff] }
 0x4bc   :  { %6221 = vmatprep.subr.bf16.mxu1 %v6220_v20 }
 0x4bd   :  { %3275 = vmatmul.mubr.f32.gmra.mrb[116].mxu1 %v6752_v48 }
 0x4be   :  { %3280 = vmatprep.mubr.f32.mxu1 %v8477_v7  ;;  %3436 = vmatmul.mubr.f32.gmra.mrb[132].mxu0 %v6752_v48 }
 0x4bf   :  { %3441 = vmatprep.mubr.f32.mxu0 %v8477_v7  ;;  %6223 = vmatpush1.bf16.msra.mxu1 %v6222_v1 }
 0x4c0   :  { %6225 = vmatprep.subr.bf16.mxu1 %v6224_v59 }
 0x4c1   :  { %3281 = vmatmul.mubr.f32.gmra.mrb[118].mxu1 %v6753_v16 }
 0x4c2   :  { %3286 = vmatprep.mubr.f32.mxu1 %v8477_v7  ;;  %3442 = vmatmul.mubr.f32.gmra.mrb[134].mxu0 %v6753_v16  ;;  %v6252_v16 = vpack.c.bf16 %v3611_v39, %v3609_v3 }
 0x4c3   :  { %3447 = vmatprep.mubr.f32.mxu0 %v8477_v7  ;;  %6227 = vmatpush1.bf16.msra.mxu1 %v6226_v9  ;;  %v6250_v9 = vpack.c.bf16 %v3606_v4, %v3604_v56  ;;  %v6264_v56 = vpack.c.bf16 %v3623_v30, %v3621_v23  ;;  %v3620_v4 = vld [vmem:[#allocation14 + $0x2a0] sm:$0xff] }
 0x4c4   :  { %6229 = vmatprep.subr.bf16.mxu1 %v6228_v51 }
 0x4c5   :  { %3287 = vmatmul.mubr.f32.gmra.mrb[120].mxu1 %v6754_v29 }
 0x4c6   :  { %3292 = vmatprep.mubr.f32.mxu1 %v8477_v7  ;;  %3448 = vmatmul.mubr.f32.gmra.mrb[136].mxu0 %v6754_v29 }
 0x4c7   :  { %3453 = vmatprep.mubr.f32.mxu0 %v8477_v7  ;;  %6231 = vmatpush1.bf16.msra.mxu1 %v6230_v57 }
 0x4c8   :  { %6233 = vmatprep.subr.bf16.mxu1 %v6232_v53 }
 0x4c9   :  { %3293 = vmatmul.mubr.f32.gmra.mrb[122].mxu1 %v6755_v47 }
 0x4ca   :  { %3298 = vmatprep.mubr.f32.mxu1 %v8477_v7  ;;  %3454 = vmatmul.mubr.f32.gmra.mrb[138].mxu0 %v6755_v47 }
 0x4cb   :  { %3459 = vmatprep.mubr.f32.mxu0 %v8477_v7  ;;  %6235 = vmatpush1.bf16.msra.mxu1 %v6234_v28  ;;  %v6254_v28 = vpack.c.bf16 %v3610_v37, %v3608_v60 }
 0x4cc   :  { %6237 = vmatprep.subr.bf16.mxu1 %v6236_v14 }
 0x4cd   :  { %3299 = vmatmul.mubr.f32.gmra.mrb[124].mxu1 %v6756_v25 }
 0x4ce   :  { %3304 = vmatprep.mubr.f32.mxu1 %v8477_v7  ;;  %3460 = vmatmul.mubr.f32.gmra.mrb[140].mxu0 %v6756_v25 }
 0x4cf   :  { %3465 = vmatprep.mubr.f32.mxu0 %v8477_v7  ;;  %6239 = vmatpush1.bf16.msra.mxu1 %v6238_v13 }
 0x4d0   :  { %6241 = vmatprep.subr.bf16.mxu1 %v6240_v32  ;;  %v3619_v32 = vld [vmem:[#allocation14 + $0x298] sm:$0xff] }
 0x4d1   :  { %3305 = vmatmul.mubr.f32.gmra.mrb[126].mxu1 %v6757_v31 }
 0x4d2   :  { %3466 = vmatmul.mubr.f32.gmra.mrb[142].mxu0 %v6757_v31  ;;  %v6256_v31 = vpack.c.bf16 %v3615_v43, %v3613_v63  ;;  %v3624_v63 = vld [vmem:[#allocation14 + $0x2c0] sm:$0xff]  ;;  %v3626_v43 = vld [vmem:[#allocation14 + $0x2d0] sm:$0xff] }
 0x4d3   :  { %4062 = vmatprep.mubr.f32.mxu0 %v8477_v7  ;;  %6243 = vmatpush1.bf16.msra.mxu1 %v6242_v0  ;;  %v6270_v8 = vpack.c.bf16 %v3626_v43, %v3624_v63  ;;  %v3641_v43 = vld [vmem:[#allocation14 + $0x348] sm:$0xff] }
 0x4d4   :  { %6245 = vmatprep.subr.bf16.mxu1 %v6244_v19 }
 0x568   :  { %v3216_v6 = vpop.f32.mrb[96].mxu1 }
 0x569   :  { %v3217_v45 = vadd.f32 %v3216_v6, %v8043_v22  ;;  %v3218_v5 = vpop.f32.mrb[97].mxu1  ;;  %v8050_v38 = vpop.f32.mrb[112].mxu0 }
 0x56a   :  { %v3219_v33 = vadd.f32 %v3218_v5, %v8047_v15  ;;  %v8053_v34 = vpop.f32.mrb[113].mxu0  ;;  %v3616_v5 = vld [vmem:[#allocation14 + $0x280] sm:$0xff] }
 0x56b   :  { %v3472_v20 = vmax.f32 %v3217_v45, 0.0  ;;  %v6260_v45 = vpack.c.bf16 %v3619_v32, %v3617_v2 }
 0x56c   :  { %v3473_v55 = vmax.f32 %v3219_v33, 0.0  ;;  %v3222_v11 = vpop.f32.mrb[98].mxu1 }
 0x56d   :  { %v3223_v10 = vadd.f32 %v3222_v11, %v8043_v22  ;;  %v3224_v62 = vpop.f32.mrb[99].mxu1  ;;  %v8056_v1 = vpop.f32.mrb[114].mxu0 }
 0x56e   :  { %v3225_v59 = vadd.f32 %v3224_v62, %v8047_v15  ;;  %3729 = vmatprep.mubr.f32.mxu1 %v3473_v55  ;;  %v8059_v48 = vpop.f32.mrb[115].mxu0 }
 0x56f   :  { %3730 = vmatmul.mubr.f32.vlgmr.msra.gmra.mrb[128].mxu1 %v3472_v20  ;;  %v3476_v51 = vmax.f32 %v3223_v10, 0.0  ;;  %v6262_v20 = vpack.c.bf16 %v3618_v12, %v3616_v5 }
 0x570   :  { %v3477_v24 = vmax.f32 %v3225_v59, 0.0  ;;  %v3228_v26 = vpop.f32.mrb[100].mxu1  ;;  %6247 = vmatpush1.bf16.msra.mxu1 %v6246_v46  ;;  %v3622_v59 = vld [vmem:[#allocation14 + $0x2b0] sm:$0xff] }
 0x571   :  { %v3229_v50 = vadd.f32 %v3228_v26, %v8043_v22  ;;  %v3230_v58 = vpop.f32.mrb[101].mxu1  ;;  %6249 = vmatprep.subr.bf16.mxu1 %v6248_v42  ;;  %v8062_v57 = vpop.f32.mrb[116].mxu0  ;;  %v3627_v26 = vld [vmem:[#allocation14 + $0x2d8] sm:$0xff] }
 0x572   :  { %v3231_v53 = vadd.f32 %v3230_v58, %v8047_v15  ;;  %3735 = vmatprep.mubr.f32.mxu1 %v3477_v24  ;;  %v8065_v29 = vpop.f32.mrb[117].mxu0  ;;  %v3625_v24 = vld [vmem:[#allocation14 + $0x2c8] sm:$0xff]  ;;  %v6266_v58 = vpack.c.bf16 %v3622_v59, %v3620_v4  ;;  %v3639_v4 = vld [vmem:[#allocation14 + $0x338] sm:$0xff] }
 0x573   :  { %3736 = vmatmul.mubr.f32.gmra.mrb[130].mxu1 %v3476_v51  ;;  %v3480_v14 = vmax.f32 %v3229_v50, 0.0 }
 0x574   :  { %v3481_v49 = vmax.f32 %v3231_v53, 0.0  ;;  %v3234_v18 = vpop.f32.mrb[102].mxu1  ;;  %6251 = vmatpush1.bf16.msra.mxu1 %v6250_v9  ;;  %v6268_v53 = vpack.c.bf16 %v3627_v26, %v3625_v24 }
 0x575   :  { %v3235_v47 = vadd.f32 %v3234_v18, %v8043_v22  ;;  %v3236_v25 = vpop.f32.mrb[103].mxu1  ;;  %6253 = vmatprep.subr.bf16.mxu1 %v6252_v16  ;;  %v8068_v13 = vpop.f32.mrb[118].mxu0 }
 0x576   :  { %v3237_v52 = vadd.f32 %v3236_v25, %v8047_v15  ;;  %3741 = vmatprep.mubr.f32.mxu1 %v3481_v49  ;;  %v8071_v54 = vpop.f32.mrb[119].mxu0 }
 0x577   :  { %3742 = vmatmul.mubr.f32.gmra.mrb[132].mxu1 %v3480_v14  ;;  %v3484_v61 = vmax.f32 %v3235_v47, 0.0  ;;  %v3631_v14 = vld [vmem:[#allocation14 + $0x2f8] sm:$0xff] }
 0x578   :  { %v3485_v36 = vmax.f32 %v3237_v52, 0.0  ;;  %v3240_v0 = vpop.f32.mrb[104].mxu1  ;;  %6255 = vmatpush1.bf16.msra.mxu1 %v6254_v28  ;;  %v3629_v28 = vld [vmem:[#allocation14 + $0x2e8] sm:$0xff] }
 0x579   :  { %v3241_v19 = vadd.f32 %v3240_v0, %v8043_v22  ;;  %v3242_v6 = vpop.f32.mrb[105].mxu1  ;;  %6257 = vmatprep.subr.bf16.mxu1 %v6256_v31  ;;  %v8074_v35 = vpop.f32.mrb[120].mxu0  ;;  %v6272_v32 = vpack.c.bf16 %v3631_v14, %v3629_v28  ;;  %v3630_v0 = vld [vmem:[#allocation14 + $0x2f0] sm:$0xff] }
 0x57a   :  { %v3243_v33 = vadd.f32 %v3242_v6, %v8047_v15  ;;  %3747 = vmatprep.mubr.f32.mxu1 %v3485_v36  ;;  %v8077_v55 = vpop.f32.mrb[121].mxu0  ;;  %v3628_v36 = vld [vmem:[#allocation14 + $0x2e0] sm:$0xff]  ;;  %v3635_v6 = vld [vmem:[#allocation14 + $0x318] sm:$0xff] }
 0x57b   :  { %3748 = vmatmul.mubr.f32.gmra.mrb[134].mxu1 %v3484_v61  ;;  %v3488_v10 = vmax.f32 %v3241_v19, 0.0  ;;  %v3633_v19 = vld [vmem:[#allocation14 + $0x308] sm:$0xff] }
 0x57c   :  { %v3489_v11 = vmax.f32 %v3243_v33, 0.0  ;;  %v3246_v46 = vpop.f32.mrb[106].mxu1  ;;  %6259 = vmatpush1.bf16.msra.mxu1 %v6258_v17  ;;  %v6274_v33 = vpack.c.bf16 %v3630_v0, %v3628_v36  ;;  %v3642_v36 = vld [vmem:[#allocation14 + $0x350] sm:$0xff] }
 0x57d   :  { %v3247_v62 = vadd.f32 %v3246_v46, %v8043_v22  ;;  %v3248_v42 = vpop.f32.mrb[107].mxu1  ;;  %6261 = vmatprep.subr.bf16.mxu1 %v6260_v45  ;;  %v8080_v3 = vpop.f32.mrb[122].mxu0  ;;  %v6276_v46 = vpack.c.bf16 %v3635_v6, %v3633_v19  ;;  %v3645_v19 = vld [vmem:[#allocation14 + $0x368] sm:$0xff]  ;;  %v3647_v6 = vld [vmem:[#allocation14 + $0x378] sm:$0xff] }
 0x57e   :  { %v3249_v39 = vadd.f32 %v3248_v42, %v8047_v15  ;;  %3753 = vmatprep.mubr.f32.mxu1 %v3489_v11  ;;  %v8083_v9 = vpop.f32.mrb[123].mxu0 }
 0x57f   :  { %3754 = vmatmul.mubr.f32.gmra.mrb[136].mxu1 %v3488_v10  ;;  %v3492_v16 = vmax.f32 %v3247_v62, 0.0  ;;  %v3634_v10 = vld [vmem:[#allocation14 + $0x310] sm:$0xff] }
 0x580   :  { %v3493_v51 = vmax.f32 %v3249_v39, 0.0  ;;  %v3252_v50 = vpop.f32.mrb[108].mxu1  ;;  %6263 = vmatpush1.bf16.msra.mxu1 %v6262_v20  ;;  %v3632_v20 = vld [vmem:[#allocation14 + $0x300] sm:$0xff] }
 0x581   :  { %v3253_v60 = vadd.f32 %v3252_v50, %v8043_v22  ;;  %v3254_v37 = vpop.f32.mrb[109].mxu1  ;;  %6265 = vmatprep.subr.bf16.mxu1 %v6264_v56  ;;  %v8086_v49 = vpop.f32.mrb[124].mxu0  ;;  %v3637_v56 = vld [vmem:[#allocation14 + $0x328] sm:$0xff]  ;;  %v6278_v26 = vpack.c.bf16 %v3634_v10, %v3632_v20  ;;  %v6288_v20 = vpack.c.bf16 %v3647_v6, %v3645_v19  ;;  %v3644_v10 = vld [vmem:[#allocation14 + $0x360] sm:$0xff] }
 0x582   :  { %v3255_v18 = vadd.f32 %v3254_v37, %v8047_v15  ;;  %3759 = vmatprep.mubr.f32.mxu1 %v3493_v51  ;;  %v8089_v47 = vpop.f32.mrb[125].mxu0  ;;  %v3638_v37 = vld [vmem:[#allocation14 + $0x330] sm:$0xff] }
 0x583   :  { %3760 = vmatmul.mubr.f32.gmra.mrb[138].mxu1 %v3492_v16  ;;  %v3496_v27 = vmax.f32 %v3253_v60, 0.0  ;;  %v6280_v16 = vpack.c.bf16 %v3639_v4, %v3637_v56  ;;  %v3636_v60 = vld [vmem:[#allocation14 + $0x320] sm:$0xff] }
 0x584   :  { %v3497_v25 = vmax.f32 %v3255_v18, 0.0  ;;  %v3258_v31 = vpop.f32.mrb[110].mxu1  ;;  %6267 = vmatpush1.bf16.msra.mxu1 %v6266_v58  ;;  %v3643_v18 = vld [vmem:[#allocation14 + $0x358] sm:$0xff] }
 0x585   :  { %v3259_v52 = vadd.f32 %v3258_v31, %v8043_v22  ;;  %v3260_v2 = vpop.f32.mrb[111].mxu1  ;;  %6269 = vmatprep.subr.bf16.mxu1 %v6268_v53  ;;  %v8092_v17 = vpop.f32.mrb[126].mxu0  ;;  %v6282_v31 = vpack.c.bf16 %v3638_v37, %v3636_v60 }
 0x586   :  { %v3261_v61 = vadd.f32 %v3260_v2, %v8047_v15  ;;  %3765 = vmatprep.mubr.f32.mxu1 %v3497_v25  ;;  %v8095_v45 = vpop.f32.mrb[127].mxu0  ;;  %v6284_v2 = vpack.c.bf16 %v3643_v18, %v3641_v43  ;;  %v3648_v43 = vld [vmem:[#allocation14 + $0x380] sm:$0xff]  ;;  %v3650_v18 = vld [vmem:[#allocation14 + $0x390] sm:$0xff] }
 0x587   :  { %3766 = vmatmul.mubr.f32.gmra.mrb[140].mxu1 %v3496_v27  ;;  %v3500_v23 = vmax.f32 %v3259_v52, 0.0 }
 0x588   :  { %v3501_v5 = vmax.f32 %v3261_v61, 0.0  ;;  %v3264_v12 = vpop.f32.mrb[112].mxu1  ;;  %6271 = vmatpush1.bf16.msra.mxu1 %v6270_v8 }
 0x589   :  { %v3265_v30 = vadd.f32 %v3264_v12, %v8043_v22  ;;  %v3266_v11 = vpop.f32.mrb[113].mxu1  ;;  %6273 = vmatprep.subr.bf16.mxu1 %v6272_v32  ;;  %v8098_v62 = vpop.f32.mrb[128].mxu0  ;;  %v3640_v32 = vld [vmem:[#allocation14 + $0x340] sm:$0xff] }
 0x58a   :  { %v3267_v42 = vadd.f32 %v3266_v11, %v8047_v15  ;;  %3771 = vmatprep.mubr.f32.mxu1 %v3501_v5  ;;  %v8101_v59 = vpop.f32.mrb[129].mxu0 }
 0x58b   :  { %3772 = vmatmul.mubr.f32.gmra.mrb[142].mxu1 %v3500_v23  ;;  %v3504_v51 = vmax.f32 %v3265_v30, 0.0  ;;  %v6286_v23 = vpack.c.bf16 %v3642_v36, %v3640_v32  ;;  %v6294_v32 = vpack.c.bf16 %v3650_v18, %v3648_v43  ;;  %v3661_v18 = vld [vmem:[#allocation14 + $0x3e8] sm:$0xff] }
 0x58c   :  { %v3505_v39 = vmax.f32 %v3267_v42, 0.0  ;;  %v3270_v24 = vpop.f32.mrb[114].mxu1  ;;  %6275 = vmatpush1.bf16.msra.mxu1 %v6274_v33  ;;  %v3646_v42 = vld [vmem:[#allocation14 + $0x370] sm:$0xff] }
 0x58d   :  { %v3271_v50 = vadd.f32 %v3270_v24, %v8043_v22  ;;  %v3272_v58 = vpop.f32.mrb[115].mxu1  ;;  %6277 = vmatprep.subr.bf16.mxu1 %v6276_v46  ;;  %v8104_v53 = vpop.f32.mrb[130].mxu0  ;;  %v3651_v24 = vld [vmem:[#allocation14 + $0x398] sm:$0xff] }
 0x58e   :  { %v3273_v63 = vadd.f32 %v3272_v58, %v8047_v15  ;;  %3777 = vmatprep.mubr.f32.mxu1 %v3505_v39  ;;  %v8107_v28 = vpop.f32.mrb[131].mxu0  ;;  %v3649_v39 = vld [vmem:[#allocation14 + $0x388] sm:$0xff]  ;;  %v6290_v58 = vpack.c.bf16 %v3646_v42, %v3644_v10 }
 0x58f   :  { %3778 = vmatmul.mubr.f32.gmra.mrb[144].mxu1 %v3504_v51  ;;  %v3508_v8 = vmax.f32 %v3271_v50, 0.0 }
 0x590   :  { %v3509_v14 = vmax.f32 %v3273_v63, 0.0  ;;  %v3276_v25 = vpop.f32.mrb[116].mxu1  ;;  %6279 = vmatpush1.bf16.msra.mxu1 %v6278_v26  ;;  %v6292_v63 = vpack.c.bf16 %v3651_v24, %v3649_v39  ;;  %v8480_v39 = vsub.s32 3, %v7542_v40 }
 0x591   :  { %v3277_v27 = vadd.f32 %v3276_v25, %v8043_v22  ;;  %v3278_v52 = vpop.f32.mrb[117].mxu1  ;;  %6281 = vmatprep.subr.bf16.mxu1 %v6280_v16  ;;  %v8110_v0 = vpop.f32.mrb[132].mxu0 }
 0x592   :  { %v3279_v61 = vadd.f32 %v3278_v52, %v8047_v15  ;;  %3783 = vmatprep.mubr.f32.mxu1 %v3509_v14  ;;  %v8113_v5 = vpop.f32.mrb[133].mxu0  ;;  %v8136_v24 = vrot.slane %v8039_v21, %v8480_v39 }
 0x593   :  { %3784 = vmatmul.mubr.f32.gmra.mrb[146].mxu1 %v3508_v8  ;;  %v3512_v30 = vmax.f32 %v3277_v27, 0.0  ;;  %v3655_v8 = vld [vmem:[#allocation14 + $0x3b8] sm:$0xff] }
 0x594   :  { %v3513_v12 = vmax.f32 %v3279_v61, 0.0  ;;  %v3282_v33 = vpop.f32.mrb[118].mxu1  ;;  %6283 = vmatpush1.bf16.msra.mxu1 %v6282_v31  ;;  %v3653_v31 = vld [vmem:[#allocation14 + $0x3a8] sm:$0xff] }
 0x595   :  { %v3283_v11 = vadd.f32 %v3282_v33, %v8043_v22  ;;  %v3284_v46 = vpop.f32.mrb[119].mxu1  ;;  %6285 = vmatprep.subr.bf16.mxu1 %v6284_v2  ;;  %v8116_v56 = vpop.f32.mrb[134].mxu0  ;;  %v6296_v6 = vpack.c.bf16 %v3655_v8, %v3653_v31  ;;  %v3654_v33 = vld [vmem:[#allocation14 + $0x3b0] sm:$0xff] }
 0x596   :  { %v3285_v4 = vadd.f32 %v3284_v46, %v8047_v15  ;;  %3789 = vmatprep.mubr.f32.mxu1 %v3513_v12  ;;  %v8119_v26 = vpop.f32.mrb[135].mxu0  ;;  %v3652_v12 = vld [vmem:[#allocation14 + $0x3a0] sm:$0xff]  ;;  %v3659_v46 = vld [vmem:[#allocation14 + $0x3d8] sm:$0xff] }
 0x597   :  { %3790 = vmatmul.mubr.f32.gmra.mrb[148].mxu1 %v3512_v30  ;;  %v3516_v16 = vmax.f32 %v3283_v11, 0.0  ;;  %v3657_v11 = vld [vmem:[#allocation14 + $0x3c8] sm:$0xff] }
 0x598   :  { %v3517_v51 = vmax.f32 %v3285_v4, 0.0  ;;  %v3288_v50 = vpop.f32.mrb[120].mxu1  ;;  %6287 = vmatpush1.bf16.msra.mxu1 %v6286_v23  ;;  %v6298_v4 = vpack.c.bf16 %v3654_v33, %v3652_v12 }
 0x599   :  { %v3289_v60 = vadd.f32 %v3288_v50, %v8043_v22  ;;  %v3290_v37 = vpop.f32.mrb[121].mxu1  ;;  %6289 = vmatprep.subr.bf16.mxu1 %v6288_v20  ;;  %v8122_v14 = vpop.f32.mrb[136].mxu0 }
 0x59a   :  { %v3291_v25 = vadd.f32 %v3290_v37, %v8047_v15  ;;  %3795 = vmatprep.mubr.f32.mxu1 %v3517_v51  ;;  %v8125_v27 = vpop.f32.mrb[137].mxu0  ;;  %v3658_v37 = vld [vmem:[#allocation14 + $0x3d0] sm:$0xff] }
 0x59b   :  { %3796 = vmatmul.mubr.f32.gmra.mrb[150].mxu1 %v3516_v16  ;;  %v3520_v36 = vmax.f32 %v3289_v60, 0.0  ;;  %v6300_v16 = vpack.c.bf16 %v3659_v46, %v3657_v11  ;;  %v3656_v60 = vld [vmem:[#allocation14 + $0x3c0] sm:$0xff]  ;;  %v3662_v11 = vld [vmem:[#allocation14 + $0x3f0] sm:$0xff] }
 0x59c   :  { %v3521_v52 = vmax.f32 %v3291_v25, 0.0  ;;  %v3294_v2 = vpop.f32.mrb[122].mxu1  ;;  %6291 = vmatpush1.bf16.msra.mxu1 %v6290_v58  ;;  %v3663_v25 = vld [vmem:[#allocation14 + $0x3f8] sm:$0xff] }
 0x59d   :  { %v3295_v61 = vadd.f32 %v3294_v2, %v8043_v22  ;;  %v3296_v19 = vpop.f32.mrb[123].mxu1  ;;  %6293 = vmatprep.subr.bf16.mxu1 %v6292_v63  ;;  %v8128_v23 = vpop.f32.mrb[138].mxu0  ;;  %v3380_v2 = vadd.f32 %v8053_v34, %v8136_v24  ;;  %v6304_v33 = vpack.c.bf16 %v3663_v25, %v3661_v18 }
 0x59e   :  { %v3297_v30 = vadd.f32 %v3296_v19, %v8047_v15  ;;  %3801 = vmatprep.mubr.f32.mxu1 %v3521_v52  ;;  %v8131_v20 = vpop.f32.mrb[139].mxu0 }
 0x59f   :  { %3802 = vmatmul.mubr.f32.gmra.mrb[152].mxu1 %v3520_v36  ;;  %v3524_v51 = vmax.f32 %v3295_v61, 0.0 }
 0x5a0   :  { %v3525_v10 = vmax.f32 %v3297_v30, 0.0  ;;  %v3300_v42 = vpop.f32.mrb[124].mxu1  ;;  %6295 = vmatpush1.bf16.msra.mxu1 %v6294_v32  ;;  %v6302_v32 = vpack.c.bf16 %v3658_v37, %v3656_v60  ;;  %v3660_v30 = vld [vmem:[#allocation14 + $0x3e0] sm:$0xff] }
 0x5a1   :  { %v3301_v50 = vadd.f32 %v3300_v42, %v8043_v22  ;;  %v3302_v58 = vpop.f32.mrb[125].mxu1  ;;  %6297 = vmatprep.subr.bf16.mxu1 %v6296_v6  ;;  %v8139_v63 = vpop.f32.mrb[140].mxu0  ;;  %v8481_v6 = vsub.s32 2, %v7542_v40  ;;  %v3386_v40 = vadd.f32 %v8059_v48, %v8136_v24 }
 0x5a2   :  { %v3303_v43 = vadd.f32 %v3302_v58, %v8047_v15  ;;  %3807 = vmatprep.mubr.f32.mxu1 %v3525_v10  ;;  %v8142_v31 = vpop.f32.mrb[141].mxu0 }
 0x5a3   :  { %3808 = vmatmul.mubr.f32.gmra.mrb[154].mxu1 %v3524_v51  ;;  %v3528_v36 = vmax.f32 %v3301_v50, 0.0  ;;  %v8150_v12 = vrot.slane %v8039_v21, %v8481_v6  ;;  %v6306_v21 = vpack.c.bf16 %v3662_v11, %v3660_v30  ;;  %v3479_v51 = vmax.f32 %v3386_v40, 0.0 }
 0x5a4   :  { %v3529_v8 = vmax.f32 %v3303_v43, 0.0  ;;  %v3306_v52 = vpop.f32.mrb[126].mxu1  ;;  %6299 = vmatpush1.bf16.msra.mxu1 %v6298_v4 }
 0x5a5   :  { %v3307_v61 = vadd.f32 %v3306_v52, %v8043_v22  ;;  %v3308_v19 = vpop.f32.mrb[127].mxu1  ;;  %6301 = vmatprep.subr.bf16.mxu1 %v6300_v16  ;;  %v8152_v46 = vpop.f32.mrb[142].mxu0  ;;  %v3475_v22 = vmax.f32 %v3380_v2, 0.0  ;;  %v3378_v39 = vadd.f32 %v8050_v38, %v8150_v12  ;;  %v3384_v58 = vadd.f32 %v8056_v1, %v8150_v12 }
 0x5a6   :  { %v3309_v10 = vadd.f32 %v3308_v19, %v8047_v15  ;;  %3813 = vmatprep.mubr.f32.mxu1 %v3529_v8  ;;  %v8155_v34 = vpop.f32.mrb[143].mxu0  ;;  %v3392_v15 = vadd.f32 %v8065_v29, %v8136_v24  ;;  %v3398_v16 = vadd.f32 %v8071_v54, %v8136_v24  ;;  %v3390_v60 = vadd.f32 %v8062_v57, %v8150_v12 }
 0x5a7   :  { %3814 = vmatmul.mubr.f32.gmra.mrb[156].mxu1 %v3528_v36  ;;  %v3532_v4 = vmax.f32 %v3307_v61, 0.0  ;;  %v3474_v50 = vmax.f32 %v3378_v39, 0.0  ;;  %v3478_v38 = vmax.f32 %v3384_v58, 0.0  ;;  %v3404_v29 = vadd.f32 %v8077_v55, %v8136_v24 }
 0x5a8   :  { %v3533_v42 = vmax.f32 %v3309_v10, 0.0  ;;  %6303 = vmatpush1.bf16.msra.mxu1 %v6302_v32  ;;  %v3483_v48 = vmax.f32 %v3392_v15, 0.0  ;;  %v3487_v37 = vmax.f32 %v3398_v16, 0.0  ;;  %v3482_v43 = vmax.f32 %v3390_v60, 0.0 }
 0x5a9   :  { %6305 = vmatprep.subr.bf16.mxu1 %v6304_v33  ;;  %v3396_v1 = vadd.f32 %v8068_v13, %v8150_v12  ;;  %v3491_v18 = vmax.f32 %v3404_v29, 0.0  ;;  %v3410_v54 = vadd.f32 %v8083_v9, %v8136_v24  ;;  %v3402_v57 = vadd.f32 %v8074_v35, %v8150_v12 }
 0x5aa   :  { %3819 = vmatprep.mubr.f32.mxu1 %v3533_v42  ;;  %v3416_v55 = vadd.f32 %v8089_v47, %v8136_v24  ;;  %v3408_v13 = vadd.f32 %v8080_v3, %v8150_v12  ;;  %v3422_v9 = vadd.f32 %v8095_v45, %v8136_v24  ;;  %v3414_v35 = vadd.f32 %v8086_v49, %v8150_v12 }
 0x5ab   :  { %3820 = vmatmul.mubr.f32.gmra.mrb[158].mxu1 %v3532_v4  ;;  %v3486_v25 = vmax.f32 %v3396_v1, 0.0  ;;  %v3495_v8 = vmax.f32 %v3410_v54, 0.0  ;;  %v3490_v52 = vmax.f32 %v3402_v57, 0.0  ;;  %v3428_v47 = vadd.f32 %v8101_v59, %v8136_v24 }
 0x5ac   :  { %6307 = vmatpush1.bf16.msra.mxu1 %v6306_v21  ;;  %3890 = vmatprep.mubr.f32.mxu1 %v3475_v22  ;;  %v3499_v2 = vmax.f32 %v3416_v55, 0.0  ;;  %v3494_v32 = vmax.f32 %v3408_v13, 0.0  ;;  %v3503_v36 = vmax.f32 %v3422_v9, 0.0  ;;  %v3498_v61 = vmax.f32 %v3414_v35, 0.0 }
 0x5ad   :  { %v3420_v3 = vadd.f32 %v8092_v17, %v8150_v12  ;;  %v3507_v19 = vmax.f32 %v3428_v47, 0.0  ;;  %v3434_v45 = vadd.f32 %v8107_v28, %v8136_v24  ;;  %v3426_v49 = vadd.f32 %v8098_v62, %v8150_v12 }
 0x5ae   :  { %v3440_v59 = vadd.f32 %v8113_v5, %v8136_v24  ;;  %v3432_v17 = vadd.f32 %v8104_v53, %v8150_v12  ;;  %v3446_v28 = vadd.f32 %v8119_v26, %v8136_v24  ;;  %v3438_v62 = vadd.f32 %v8110_v0, %v8150_v12 }
 0x5af   :  { %3891 = vmatmul.mubr.f32.vlgmr.msra.gmra.mrb[128].mxu1 %v3474_v50  ;;  %v3502_v6 = vmax.f32 %v3420_v3, 0.0  ;;  %v3511_v33 = vmax.f32 %v3434_v45, 0.0  ;;  %v3506_v30 = vmax.f32 %v3426_v49, 0.0  ;;  %v3452_v5 = vadd.f32 %v8125_v27, %v8136_v24 }
 0x5b0   :  { %3896 = vmatprep.mubr.f32.mxu1 %v3479_v51  ;;  %v3515_v11 = vmax.f32 %v3440_v59, 0.0  ;;  %v3510_v10 = vmax.f32 %v3432_v17, 0.0  ;;  %v3519_v42 = vmax.f32 %v3446_v28, 0.0  ;;  %v3514_v22 = vmax.f32 %v3438_v62, 0.0 }
 0x5b1   :  { %v3444_v53 = vadd.f32 %v8116_v56, %v8150_v12  ;;  %v3523_v40 = vmax.f32 %v3452_v5, 0.0  ;;  %v3458_v26 = vadd.f32 %v8131_v20, %v8136_v24  ;;  %v3450_v0 = vadd.f32 %v8122_v14, %v8150_v12 }
 0x5b2   :  { %v3464_v27 = vadd.f32 %v8142_v31, %v8136_v24  ;;  %v3456_v56 = vadd.f32 %v8128_v23, %v8150_v12  ;;  %v3470_v20 = vadd.f32 %v8155_v34, %v8136_v24  ;;  %v3462_v14 = vadd.f32 %v8139_v63, %v8150_v12 }
 0x5b3   :  { %3897 = vmatmul.mubr.f32.gmra.mrb[130].mxu1 %v3478_v38  ;;  %v3518_v21 = vmax.f32 %v3444_v53, 0.0  ;;  %v3527_v4 = vmax.f32 %v3458_v26, 0.0  ;;  %v3522_v39 = vmax.f32 %v3450_v0, 0.0  ;;  %v3468_v31 = vadd.f32 %v8152_v46, %v8150_v12  ;;  %v4208_v26 = vld [vmem:[#allocation17 + $0x88] sm:$0xff] }
 0x5b4   :  { %3902 = vmatprep.mubr.f32.mxu1 %v3483_v48  ;;  %v3531_v51 = vmax.f32 %v3464_v27, 0.0  ;;  %v3526_v15 = vmax.f32 %v3456_v56, 0.0  ;;  %v3535_v50 = vmax.f32 %v3470_v20, 0.0  ;;  %v3530_v58 = vmax.f32 %v3462_v14, 0.0  ;;  %v8219_v48 = vld [vmem:[#allocation2] sm:$0xff]  ;;  %v4191_v56 = vld [vmem:[#allocation17] sm:$0xff] }
 0x5b5   :  { %v3534_v23 = vmax.f32 %v3468_v31, 0.0  ;;  %v4209_v20 = vld [vmem:[#allocation17 + $0x90] sm:$0xff]  ;;  %v4194_v31 = vld [vmem:[#allocation17 + $0x18] sm:$0xff] }
 0x5b7   :  { %3903 = vmatmul.mubr.f32.gmra.mrb[132].mxu1 %v3482_v43 }
 0x5b8   :  { %3908 = vmatprep.mubr.f32.mxu1 %v3487_v37 }
 0x5bb   :  { %3909 = vmatmul.mubr.f32.gmra.mrb[134].mxu1 %v3486_v25 }
 0x5bc   :  { %3914 = vmatprep.mubr.f32.mxu1 %v3491_v18 }
 0x5bf   :  { %3915 = vmatmul.mubr.f32.gmra.mrb[136].mxu1 %v3490_v52 }
 0x5c0   :  { %3920 = vmatprep.mubr.f32.mxu1 %v3495_v8 }
 0x5c3   :  { %3921 = vmatmul.mubr.f32.gmra.mrb[138].mxu1 %v3494_v32 }
 0x5c4   :  { %3926 = vmatprep.mubr.f32.mxu1 %v3499_v2 }
 0x5c7   :  { %3927 = vmatmul.mubr.f32.gmra.mrb[140].mxu1 %v3498_v61 }
 0x5c8   :  { %3932 = vmatprep.mubr.f32.mxu1 %v3503_v36 }
 0x5cb   :  { %3933 = vmatmul.mubr.f32.gmra.mrb[142].mxu1 %v3502_v6 }
 0x5cc   :  { %3938 = vmatprep.mubr.f32.mxu1 %v3507_v19 }
 0x5cf   :  { %3939 = vmatmul.mubr.f32.gmra.mrb[144].mxu1 %v3506_v30 }
 0x5d0   :  { %3944 = vmatprep.mubr.f32.mxu1 %v3511_v33 }
 0x5d3   :  { %3945 = vmatmul.mubr.f32.gmra.mrb[146].mxu1 %v3510_v10 }
 0x5d4   :  { %3950 = vmatprep.mubr.f32.mxu1 %v3515_v11 }
 0x5d7   :  { %3951 = vmatmul.mubr.f32.gmra.mrb[148].mxu1 %v3514_v22 }
 0x5d8   :  { %3956 = vmatprep.mubr.f32.mxu1 %v3519_v42 }
 0x5db   :  { %3957 = vmatmul.mubr.f32.gmra.mrb[150].mxu1 %v3518_v21 }
 0x5dc   :  { %3962 = vmatprep.mubr.f32.mxu1 %v3523_v40  ;;  %v4207_v40 = vld [vmem:[#allocation17 + $0x80] sm:$0xff] }
 0x5df   :  { %3963 = vmatmul.mubr.f32.gmra.mrb[152].mxu1 %v3522_v39  ;;  %v6340_v39 = vpack.c.bf16 %v4208_v26, %v4207_v40  ;;  %v8280_v40 = vld [vmem:[#allocation2 + $0x78] sm:$0xff]  ;;  %v4221_v26 = vld [vmem:[#allocation17 + $0xf0] sm:$0xff] }
 0x5e0   :  { %3968 = vmatprep.mubr.f32.mxu1 %v3527_v4 }
 0x5e3   :  { %3969 = vmatmul.mubr.f32.gmra.mrb[154].mxu1 %v3526_v15  ;;  %v4210_v15 = vld [vmem:[#allocation17 + $0x98] sm:$0xff] }
 0x5e4   :  { %3974 = vmatprep.mubr.f32.mxu1 %v3531_v51  ;;  %v4192_v51 = vld [vmem:[#allocation17 + $0x8] sm:$0xff] }
 0x5e5   :  { %v6342_v14 = vpack.c.bf16 %v4192_v51, %v4191_v56  ;;  %v3664_v56 = vld [vmem:[#allocation16] sm:$0x3] }
 0x5e6   :  { %v8284_v51 = vrot.slane %v3664_v56, %v8478_v44 }
 0x5e7   :  { %3975 = vmatmul.mubr.f32.gmra.mrb[156].mxu1 %v3530_v58  ;;  %v4193_v58 = vld [vmem:[#allocation17 + $0x10] sm:$0xff] }
 0x5e8   :  { %3980 = vmatprep.mubr.f32.mxu1 %v3535_v50  ;;  %v6344_v50 = vpack.c.bf16 %v4210_v15, %v4209_v20  ;;  %v8287_v20 = vrot.slane %v3664_v56, %v8479_v41 }
 0x5eb   :  { %3981 = vmatmul.mubr.f32.gmra.mrb[158].mxu1 %v3534_v23  ;;  %v4211_v23 = vld [vmem:[#allocation17 + $0xa0] sm:$0xff] }
 0x5ec   :  { %5273 = vmatprep.mubr.f32.mxu1 %v8219_v48 }
 0x682   :  { %v3892_v24 = vpop.f32.mrb[128].mxu1 }
 0x683   :  { %v3894_v34 = vpop.f32.mrb[129].mxu1 }
 0x686   :  { %v3898_v16 = vpop.f32.mrb[130].mxu1 }
 0x687   :  { %v6310_v38 = vpack.c.bf16 %v3898_v16, %v3892_v24  ;;  %v3900_v63 = vpop.f32.mrb[131].mxu1  ;;  %v4212_v24 = vld [vmem:[#allocation17 + $0xa8] sm:$0xff] }
 0x688   :  { %v6308_v60 = vpack.c.bf16 %v3900_v63, %v3894_v34  ;;  %v6346_v34 = vpack.c.bf16 %v4194_v31, %v4193_v58  ;;  %v6348_v16 = vpack.c.bf16 %v4212_v24, %v4211_v23  ;;  %v4196_v63 = vld [vmem:[#allocation17 + $0x28] sm:$0xff] }
 0x68a   :  { %v3904_v37 = vpop.f32.mrb[132].mxu1  ;;  %6309 = vmatprep.subr.bf16.mxu0 %v6308_v60  ;;  %v4213_v60 = vld [vmem:[#allocation17 + $0xb0] sm:$0xff] }
 0x68b   :  { %v3906_v29 = vpop.f32.mrb[133].mxu1  ;;  %6311 = vmatpush1.bf16.msra.mxu0 %v6310_v38  ;;  %v4195_v38 = vld [vmem:[#allocation17 + $0x20] sm:$0xff] }
 0x68e   :  { %v3910_v43 = vpop.f32.mrb[134].mxu1 }
 0x68f   :  { %v6314_v12 = vpack.c.bf16 %v3910_v43, %v3904_v37  ;;  %v3912_v46 = vpop.f32.mrb[135].mxu1  ;;  %v4214_v37 = vld [vmem:[#allocation17 + $0xb8] sm:$0xff]  ;;  %v6350_v43 = vpack.c.bf16 %v4196_v63, %v4195_v38 }
 0x690   :  { %v6312_v1 = vpack.c.bf16 %v3912_v46, %v3906_v29  ;;  %v8224_v29 = vld [vmem:[#allocation2 + $0x8] sm:$0xff] }
 0x691   :  { %v4197_v46 = vld [vmem:[#allocation17 + $0x30] sm:$0xff] }
 0x692   :  { %v3916_v18 = vpop.f32.mrb[136].mxu1  ;;  %6313 = vmatprep.subr.bf16.mxu0 %v6312_v1  ;;  %v4198_v1 = vld [vmem:[#allocation17 + $0x38] sm:$0xff] }
 0x693   :  { %v3918_v54 = vpop.f32.mrb[137].mxu1  ;;  %6315 = vmatpush1.bf16.msra.mxu0 %v6314_v12  ;;  %v6352_v12 = vpack.c.bf16 %v4214_v37, %v4213_v60 }
 0x696   :  { %v3922_v25 = vpop.f32.mrb[138].mxu1 }
 0x697   :  { %v6318_v57 = vpack.c.bf16 %v3922_v25, %v3916_v18  ;;  %v3924_v8 = vpop.f32.mrb[139].mxu1  ;;  %v4215_v18 = vld [vmem:[#allocation17 + $0xc0] sm:$0xff] }
 0x698   :  { %v6316_v55 = vpack.c.bf16 %v3924_v8, %v3918_v54  ;;  %v4216_v54 = vld [vmem:[#allocation17 + $0xc8] sm:$0xff]  ;;  %v8228_v25 = vld [vmem:[#allocation2 + $0x10] sm:$0xff] }
 0x699   :  { %v6356_v8 = vpack.c.bf16 %v4216_v54, %v4215_v18 }
 0x69a   :  { %v3928_v52 = vpop.f32.mrb[140].mxu1  ;;  %6317 = vmatprep.subr.bf16.mxu0 %v6316_v55  ;;  %v4199_v55 = vld [vmem:[#allocation17 + $0x40] sm:$0xff] }
 0x69b   :  { %v3930_v13 = vpop.f32.mrb[141].mxu1  ;;  %6319 = vmatpush1.bf16.msra.mxu0 %v6318_v57  ;;  %v6354_v57 = vpack.c.bf16 %v4198_v1, %v4197_v46 }
 0x69e   :  { %v3934_v2 = vpop.f32.mrb[142].mxu1 }
 0x69f   :  { %v6322_v9 = vpack.c.bf16 %v3934_v2, %v3928_v52  ;;  %v3936_v32 = vpop.f32.mrb[143].mxu1  ;;  %v4200_v52 = vld [vmem:[#allocation17 + $0x48] sm:$0xff]  ;;  %v4218_v2 = vld [vmem:[#allocation17 + $0xd8] sm:$0xff] }
 0x6a0   :  { %v6320_v35 = vpack.c.bf16 %v3936_v32, %v3930_v13  ;;  %v4217_v13 = vld [vmem:[#allocation17 + $0xd0] sm:$0xff]  ;;  %v6358_v32 = vpack.c.bf16 %v4200_v52, %v4199_v55 }
 0x6a2   :  { %v3940_v36 = vpop.f32.mrb[144].mxu1  ;;  %6321 = vmatprep.subr.bf16.mxu0 %v6320_v35  ;;  %v6360_v35 = vpack.c.bf16 %v4218_v2, %v4217_v13 }
 0x6a3   :  { %v3942_v47 = vpop.f32.mrb[145].mxu1  ;;  %6323 = vmatpush1.bf16.msra.mxu0 %v6322_v9  ;;  %v8232_v9 = vld [vmem:[#allocation2 + $0x18] sm:$0xff] }
 0x6a6   :  { %v3946_v61 = vpop.f32.mrb[146].mxu1 }
 0x6a7   :  { %v6326_v3 = vpack.c.bf16 %v3946_v61, %v3940_v36  ;;  %v3948_v19 = vpop.f32.mrb[147].mxu1  ;;  %v4201_v36 = vld [vmem:[#allocation17 + $0x50] sm:$0xff]  ;;  %v4219_v61 = vld [vmem:[#allocation17 + $0xe0] sm:$0xff] }
 0x6a8   :  { %v6324_v45 = vpack.c.bf16 %v3948_v19, %v3942_v47  ;;  %v4202_v47 = vld [vmem:[#allocation17 + $0x58] sm:$0xff]  ;;  %v8236_v19 = vld [vmem:[#allocation2 + $0x20] sm:$0xff] }
 0x6aa   :  { %v3952_v6 = vpop.f32.mrb[148].mxu1  ;;  %6325 = vmatprep.subr.bf16.mxu0 %v6324_v45  ;;  %v6362_v45 = vpack.c.bf16 %v4202_v47, %v4201_v36 }
 0x6ab   :  { %v3954_v49 = vpop.f32.mrb[149].mxu1  ;;  %6327 = vmatpush1.bf16.msra.mxu0 %v6326_v3  ;;  %v4220_v3 = vld [vmem:[#allocation17 + $0xe8] sm:$0xff] }
 0x6ae   :  { %v3958_v33 = vpop.f32.mrb[150].mxu1 }
 0x6af   :  { %v6330_v59 = vpack.c.bf16 %v3958_v33, %v3952_v6  ;;  %v3960_v30 = vpop.f32.mrb[151].mxu1  ;;  %v6364_v6 = vpack.c.bf16 %v4220_v3, %v4219_v61  ;;  %v4204_v33 = vld [vmem:[#allocation17 + $0x68] sm:$0xff] }
 0x6b0   :  { %v6328_v17 = vpack.c.bf16 %v3960_v30, %v3954_v49  ;;  %v4203_v49 = vld [vmem:[#allocation17 + $0x60] sm:$0xff] }
 0x6b1   :  { %v6366_v30 = vpack.c.bf16 %v4204_v33, %v4203_v49 }
 0x6b2   :  { %v3964_v11 = vpop.f32.mrb[152].mxu1  ;;  %6329 = vmatprep.subr.bf16.mxu0 %v6328_v17  ;;  %v8244_v17 = vld [vmem:[#allocation2 + $0x30] sm:$0xff] }
 0x6b3   :  { %v3966_v28 = vpop.f32.mrb[153].mxu1  ;;  %6331 = vmatpush1.bf16.msra.mxu0 %v6330_v59  ;;  %v8240_v59 = vld [vmem:[#allocation2 + $0x28] sm:$0xff] }
 0x6b6   :  { %v3970_v10 = vpop.f32.mrb[154].mxu1 }
 0x6b7   :  { %v6334_v62 = vpack.c.bf16 %v3970_v10, %v3964_v11  ;;  %v3972_v42 = vpop.f32.mrb[155].mxu1  ;;  %v8248_v11 = vld [vmem:[#allocation2 + $0x38] sm:$0xff]  ;;  %v8256_v10 = vld [vmem:[#allocation2 + $0x48] sm:$0xff] }
 0x6b8   :  { %v6332_v5 = vpack.c.bf16 %v3972_v42, %v3966_v28  ;;  %v8252_v28 = vld [vmem:[#allocation2 + $0x40] sm:$0xff]  ;;  %v8264_v42 = vld [vmem:[#allocation2 + $0x58] sm:$0xff] }
 0x6ba   :  { %v3976_v22 = vpop.f32.mrb[156].mxu1  ;;  %6333 = vmatprep.subr.bf16.mxu0 %v6332_v5  ;;  %v8268_v5 = vld [vmem:[#allocation2 + $0x60] sm:$0xff] }
 0x6bb   :  { %v3978_v53 = vpop.f32.mrb[157].mxu1  ;;  %6335 = vmatpush1.bf16.msra.mxu0 %v6334_v62  ;;  %v8260_v62 = vld [vmem:[#allocation2 + $0x50] sm:$0xff] }
 0x6be   :  { %v3982_v21 = vpop.f32.mrb[158].mxu1 }
 0x6bf   :  { %v6338_v0 = vpack.c.bf16 %v3982_v21, %v3976_v22  ;;  %v3984_v4 = vpop.f32.mrb[159].mxu1  ;;  %v8272_v22 = vld [vmem:[#allocation2 + $0x68] sm:$0xff] }
 0x6c0   :  { %v6336_v27 = vpack.c.bf16 %v3984_v4, %v3978_v53  ;;  %v8276_v53 = vld [vmem:[#allocation2 + $0x70] sm:$0xff]  ;;  %v4205_v4 = vld [vmem:[#allocation17 + $0x70] sm:$0xff] }
 0x6c1   :  { %v4222_v21 = vld [vmem:[#allocation17 + $0xf8] sm:$0xff] }
 0x6c2   :  { %6337 = vmatprep.subr.bf16.mxu0 %v6336_v27  ;;  %v4206_v27 = vld [vmem:[#allocation17 + $0x78] sm:$0xff] }
 0x6c3   :  { %6339 = vmatpush1.bf16.msra.mxu0 %v6338_v0  ;;  %v6368_v0 = vpack.c.bf16 %v4222_v21, %v4221_v26 }
 0x6c4   :  { %6341 = vmatprep.subr.bf16.mxu0 %v6340_v39  ;;  %v6370_v39 = vpack.c.bf16 %v4206_v27, %v4205_v4 }
 0x6c6   :  { %4063 = vmatmul.mubr.f32.vlgmr.msra.gmra.mrb[144].mxu0 %v8219_v48 }
 0x6c7   :  { %4068 = vmatprep.mubr.f32.mxu0 %v8477_v7  ;;  %6343 = vmatpush3.bf16.msra.mxu0 %v6342_v14 }
 0x6c8   :  { %6345 = vmatprep.subr.bf16.mxu0 %v6344_v50 }
 0x6ca   :  { %4069 = vmatmul.mubr.f32.gmra.mrb[146].mxu0 %v8224_v29 }
 0x6cb   :  { %4074 = vmatprep.mubr.f32.mxu0 %v8477_v7  ;;  %6347 = vmatpush3.bf16.msra.mxu0 %v6346_v34 }
 0x6cc   :  { %6349 = vmatprep.subr.bf16.mxu0 %v6348_v16 }
 0x6ce   :  { %4075 = vmatmul.mubr.f32.gmra.mrb[148].mxu0 %v8228_v25 }
 0x6cf   :  { %4080 = vmatprep.mubr.f32.mxu0 %v8477_v7  ;;  %6351 = vmatpush3.bf16.msra.mxu0 %v6350_v43 }
 0x6d0   :  { %6353 = vmatprep.subr.bf16.mxu0 %v6352_v12 }
 0x6d2   :  { %4081 = vmatmul.mubr.f32.gmra.mrb[150].mxu0 %v8232_v9 }
 0x6d3   :  { %4086 = vmatprep.mubr.f32.mxu0 %v8477_v7  ;;  %6355 = vmatpush3.bf16.msra.mxu0 %v6354_v57 }
 0x6d4   :  { %6357 = vmatprep.subr.bf16.mxu0 %v6356_v8 }
 0x6d6   :  { %4087 = vmatmul.mubr.f32.gmra.mrb[152].mxu0 %v8236_v19 }
 0x6d7   :  { %4092 = vmatprep.mubr.f32.mxu0 %v8477_v7  ;;  %6359 = vmatpush3.bf16.msra.mxu0 %v6358_v32 }
 0x6d8   :  { %6361 = vmatprep.subr.bf16.mxu0 %v6360_v35 }
 0x6da   :  { %4093 = vmatmul.mubr.f32.gmra.mrb[154].mxu0 %v8240_v59 }
 0x6db   :  { %4098 = vmatprep.mubr.f32.mxu0 %v8477_v7  ;;  %6363 = vmatpush3.bf16.msra.mxu0 %v6362_v45 }
 0x6dc   :  { %6365 = vmatprep.subr.bf16.mxu0 %v6364_v6 }
 0x6de   :  { %4099 = vmatmul.mubr.f32.gmra.mrb[156].mxu0 %v8244_v17 }
 0x6df   :  { %4104 = vmatprep.mubr.f32.mxu0 %v8477_v7  ;;  %6367 = vmatpush3.bf16.msra.mxu0 %v6366_v30 }
 0x6e0   :  { %6369 = vmatprep.subr.bf16.mxu0 %v6368_v0 }
 0x6e2   :  { %4105 = vmatmul.mubr.f32.gmra.mrb[158].mxu0 %v8248_v11 }
 0x6e3   :  { %4110 = vmatprep.mubr.f32.mxu0 %v8477_v7  ;;  %6371 = vmatpush3.bf16.msra.mxu0 %v6370_v39 }
 0x6e6   :  { %4111 = vmatmul.mubr.f32.gmra.mrb[160].mxu0 %v8252_v28 }
 0x6e7   :  { %4116 = vmatprep.mubr.f32.mxu0 %v8477_v7 }
 0x6ea   :  { %4117 = vmatmul.mubr.f32.gmra.mrb[162].mxu0 %v8256_v10 }
 0x6eb   :  { %4122 = vmatprep.mubr.f32.mxu0 %v8477_v7 }
 0x6ee   :  { %4123 = vmatmul.mubr.f32.gmra.mrb[164].mxu0 %v8260_v62 }
 0x6ef   :  { %4128 = vmatprep.mubr.f32.mxu0 %v8477_v7 }
 0x6f2   :  { %4129 = vmatmul.mubr.f32.gmra.mrb[166].mxu0 %v8264_v42 }
 0x6f3   :  { %4134 = vmatprep.mubr.f32.mxu0 %v8477_v7 }
 0x6f6   :  { %4135 = vmatmul.mubr.f32.gmra.mrb[168].mxu0 %v8268_v5 }
 0x6f7   :  { %4140 = vmatprep.mubr.f32.mxu0 %v8477_v7 }
 0x6fa   :  { %4141 = vmatmul.mubr.f32.gmra.mrb[170].mxu0 %v8272_v22 }
 0x6fb   :  { %4146 = vmatprep.mubr.f32.mxu0 %v8477_v7 }
 0x6fe   :  { %4147 = vmatmul.mubr.f32.gmra.mrb[172].mxu0 %v8276_v53 }
 0x6ff   :  { %4152 = vmatprep.mubr.f32.mxu0 %v8477_v7 }
 0x702   :  { %4153 = vmatmul.mubr.f32.gmra.mrb[174].mxu0 %v8280_v40 }
 0x799   :  { %v4064_v15 = vpop.f32.mrb[144].mxu0 }
 0x79a   :  { %v4065_v14 = vadd.f32 %v4064_v15, %v8284_v51  ;;  %v4066_v50 = vpop.f32.mrb[145].mxu0 }
 0x79b   :  { %v4067_v58 = vadd.f32 %v4066_v50, %v8287_v20 }
 0x79c   :  { %v4159_v24 = vmax.f32 %v4065_v14, 0.0 }
 0x79d   :  { %v4160_v31 = vmax.f32 %v4067_v58, 0.0  ;;  %v4070_v23 = vpop.f32.mrb[146].mxu0 }
 0x79e   :  { %v4071_v34 = vadd.f32 %v4070_v23, %v8284_v51  ;;  %v4072_v16 = vpop.f32.mrb[147].mxu0 }
 0x79f   :  { %v4073_v38 = vadd.f32 %v4072_v16, %v8287_v20  ;;  %4288 = vmatprep.mubr.f32.mxu0 %v4160_v31 }
 0x7a0   :  { %4289 = vmatmul.mubr.f32.vlgmr.msra.gmra.mrb[176].mxu0 %v4159_v24  ;;  %v4161_v41 = vmax.f32 %v4071_v34, 0.0 }
 0x7a1   :  { %v4162_v44 = vmax.f32 %v4073_v38, 0.0  ;;  %v4076_v63 = vpop.f32.mrb[148].mxu0 }
 0x7a2   :  { %v4077_v60 = vadd.f32 %v4076_v63, %v8284_v51  ;;  %v4078_v37 = vpop.f32.mrb[149].mxu0 }
 0x7a3   :  { %v4079_v43 = vadd.f32 %v4078_v37, %v8287_v20  ;;  %4293 = vmatprep.mubr.f32.mxu0 %v4162_v44 }
 0x7a4   :  { %4294 = vmatmul.mubr.f32.gmra.mrb[178].mxu0 %v4161_v41  ;;  %v4163_v1 = vmax.f32 %v4077_v60, 0.0 }
 0x7a5   :  { %v4164_v12 = vmax.f32 %v4079_v43, 0.0  ;;  %v4082_v46 = vpop.f32.mrb[150].mxu0 }
 0x7a6   :  { %v4083_v18 = vadd.f32 %v4082_v46, %v8284_v51  ;;  %v4084_v54 = vpop.f32.mrb[151].mxu0 }
 0x7a7   :  { %v4085_v57 = vadd.f32 %v4084_v54, %v8287_v20  ;;  %4298 = vmatprep.mubr.f32.mxu0 %v4164_v12 }
 0x7a8   :  { %4299 = vmatmul.mubr.f32.gmra.mrb[180].mxu0 %v4163_v1  ;;  %v4165_v52 = vmax.f32 %v4083_v18, 0.0 }
 0x7a9   :  { %v4166_v8 = vmax.f32 %v4085_v57, 0.0  ;;  %v4088_v55 = vpop.f32.mrb[152].mxu0 }
 0x7aa   :  { %v4089_v13 = vadd.f32 %v4088_v55, %v8284_v51  ;;  %v4090_v2 = vpop.f32.mrb[153].mxu0 }
 0x7ab   :  { %v4091_v32 = vadd.f32 %v4090_v2, %v8287_v20  ;;  %4303 = vmatprep.mubr.f32.mxu0 %v4166_v8 }
 0x7ac   :  { %4304 = vmatmul.mubr.f32.gmra.mrb[182].mxu0 %v4165_v52  ;;  %v4167_v47 = vmax.f32 %v4089_v13, 0.0 }
 0x7ad   :  { %v4168_v35 = vmax.f32 %v4091_v32, 0.0  ;;  %v4094_v36 = vpop.f32.mrb[154].mxu0 }
 0x7ae   :  { %v4095_v61 = vadd.f32 %v4094_v36, %v8284_v51  ;;  %v4096_v3 = vpop.f32.mrb[155].mxu0 }
 0x7af   :  { %v4097_v45 = vadd.f32 %v4096_v3, %v8287_v20  ;;  %4308 = vmatprep.mubr.f32.mxu0 %v4168_v35 }
 0x7b0   :  { %4309 = vmatmul.mubr.f32.gmra.mrb[184].mxu0 %v4167_v47  ;;  %v4169_v33 = vmax.f32 %v4095_v61, 0.0 }
 0x7b1   :  { %v4170_v6 = vmax.f32 %v4097_v45, 0.0  ;;  %v4100_v49 = vpop.f32.mrb[156].mxu0 }
 0x7b2   :  { %v4101_v30 = vadd.f32 %v4100_v49, %v8284_v51  ;;  %v4102_v26 = vpop.f32.mrb[157].mxu0 }
 0x7b3   :  { %v4103_v21 = vadd.f32 %v4102_v26, %v8287_v20  ;;  %4313 = vmatprep.mubr.f32.mxu0 %v4170_v6 }
 0x7b4   :  { %4314 = vmatmul.mubr.f32.gmra.mrb[186].mxu0 %v4169_v33  ;;  %v4171_v27 = vmax.f32 %v4101_v30, 0.0 }
 0x7b5   :  { %v4172_v0 = vmax.f32 %v4103_v21, 0.0  ;;  %v4106_v4 = vpop.f32.mrb[158].mxu0 }
 0x7b6   :  { %v4107_v39 = vadd.f32 %v4106_v4, %v8284_v51  ;;  %v4108_v56 = vpop.f32.mrb[159].mxu0 }
 0x7b7   :  { %v4109_v15 = vadd.f32 %v4108_v56, %v8287_v20  ;;  %4318 = vmatprep.mubr.f32.mxu0 %v4172_v0 }
 0x7b8   :  { %4319 = vmatmul.mubr.f32.gmra.mrb[188].mxu0 %v4171_v27  ;;  %v4173_v58 = vmax.f32 %v4107_v39, 0.0 }
 0x7b9   :  { %v4174_v14 = vmax.f32 %v4109_v15, 0.0  ;;  %v4112_v50 = vpop.f32.mrb[160].mxu0 }
 0x7ba   :  { %v4113_v31 = vadd.f32 %v4112_v50, %v8284_v51  ;;  %v4114_v23 = vpop.f32.mrb[161].mxu0 }
 0x7bb   :  { %v4115_v24 = vadd.f32 %v4114_v23, %v8287_v20  ;;  %4323 = vmatprep.mubr.f32.mxu0 %v4174_v14 }
 0x7bc   :  { %4324 = vmatmul.mubr.f32.gmra.mrb[190].mxu0 %v4173_v58  ;;  %v4175_v38 = vmax.f32 %v4113_v31, 0.0 }
 0x7bd   :  { %v4176_v34 = vmax.f32 %v4115_v24, 0.0  ;;  %v4118_v16 = vpop.f32.mrb[162].mxu0  ;;  %v4536_v24 = vld [vmem:[#allocation20] sm:$0xff] }
 0x7be   :  { %v4119_v44 = vadd.f32 %v4118_v16, %v8284_v51  ;;  %v4120_v63 = vpop.f32.mrb[163].mxu0  ;;  %v4538_v16 = vld [vmem:[#allocation20 + $0x10] sm:$0xff] }
 0x7bf   :  { %v4121_v41 = vadd.f32 %v4120_v63, %v8287_v20  ;;  %4328 = vmatprep.mubr.f32.mxu0 %v4176_v34  ;;  %v4537_v34 = vld [vmem:[#allocation20 + $0x8] sm:$0xff] }
 0x7c0   :  { %4329 = vmatmul.mubr.f32.gmra.mrb[192].mxu0 %v4175_v38  ;;  %v4177_v43 = vmax.f32 %v4119_v44, 0.0  ;;  %v6404_v38 = vpack.c.bf16 %v4537_v34, %v4536_v24  ;;  %v4539_v44 = vld [vmem:[#allocation20 + $0x18] sm:$0xff] }
 0x7c1   :  { %v4178_v60 = vmax.f32 %v4121_v41, 0.0  ;;  %v4124_v37 = vpop.f32.mrb[164].mxu0  ;;  %v6408_v63 = vpack.c.bf16 %v4539_v44, %v4538_v16  ;;  %v4540_v41 = vld [vmem:[#allocation20 + $0x20] sm:$0xff] }
 0x7c2   :  { %v4125_v12 = vadd.f32 %v4124_v37, %v8284_v51  ;;  %v4126_v46 = vpop.f32.mrb[165].mxu0  ;;  %6405 = vmatprep.subr.bf16.mxu0 %v6404_v38  ;;  %v4542_v37 = vld [vmem:[#allocation20 + $0x30] sm:$0xff] }
 0x7c3   :  { %v4127_v1 = vadd.f32 %v4126_v46, %v8287_v20  ;;  %4333 = vmatprep.mubr.f32.mxu0 %v4178_v60  ;;  %v4541_v60 = vld [vmem:[#allocation20 + $0x28] sm:$0xff]  ;;  %6407 = vmatpush3.bf16.msra.mxu0 %v6404_v38 }
 0x7c4   :  { %4334 = vmatmul.mubr.f32.gmra.mrb[194].mxu0 %v4177_v43  ;;  %v4179_v57 = vmax.f32 %v4125_v12, 0.0  ;;  %6409 = vmatprep.subr.bf16.mxu0 %v6408_v63  ;;  %v4544_v12 = vld [vmem:[#allocation20 + $0x40] sm:$0xff]  ;;  %v4545_v46 = vld [vmem:[#allocation20 + $0x48] sm:$0xff] }
 0x7c5   :  { %v4180_v18 = vmax.f32 %v4127_v1, 0.0  ;;  %v4130_v54 = vpop.f32.mrb[166].mxu0  ;;  %v6420_v1 = vpack.c.bf16 %v4545_v46, %v4544_v12 }
 0x7c6   :  { %v4131_v8 = vadd.f32 %v4130_v54, %v8284_v51  ;;  %v4132_v55 = vpop.f32.mrb[167].mxu0  ;;  %v4547_v54 = vld [vmem:[#allocation20 + $0x58] sm:$0xff] }
 0x7c7   :  { %v4133_v52 = vadd.f32 %v4132_v55, %v8287_v20  ;;  %4338 = vmatprep.mubr.f32.mxu0 %v4180_v18  ;;  %6411 = vmatpush3.bf16.msra.mxu0 %v6408_v63  ;;  %v4546_v18 = vld [vmem:[#allocation20 + $0x50] sm:$0xff]  ;;  %v4549_v55 = vld [vmem:[#allocation20 + $0x68] sm:$0xff] }
 0x7c8   :  { %4339 = vmatmul.mubr.f32.gmra.mrb[196].mxu0 %v4179_v57  ;;  %v4181_v32 = vmax.f32 %v4131_v8, 0.0  ;;  %v6424_v57 = vpack.c.bf16 %v4547_v54, %v4546_v18  ;;  %v4548_v8 = vld [vmem:[#allocation20 + $0x60] sm:$0xff] }
 0x7c9   :  { %v4182_v13 = vmax.f32 %v4133_v52, 0.0  ;;  %v4136_v2 = vpop.f32.mrb[168].mxu0  ;;  %v6428_v52 = vpack.c.bf16 %v4549_v55, %v4548_v8 }
 0x7ca   :  { %v4137_v35 = vadd.f32 %v4136_v2, %v8284_v51  ;;  %v4138_v36 = vpop.f32.mrb[169].mxu0 }
 0x7cb   :  { %v4139_v47 = vadd.f32 %v4138_v36, %v8287_v20  ;;  %4343 = vmatprep.mubr.f32.mxu0 %v4182_v13 }
 0x7cc   :  { %4344 = vmatmul.mubr.f32.gmra.mrb[198].mxu0 %v4181_v32  ;;  %v4183_v45 = vmax.f32 %v4137_v35, 0.0 }
 0x7cd   :  { %v4184_v61 = vmax.f32 %v4139_v47, 0.0  ;;  %v4142_v3 = vpop.f32.mrb[170].mxu0 }
 0x7ce   :  { %v4143_v6 = vadd.f32 %v4142_v3, %v8284_v51  ;;  %v4144_v49 = vpop.f32.mrb[171].mxu0 }
 0x7cf   :  { %v4145_v33 = vadd.f32 %v4144_v49, %v8287_v20  ;;  %4348 = vmatprep.mubr.f32.mxu0 %v4184_v61 }
 0x7d0   :  { %4349 = vmatmul.mubr.f32.gmra.mrb[200].mxu0 %v4183_v45  ;;  %v4185_v21 = vmax.f32 %v4143_v6, 0.0 }
 0x7d1   :  { %v4186_v30 = vmax.f32 %v4145_v33, 0.0  ;;  %v4148_v26 = vpop.f32.mrb[172].mxu0 }
 0x7d2   :  { %v4149_v0 = vadd.f32 %v4148_v26, %v8284_v51  ;;  %v4150_v4 = vpop.f32.mrb[173].mxu0 }
 0x7d3   :  { %v4151_v27 = vadd.f32 %v4150_v4, %v8287_v20  ;;  %4353 = vmatprep.mubr.f32.mxu0 %v4186_v30 }
 0x7d4   :  { %4354 = vmatmul.mubr.f32.gmra.mrb[202].mxu0 %v4185_v21  ;;  %v4187_v15 = vmax.f32 %v4149_v0, 0.0 }
 0x7d5   :  { %v4188_v39 = vmax.f32 %v4151_v27, 0.0  ;;  %v4154_v56 = vpop.f32.mrb[174].mxu0 }
 0x7d6   :  { %v4155_v14 = vadd.f32 %v4154_v56, %v8284_v51  ;;  %v4156_v50 = vpop.f32.mrb[175].mxu0  ;;  %v6412_v51 = vpack.c.bf16 %v4541_v60, %v4540_v41 }
 0x7d7   :  { %v4157_v58 = vadd.f32 %v4156_v50, %v8287_v20  ;;  %4358 = vmatprep.mubr.f32.mxu0 %v4188_v39  ;;  %v4543_v20 = vld [vmem:[#allocation20 + $0x38] sm:$0xff] }
 0x7d8   :  { %4359 = vmatmul.mubr.f32.gmra.mrb[204].mxu0 %v4187_v15  ;;  %v4189_v23 = vmax.f32 %v4155_v14, 0.0  ;;  %6413 = vmatprep.subr.bf16.mxu0 %v6412_v51  ;;  %v6416_v43 = vpack.c.bf16 %v4543_v20, %v4542_v37 }
 0x7d9   :  { %v4190_v31 = vmax.f32 %v4157_v58, 0.0  ;;  %6415 = vmatpush3.bf16.msra.mxu0 %v6412_v51 }
 0x7da   :  { %6417 = vmatprep.subr.bf16.mxu0 %v6416_v43 }
 0x7db   :  { %4363 = vmatprep.mubr.f32.mxu0 %v4190_v31 }
 0x7dc   :  { %4364 = vmatmul.mubr.f32.gmra.mrb[206].mxu0 %v4189_v23 }
 0x7dd   :  { %6419 = vmatpush3.bf16.msra.mxu0 %v6416_v43 }
 0x7de   :  { %6421 = vmatprep.subr.bf16.mxu0 %v6420_v1 }
 0x7e1   :  { %6423 = vmatpush3.bf16.msra.mxu0 %v6420_v1 }
 0x7e2   :  { %6425 = vmatprep.subr.bf16.mxu0 %v6424_v57 }
 0x7e5   :  { %6427 = vmatpush3.bf16.msra.mxu0 %v6424_v57 }
 0x7e6   :  { %6429 = vmatprep.subr.bf16.mxu0 %v6428_v52 }
 0x7e9   :  { %6431 = vmatpush3.bf16.msra.mxu0 %v6428_v52 }
 0x873   :  { %v5024_v13 = vpop.f32.mrb[176].mxu0 }
 0x874   :  { %v5025_v2 = vpop.f32.mrb[177].mxu0 }
 0x875   :  { %v5026_v32 = vadd.f32 %v5025_v2, %v5024_v13 }
 0x877   :  { %v5027_v35 = vpop.f32.mrb[178].mxu0 }
 0x878   :  { %v5028_v36 = vpop.f32.mrb[179].mxu0 }
 0x879   :  { %v5029_v47 = vadd.f32 %v5028_v36, %v5027_v35 }
 0x87b   :  { %v6372_v61 = vpack.c.bf16 %v5029_v47, %v5026_v32  ;;  %v5030_v3 = vpop.f32.mrb[180].mxu0 }
 0x87c   :  { %v5031_v45 = vpop.f32.mrb[181].mxu0 }
 0x87d   :  { %v5032_v6 = vadd.f32 %v5031_v45, %v5030_v3  ;;  %6373 = vmatprep.subr.bf16.mxu1 %v6372_v61 }
 0x87e   :  { %6375 = vmatpush3.bf16.msra.mxu1 %v6372_v61 }
 0x87f   :  { %v5033_v49 = vpop.f32.mrb[182].mxu0 }
 0x880   :  { %v5034_v33 = vpop.f32.mrb[183].mxu0 }
 0x881   :  { %v5035_v30 = vadd.f32 %v5034_v33, %v5033_v49  ;;  %v4551_v49 = vld [vmem:[#allocation20 + $0x78] sm:$0xff] }
 0x883   :  { %v6376_v26 = vpack.c.bf16 %v5035_v30, %v5032_v6  ;;  %v5036_v21 = vpop.f32.mrb[184].mxu0  ;;  %v4550_v6 = vld [vmem:[#allocation20 + $0x70] sm:$0xff]  ;;  %v4958_v30 = vld [vmem:[#allocation19] ss:$0 sm:$0xff] }
 0x884   :  { %v5037_v0 = vpop.f32.mrb[185].mxu0  ;;  %v6432_v33 = vpack.c.bf16 %v4551_v49, %v4550_v6 }
 0x885   :  { %v5038_v4 = vadd.f32 %v5037_v0, %v5036_v21  ;;  %6377 = vmatprep.subr.bf16.mxu1 %v6376_v26 }
 0x886   :  { %6379 = vmatpush3.bf16.msra.mxu1 %v6376_v26  ;;  %6433 = vmatprep.subr.bf16.mxu0 %v6432_v33 }
 0x887   :  { %v5039_v27 = vpop.f32.mrb[186].mxu0  ;;  %6435 = vmatpush3.bf16.msra.mxu0 %v6432_v33 }
 0x888   :  { %v5040_v39 = vpop.f32.mrb[187].mxu0 }
 0x889   :  { %v5041_v56 = vadd.f32 %v5040_v39, %v5039_v27 }
 0x88b   :  { %v6380_v15 = vpack.c.bf16 %v5041_v56, %v5038_v4  ;;  %v5042_v14 = vpop.f32.mrb[188].mxu0 }
 0x88c   :  { %v5043_v50 = vpop.f32.mrb[189].mxu0 }
 0x88d   :  { %v5044_v58 = vadd.f32 %v5043_v50, %v5042_v14  ;;  %6381 = vmatprep.subr.bf16.mxu1 %v6380_v15 }
 0x88e   :  { %6383 = vmatpush3.bf16.msra.mxu1 %v6380_v15 }
 0x88f   :  { %v5045_v31 = vpop.f32.mrb[190].mxu0 }
 0x890   :  { %v5046_v23 = vpop.f32.mrb[191].mxu0 }
 0x891   :  { %v5047_v24 = vadd.f32 %v5046_v23, %v5045_v31 }
 0x893   :  { %v6384_v34 = vpack.c.bf16 %v5047_v24, %v5044_v58  ;;  %v5048_v16 = vpop.f32.mrb[192].mxu0 }
 0x894   :  { %v5049_v38 = vpop.f32.mrb[193].mxu0 }
 0x895   :  { %v5050_v44 = vadd.f32 %v5049_v38, %v5048_v16  ;;  %6385 = vmatprep.subr.bf16.mxu1 %v6384_v34 }
 0x896   :  { %6387 = vmatpush3.bf16.msra.mxu1 %v6384_v34 }
 0x897   :  { %v5051_v63 = vpop.f32.mrb[194].mxu0 }
 0x898   :  { %v5052_v41 = vpop.f32.mrb[195].mxu0 }
 0x899   :  { %v5053_v60 = vadd.f32 %v5052_v41, %v5051_v63 }
 0x89b   :  { %v6388_v51 = vpack.c.bf16 %v5053_v60, %v5050_v44  ;;  %v5054_v37 = vpop.f32.mrb[196].mxu0 }
 0x89c   :  { %v5055_v20 = vpop.f32.mrb[197].mxu0 }
 0x89d   :  { %v5056_v43 = vadd.f32 %v5055_v20, %v5054_v37  ;;  %6389 = vmatprep.subr.bf16.mxu1 %v6388_v51 }
 0x89e   :  { %6391 = vmatpush3.bf16.msra.mxu1 %v6388_v51 }
 0x89f   :  { %v5057_v12 = vpop.f32.mrb[198].mxu0 }
 0x8a0   :  { %v5058_v46 = vpop.f32.mrb[199].mxu0 }
 0x8a1   :  { %v5059_v1 = vadd.f32 %v5058_v46, %v5057_v12 }
 0x8a3   :  { %v6392_v18 = vpack.c.bf16 %v5059_v1, %v5056_v43  ;;  %v5060_v54 = vpop.f32.mrb[200].mxu0 }
 0x8a4   :  { %v5061_v57 = vpop.f32.mrb[201].mxu0 }
 0x8a5   :  { %v5062_v8 = vadd.f32 %v5061_v57, %v5060_v54  ;;  %6393 = vmatprep.subr.bf16.mxu1 %v6392_v18 }
 0x8a6   :  { %6395 = vmatpush3.bf16.msra.mxu1 %v6392_v18 }
 0x8a7   :  { %v5063_v55 = vpop.f32.mrb[202].mxu0 }
 0x8a8   :  { %v5064_v52 = vpop.f32.mrb[203].mxu0 }
 0x8a9   :  { %v5065_v13 = vadd.f32 %v5064_v52, %v5063_v55 }
 0x8ab   :  { %v6396_v2 = vpack.c.bf16 %v5065_v13, %v5062_v8  ;;  %v5066_v32 = vpop.f32.mrb[204].mxu0 }
 0x8ac   :  { %v5067_v35 = vpop.f32.mrb[205].mxu0 }
 0x8ad   :  { %v5068_v36 = vadd.f32 %v5067_v35, %v5066_v32  ;;  %6397 = vmatprep.subr.bf16.mxu1 %v6396_v2 }
 0x8ae   :  { %6399 = vmatpush3.bf16.msra.mxu1 %v6396_v2 }
 0x8af   :  { %v5069_v47 = vpop.f32.mrb[206].mxu0 }
 0x8b0   :  { %v5070_v61 = vpop.f32.mrb[207].mxu0 }
 0x8b1   :  { %v5071_v3 = vadd.f32 %v5070_v61, %v5069_v47 }
 0x8b3   :  { %v6400_v45 = vpack.c.bf16 %v5071_v3, %v5068_v36 }
 0x8b5   :  { %6401 = vmatprep.subr.bf16.mxu1 %v6400_v45 }
 0x8b6   :  { %6403 = vmatpush3.bf16.msra.mxu1 %v6400_v45 }
 0x8b9   :  { %5274 = vmatmul.mubr.f32.vlgmr.msra.gmra.mrb[160].mxu1 %v8224_v29 }
 0x8ba   :  { %5276 = vmatprep.mubr.f32.mxu1 %v8228_v25 }
 0x8bd   :  { %5277 = vmatmul.mubr.f32.gmra.mrb[162].mxu1 %v8232_v9 }
 0x8be   :  { %5279 = vmatprep.mubr.f32.mxu1 %v8236_v19 }
 0x8c1   :  { %5280 = vmatmul.mubr.f32.gmra.mrb[164].mxu1 %v8240_v59 }
 0x8c2   :  { %5282 = vmatprep.mubr.f32.mxu1 %v8244_v17 }
 0x8c5   :  { %5283 = vmatmul.mubr.f32.gmra.mrb[166].mxu1 %v8248_v11 }
 0x8c6   :  { %5285 = vmatprep.mubr.f32.mxu1 %v8252_v28 }
 0x8c9   :  { %5286 = vmatmul.mubr.f32.gmra.mrb[168].mxu1 %v8256_v10 }
 0x8ca   :  { %5288 = vmatprep.mubr.f32.mxu1 %v8260_v62 }
 0x8cd   :  { %5289 = vmatmul.mubr.f32.gmra.mrb[170].mxu1 %v8264_v42 }
 0x8ce   :  { %5291 = vmatprep.mubr.f32.mxu1 %v8268_v5 }
 0x8d1   :  { %5292 = vmatmul.mubr.f32.gmra.mrb[172].mxu1 %v8272_v22 }
 0x8d2   :  { %5294 = vmatprep.mubr.f32.mxu1 %v8276_v53 }
 0x8d5   :  { %5295 = vmatmul.mubr.f32.gmra.mrb[174].mxu1 %v8280_v40 }
 0x8d6   :  { %5385 = vmatprep.mubr.f32.mxu1 %v8219_v48 }
 0x98c   :  { %v5275_v26 = vpop.f32.mrb[160].mxu1 }
 0x98d   :  { %v4447_v21 = vadd.f32 %v5275_v26, %v4958_v30  ;;  %v4441_v0 = vpop.f32.mrb[161].mxu1 }
 0x98e   :  { %v4442_v4 = vadd.f32 %v4958_v30, %v4441_v0 }
 0x98f   :  { %v4521_v56 = vmax.f32 %v4447_v21, 0.0 }
 0x990   :  { %v4520_v27 = vmax.f32 %v4442_v4, 0.0  ;;  %v5278_v39 = vpop.f32.mrb[162].mxu1 }
 0x991   :  { %v4457_v15 = vadd.f32 %v5278_v39, %v4958_v30  ;;  %v4451_v14 = vpop.f32.mrb[163].mxu1 }
 0x992   :  { %v4452_v50 = vadd.f32 %v4958_v30, %v4451_v14  ;;  %5329 = vmatprep.mubr.f32.mxu0 %v4520_v27 }
 0x993   :  { %5330 = vmatmul.mubr.f32.vlgmr.msra.gmra.mrb[208].mxu0 %v4521_v56  ;;  %v4523_v31 = vmax.f32 %v4457_v15, 0.0 }
 0x994   :  { %v4522_v58 = vmax.f32 %v4452_v50, 0.0  ;;  %v5281_v48 = vpop.f32.mrb[164].mxu1 }
 0x995   :  { %v4467_v23 = vadd.f32 %v5281_v48, %v4958_v30  ;;  %v4461_v24 = vpop.f32.mrb[165].mxu1 }
 0x996   :  { %v4462_v34 = vadd.f32 %v4958_v30, %v4461_v24  ;;  %5332 = vmatprep.mubr.f32.mxu0 %v4522_v58 }
 0x997   :  { %5333 = vmatmul.mubr.f32.gmra.mrb[210].mxu0 %v4523_v31  ;;  %v4525_v44 = vmax.f32 %v4467_v23, 0.0 }
 0x998   :  { %v4524_v16 = vmax.f32 %v4462_v34, 0.0  ;;  %v5284_v38 = vpop.f32.mrb[166].mxu1 }
 0x999   :  { %v4477_v63 = vadd.f32 %v5284_v38, %v4958_v30  ;;  %v4471_v41 = vpop.f32.mrb[167].mxu1 }
 0x99a   :  { %v4472_v60 = vadd.f32 %v4958_v30, %v4471_v41  ;;  %5335 = vmatprep.mubr.f32.mxu0 %v4524_v16 }
 0x99b   :  { %5336 = vmatmul.mubr.f32.gmra.mrb[212].mxu0 %v4525_v44  ;;  %v4527_v20 = vmax.f32 %v4477_v63, 0.0 }
 0x99c   :  { %v4526_v51 = vmax.f32 %v4472_v60, 0.0  ;;  %v5287_v37 = vpop.f32.mrb[168].mxu1 }
 0x99d   :  { %v4487_v43 = vadd.f32 %v5287_v37, %v4958_v30  ;;  %v4481_v12 = vpop.f32.mrb[169].mxu1 }
 0x99e   :  { %v4482_v46 = vadd.f32 %v4958_v30, %v4481_v12  ;;  %5338 = vmatprep.mubr.f32.mxu0 %v4526_v51 }
 0x99f   :  { %5339 = vmatmul.mubr.f32.gmra.mrb[214].mxu0 %v4527_v20  ;;  %v4529_v54 = vmax.f32 %v4487_v43, 0.0 }
 0x9a0   :  { %v4528_v1 = vmax.f32 %v4482_v46, 0.0  ;;  %v5290_v18 = vpop.f32.mrb[170].mxu1 }
 0x9a1   :  { %v4497_v57 = vadd.f32 %v5290_v18, %v4958_v30  ;;  %v4491_v8 = vpop.f32.mrb[171].mxu1 }
 0x9a2   :  { %v4492_v55 = vadd.f32 %v4958_v30, %v4491_v8  ;;  %5341 = vmatprep.mubr.f32.mxu0 %v4528_v1 }
 0x9a3   :  { %5342 = vmatmul.mubr.f32.gmra.mrb[216].mxu0 %v4529_v54  ;;  %v4531_v2 = vmax.f32 %v4497_v57, 0.0 }
 0x9a4   :  { %v4530_v52 = vmax.f32 %v4492_v55, 0.0  ;;  %v5293_v13 = vpop.f32.mrb[172].mxu1 }
 0x9a5   :  { %v4507_v32 = vadd.f32 %v5293_v13, %v4958_v30  ;;  %v4501_v35 = vpop.f32.mrb[173].mxu1 }
 0x9a6   :  { %v4502_v36 = vadd.f32 %v4958_v30, %v4501_v35  ;;  %5344 = vmatprep.mubr.f32.mxu0 %v4530_v52 }
 0x9a7   :  { %5345 = vmatmul.mubr.f32.gmra.mrb[218].mxu0 %v4531_v2  ;;  %v4533_v3 = vmax.f32 %v4507_v32, 0.0 }
 0x9a8   :  { %v4532_v47 = vmax.f32 %v4502_v36, 0.0  ;;  %v5296_v61 = vpop.f32.mrb[174].mxu1 }
 0x9a9   :  { %v4517_v45 = vadd.f32 %v5296_v61, %v4958_v30  ;;  %v4511_v6 = vpop.f32.mrb[175].mxu1 }
 0x9aa   :  { %v4512_v49 = vadd.f32 %v4958_v30, %v4511_v6  ;;  %5347 = vmatprep.mubr.f32.mxu0 %v4532_v47 }
 0x9ab   :  { %5348 = vmatmul.mubr.f32.gmra.mrb[220].mxu0 %v4533_v3  ;;  %v4535_v26 = vmax.f32 %v4517_v45, 0.0 }
 0x9ac   :  { %v4534_v33 = vmax.f32 %v4512_v49, 0.0 }
 0x9ae   :  { %5350 = vmatprep.mubr.f32.mxu0 %v4534_v33 }
 0x9af   :  { %5351 = vmatmul.mubr.f32.gmra.mrb[222].mxu0 %v4535_v26 }
 0x9b0   :  { %5441 = vmatprep.mubr.msk.f32.mxu0 %vm7121_vm0, %v8477_v7 }
 0xa66   :  { %v5331_v21 = vpop.f32.mrb[208].mxu0 }
 0xa67   :  { %v4619_v0 = vpop.f32.mrb[209].mxu0 }
 0xa68   :  { %v6436_v4 = vpack.c.bf16 %v5331_v21, %v4619_v0 }
 0xa6a   :  { %v5334_v27 = vpop.f32.mrb[210].mxu0  ;;  %6437 = vmatprep.subr.bf16.mxu1 %v6436_v4 }
 0xa6b   :  { %v4629_v39 = vpop.f32.mrb[211].mxu0  ;;  %6439 = vmatpush3.bf16.msra.mxu1 %v6436_v4 }
 0xa6c   :  { %v6440_v56 = vpack.c.bf16 %v5334_v27, %v4629_v39 }
 0xa6e   :  { %v5337_v15 = vpop.f32.mrb[212].mxu0  ;;  %6441 = vmatprep.subr.bf16.mxu1 %v6440_v56 }
 0xa6f   :  { %v4639_v14 = vpop.f32.mrb[213].mxu0  ;;  %6443 = vmatpush3.bf16.msra.mxu1 %v6440_v56 }
 0xa70   :  { %v6444_v50 = vpack.c.bf16 %v5337_v15, %v4639_v14 }
 0xa72   :  { %v5340_v30 = vpop.f32.mrb[214].mxu0  ;;  %6445 = vmatprep.subr.bf16.mxu1 %v6444_v50 }
 0xa73   :  { %v4649_v58 = vpop.f32.mrb[215].mxu0  ;;  %6447 = vmatpush3.bf16.msra.mxu1 %v6444_v50 }
 0xa74   :  { %v6448_v48 = vpack.c.bf16 %v5340_v30, %v4649_v58 }
 0xa76   :  { %v5343_v31 = vpop.f32.mrb[216].mxu0  ;;  %6449 = vmatprep.subr.bf16.mxu1 %v6448_v48 }
 0xa77   :  { %v4659_v23 = vpop.f32.mrb[217].mxu0  ;;  %6451 = vmatpush3.bf16.msra.mxu1 %v6448_v48 }
 0xa78   :  { %v6452_v24 = vpack.c.bf16 %v5343_v31, %v4659_v23 }
 0xa7a   :  { %v5346_v34 = vpop.f32.mrb[218].mxu0  ;;  %6453 = vmatprep.subr.bf16.mxu1 %v6452_v24 }
 0xa7b   :  { %v4669_v16 = vpop.f32.mrb[219].mxu0  ;;  %6455 = vmatpush3.bf16.msra.mxu1 %v6452_v24 }
 0xa7c   :  { %v6456_v38 = vpack.c.bf16 %v5346_v34, %v4669_v16 }
 0xa7e   :  { %v5349_v44 = vpop.f32.mrb[220].mxu0  ;;  %6457 = vmatprep.subr.bf16.mxu1 %v6456_v38 }
 0xa7f   :  { %v4679_v63 = vpop.f32.mrb[221].mxu0  ;;  %6459 = vmatpush3.bf16.msra.mxu1 %v6456_v38 }
 0xa80   :  { %v6460_v41 = vpack.c.bf16 %v5349_v44, %v4679_v63  ;;  %v4865_v44 = vld [vmem:[#allocation5] sm:$0xff] }
 0xa82   :  { %v5352_v60 = vpop.f32.mrb[222].mxu0  ;;  %6461 = vmatprep.subr.bf16.mxu1 %v6460_v41 }
 0xa83   :  { %v4689_v51 = vpop.f32.mrb[223].mxu0  ;;  %6463 = vmatpush3.bf16.msra.mxu1 %v6460_v41 }
 0xa84   :  { %v6464_v37 = vpack.c.bf16 %v5352_v60, %v4689_v51 }
 0xa86   :  { %6465 = vmatprep.subr.bf16.mxu1 %v6464_v37 }
 0xa87   :  { %6467 = vmatpush3.bf16.msra.mxu1 %v6464_v37 }
 0xa8a   :  { %5386 = vmatmul.mubr.f32.vlgmr.msra.gmra.mrb[176].mxu1 %v8224_v29  ;;  %v7120_v29 = vmov 0.0|0.0  }
 0xa8b   :  { %5388 = vmatprep.mubr.f32.mxu1 %v8228_v25  ;;  %6468 = vmatprep.subr.bf16.mxu0 %v7120_v29  ;;  %v8354_v25 = vld [vmem:[#allocation22] ss:$0 sm:$0xff] }
 0xa8e   :  { %5389 = vmatmul.mubr.f32.gmra.mrb[178].mxu1 %v8232_v9 }
 0xa8f   :  { %5391 = vmatprep.mubr.f32.mxu1 %v8236_v19 }
 0xa92   :  { %5392 = vmatmul.mubr.f32.gmra.mrb[180].mxu1 %v8240_v59 }
 0xa93   :  { %5394 = vmatprep.mubr.f32.mxu1 %v8244_v17 }
 0xa96   :  { %5395 = vmatmul.mubr.f32.gmra.mrb[182].mxu1 %v8248_v11 }
 0xa97   :  { %5397 = vmatprep.mubr.f32.mxu1 %v8252_v28 }
 0xa9a   :  { %5398 = vmatmul.mubr.f32.gmra.mrb[184].mxu1 %v8256_v10 }
 0xa9b   :  { %5400 = vmatprep.mubr.f32.mxu1 %v8260_v62 }
 0xa9e   :  { %5401 = vmatmul.mubr.f32.gmra.mrb[186].mxu1 %v8264_v42 }
 0xa9f   :  { %5403 = vmatprep.mubr.f32.mxu1 %v8268_v5 }
 0xaa2   :  { %5404 = vmatmul.mubr.f32.gmra.mrb[188].mxu1 %v8272_v22 }
 0xaa3   :  { %5406 = vmatprep.mubr.f32.mxu1 %v8276_v53 }
 0xaa6   :  { %5407 = vmatmul.mubr.f32.gmra.mrb[190].mxu1 %v8280_v40 }
 0xb5d   :  { %v5387_v9 = vpop.f32.mrb[176].mxu1 }
 0xb5e   :  { %v4776_v19 = vadd.f32 %v5387_v9, %v8354_v25  ;;  %v4770_v59 = vpop.f32.mrb[177].mxu1 }
 0xb5f   :  { %v4771_v17 = vadd.f32 %v8354_v25, %v4770_v59 }
 0xb60   :  { %v4850_v11 = vmax.f32 %v4776_v19, 0.0 }
 0xb61   :  { %v4849_v28 = vmax.f32 %v4771_v17, 0.0  ;;  %v5390_v10 = vpop.f32.mrb[178].mxu1 }
 0xb62   :  { %v4786_v62 = vadd.f32 %v5390_v10, %v8354_v25  ;;  %v4780_v42 = vpop.f32.mrb[179].mxu1 }
 0xb63   :  { %v6469_v5 = vpack.c.bf16 %v4850_v11, %v4849_v28  ;;  %v4781_v22 = vadd.f32 %v8354_v25, %v4780_v42 }
 0xb64   :  { %v4852_v53 = vmax.f32 %v4786_v62, 0.0 }
 0xb65   :  { %v4851_v40 = vmax.f32 %v4781_v22, 0.0  ;;  %v5393_v7 = vpop.f32.mrb[180].mxu1  ;;  %6470 = vmatpush3.bf16.msra.mxu0 %v6469_v5 }
 0xb66   :  { %v4796_v20 = vadd.f32 %v5393_v7, %v8354_v25  ;;  %v4790_v43 = vpop.f32.mrb[181].mxu1  ;;  %6471 = vmatprep.subr.bf16.mxu0 %v7120_v29 }
 0xb67   :  { %v6472_v12 = vpack.c.bf16 %v4852_v53, %v4851_v40  ;;  %v4791_v46 = vadd.f32 %v8354_v25, %v4790_v43 }
 0xb68   :  { %v4854_v1 = vmax.f32 %v4796_v20, 0.0 }
 0xb69   :  { %v4853_v18 = vmax.f32 %v4791_v46, 0.0  ;;  %v5396_v54 = vpop.f32.mrb[182].mxu1  ;;  %6473 = vmatpush3.bf16.msra.mxu0 %v6472_v12 }
 0xb6a   :  { %v4806_v57 = vadd.f32 %v5396_v54, %v8354_v25  ;;  %v4800_v8 = vpop.f32.mrb[183].mxu1  ;;  %6474 = vmatprep.subr.bf16.mxu0 %v7120_v29 }
 0xb6b   :  { %v6475_v55 = vpack.c.bf16 %v4854_v1, %v4853_v18  ;;  %v4801_v52 = vadd.f32 %v8354_v25, %v4800_v8 }
 0xb6c   :  { %v4856_v13 = vmax.f32 %v4806_v57, 0.0 }
 0xb6d   :  { %v4855_v2 = vmax.f32 %v4801_v52, 0.0  ;;  %v5399_v32 = vpop.f32.mrb[184].mxu1  ;;  %6476 = vmatpush3.bf16.msra.mxu0 %v6475_v55 }
 0xb6e   :  { %v4816_v35 = vadd.f32 %v5399_v32, %v8354_v25  ;;  %v4810_v36 = vpop.f32.mrb[185].mxu1  ;;  %6477 = vmatprep.subr.bf16.mxu0 %v7120_v29 }
 0xb6f   :  { %v6478_v47 = vpack.c.bf16 %v4856_v13, %v4855_v2  ;;  %v4811_v61 = vadd.f32 %v8354_v25, %v4810_v36 }
 0xb70   :  { %v4858_v3 = vmax.f32 %v4816_v35, 0.0 }
 0xb71   :  { %v4857_v45 = vmax.f32 %v4811_v61, 0.0  ;;  %v5402_v6 = vpop.f32.mrb[186].mxu1  ;;  %6479 = vmatpush3.bf16.msra.mxu0 %v6478_v47 }
 0xb72   :  { %v4826_v49 = vadd.f32 %v5402_v6, %v8354_v25  ;;  %v4820_v33 = vpop.f32.mrb[187].mxu1  ;;  %6480 = vmatprep.subr.bf16.mxu0 %v7120_v29 }
 0xb73   :  { %v6481_v26 = vpack.c.bf16 %v4858_v3, %v4857_v45  ;;  %v4821_v21 = vadd.f32 %v8354_v25, %v4820_v33 }
 0xb74   :  { %v4860_v0 = vmax.f32 %v4826_v49, 0.0 }
 0xb75   :  { %v4859_v4 = vmax.f32 %v4821_v21, 0.0  ;;  %v5405_v27 = vpop.f32.mrb[188].mxu1  ;;  %6482 = vmatpush3.bf16.msra.mxu0 %v6481_v26 }
 0xb76   :  { %v4836_v39 = vadd.f32 %v5405_v27, %v8354_v25  ;;  %v4830_v56 = vpop.f32.mrb[189].mxu1  ;;  %6483 = vmatprep.subr.bf16.mxu0 %v7120_v29 }
 0xb77   :  { %v6484_v15 = vpack.c.bf16 %v4860_v0, %v4859_v4  ;;  %v4831_v14 = vadd.f32 %v8354_v25, %v4830_v56 }
 0xb78   :  { %v4862_v50 = vmax.f32 %v4836_v39, 0.0 }
 0xb79   :  { %v4861_v30 = vmax.f32 %v4831_v14, 0.0  ;;  %v5408_v58 = vpop.f32.mrb[190].mxu1  ;;  %6485 = vmatpush3.bf16.msra.mxu0 %v6484_v15 }
 0xb7a   :  { %v4846_v48 = vadd.f32 %v5408_v58, %v8354_v25  ;;  %v4840_v31 = vpop.f32.mrb[191].mxu1  ;;  %6486 = vmatprep.subr.bf16.mxu0 %v7120_v29 }
 0xb7b   :  { %v6487_v23 = vpack.c.bf16 %v4862_v50, %v4861_v30  ;;  %v4841_v24 = vadd.f32 %v8354_v25, %v4840_v31 }
 0xb7c   :  { %v4864_v34 = vmax.f32 %v4846_v48, 0.0 }
 0xb7d   :  { %v4863_v16 = vmax.f32 %v4841_v24, 0.0  ;;  %6488 = vmatpush3.bf16.msra.mxu0 %v6487_v23 }
 0xb7e   :  { %6489 = vmatprep.subr.bf16.mxu0 %v7120_v29 }
 0xb7f   :  { %v6490_v38 = vpack.c.bf16 %v4864_v34, %v4863_v16 }
 0xb81   :  { %6491 = vmatpush3.bf16.msra.mxu0 %v6490_v38 }
 0xb84   :  { %5442 = vmatmul.mubr.f32.vlgmr.msra.gmra.mrb[224].mxu0 %v4865_v44 }
 0xc57   :  { %v4932_v63 = vpop.f32.mrb[224].mxu0 }
 0xc58   :  { %4936 = vst [vmem:[#allocation23] sm:$0xff] %v4932_v63  ;;  %v5443_v41 = vpop.f32.mrb[225].mxu0 }
 0xc59   :  { %7071 = shalt.err (!%p7068_p10)
}
 0xc5a   :  { %s7072_s18 = scalar_lea.hbm %s8404_s13, 128 }
 0xc5b   :  { %p7073_p11 = scmp.ne.s32.totalorder %s8404_s13, %s7072_s18  ;;  %p7076_p12 = scmp.lt.u32.totalorder %s7072_s18, %s8404_s13 }
 0xc5d   :  { %p7078_p13 = pnand %p7076_p12, %p7073_p11 }
 0xc5f   :  { %7081 = shalt.err (!%p7078_p13)
}
 0xc60   :  { %4946 = dma.vmem_to_hbm [thread:$0]  %s4944_s11, 128, %s8404_s13, [#allocation4]  }
 0xc61   :  { %7096 = dma.done.wait [#allocation4], 128  }
 0xc62   :  { %7097 = vsyncadd [#allocation4], 4294967168 }
 0xc63   :  { %4950 = vsyncpa [#allocation3], 1 }
 0xc64   :  { %4951 = vsyncpa [#allocation6], 1 }
 0xc65   :  { %4952 = vsyncpa [#allocation9], 1 }
 0xc66   :  { %4953 = vsyncpa [#allocation12], 1 }
 0xc67   :  { %4954 = vsyncpa [#allocation15], 1 }
 0xc68   :  { %4955 = vsyncpa [#allocation18], 1 }
 0xc69   :  { %4956 = vsyncpa [#allocation21], 1 }
 0xc6a   :  { %4957 = vsyncpa [#allocation4], 1 }

</bundles_post_ra>
